<compile_context>
chip_gen: v6e
topology: v6e:2x2x1
jax: 0.10.0
libtpu: 0.0.40
codegen_flags: <defaults>
</compile_context>

<pallas_src>
import functools
import math

import jax
import jax.numpy as jnp
from jax import lax
from jax.experimental import pallas as pl
from jax.experimental.pallas import tpu as pltpu  # noqa: F401  (TPU backend)

# ----------------------------- model sizes ---------------------------------
B = 2            # batch
L = 1024         # audio samples
D_LING = 32      # linguistic feature dim
T_LING = 16      # linguistic tokens
FRAME_LEN = 64   # mel "frame" length (L // T_MEL)
T_MEL = L // FRAME_LEN
N_MELS = 32
F_TOTAL = 48     # total CQT bins
T_CQT = 16       # CQT frames
PITCH_FREQ = 32  # bins fed to the pitch encoder
PERIODS = (2, 4)
DISC_C1 = 16
DISC_C2 = 16

# metrics-vector lane layout (output of the fused kernel)
_IDX_LOSS, _IDX_DFAKE, _IDX_FMAP, _IDX_RECON, _IDX_PITCH, _IDX_CONT, \
    _IDX_POS, _IDX_NEG, _IDX_WEIGHT = range(9)


# ----------------------------- helpers --------------------------------------
def _mean11(x):
    """Mean of an N-D array, returned with shape (1, 1) (kernel-safe)."""
    n = float(math.prod(x.shape))
    x = x.astype(jnp.float32)
    while x.ndim > 2:
        x = jnp.sum(x, axis=0)
    s = jnp.sum(jnp.sum(x, axis=-1, keepdims=True), axis=-2, keepdims=True)
    return s / n


# ========================== fused loss kernel ================================
def _fused_generator_loss_kernel(
        # reconstruction
        a_s_ref, w_mel_ref,
        # pitch
        tcqt_ref, pitch_ref, shift_ref, w_pitch_ref,
        # contrastive
        x_ling_ref, y_ling_ref, mask_ref,
        # discriminator (period 2 and 4)
        x2_ref, w1t2_ref, w2t2_ref, w3t2_ref,
        x4_ref, w1t4_ref, w2t4_ref, w3t4_ref,
        # warm-up content weight
        cw_ref,
        # output: (1, 128) metrics vector
        out_ref,
        *, temperature, num_candidates, sigma, delta, half_rows):
    f32 = jnp.float32

    # ---------------- reconstruction (mel L1), single matmul -----------------
    # TODO(synk): mel_original / mel_reconstructed feature maps (only used by
    # the matplotlib logging branch) are intentionally not materialized.
    a_s = a_s_ref[...].astype(f32)                           # (2*B*T_MEL, FRAME)
    w_mel = w_mel_ref[...].astype(f32)                       # (FRAME, N_MELS)
    mel = jnp.log(jnp.abs(jnp.dot(a_s, w_mel, preferred_element_type=f32)) + 1e-5)
    recon = _mean11(jnp.abs(mel[:half_rows] - mel[half_rows:]))

    # ---------------- relative pitch difference (huber) ----------------------
    # TODO(synk): real PitchEncoder is an external module; synthetic linear
    # encoder + softplus used so the huber-loss hot path is exercised.
    tcqt = tcqt_ref[...].astype(f32)                         # (B, T_CQT, PITCH_FREQ)
    w_p = w_pitch_ref[...].astype(f32)                       # (1, PITCH_FREQ)
    pre = jnp.sum(tcqt * w_p[None, :, :], axis=-1)           # lane reduction -> (B, T)
    pred = jnp.log(1.0 + jnp.exp(pre)) + 1e-3                # softplus, > 0
    pred_log2 = jnp.log2(pred) + sigma * shift_ref[...].astype(f32)   # (B,1) bcast
    tgt = jnp.log2(pitch_ref[...].astype(f32))
    d = pred_log2 - tgt
    ad = jnp.abs(d)
    hub = jnp.where(ad <= delta, 0.5 * d * d, delta * (ad - 0.5 * delta))
    pitch_l = _mean11(hub)

    # ---------------- contrastive loss (channel-last layout) -----------------
    x = x_ling_ref[...].astype(f32)                          # (B, T, D)
    y = y_ling_ref[...].astype(f32)                          # (B, T, D)
    mask = mask_ref[...].astype(f32)                         # (T, T)
    bsz = x.shape[0]

    def l2norm(v):  # F.normalize(..., p=2) over D (lane axis)
        nrm = jnp.sqrt(jnp.sum(v * v, axis=-1, keepdims=True))
        return v / jnp.maximum(nrm, 1e-12)

    xn = l2norm(x)
    yn = l2norm(y)
    inv_t = 1.0 / temperature

    positive = jnp.sum(xn * yn, axis=-1) * inv_t             # (B, T)
    conf_x = jnp.einsum('bti,bsi->bts', xn, xn,
                        preferred_element_type=f32) * inv_t  # (B, T, T)
    conf_y = jnp.einsum('bti,bsi->bts', yn, yn,
                        preferred_element_type=f32) * inv_t

    mask_b = mask[None, :, :]
    neg_x = jnp.sum(jnp.exp(conf_x) * mask_b, axis=-1)       # (B, T)
    neg_y = jnp.sum(jnp.exp(conf_y) * mask_b, axis=-1)

    s_x = jnp.sum(positive / neg_x, axis=-1, keepdims=True)  # (B, 1)
    s_y = jnp.sum(positive / neg_y, axis=-1, keepdims=True)
    per_b = jnp.log(s_x) + jnp.log(s_y)                      # sum over stack dim
    cont = -jnp.sum(per_b, axis=0, keepdims=True) / bsz      # (1, 1)

    mean_pos = _mean11(positive) * temperature
    mn_x = jnp.sum(conf_x * mask_b, axis=-1)
    mn_y = jnp.sum(conf_y * mask_b, axis=-1)
    mean_neg = (0.5 * (_mean11(mn_x) + _mean11(mn_y))
                / num_candidates * temperature)

    # ---------------- multi-period discriminator (both periods) --------------
    # TODO(synk): real MultiPeriodDiscriminator is an external conv stack;
    # replaced by a small linear stack.  Operands are (p, 2*B*n) lane-dense,
    # real in the left half of the columns, fake in the right half.
    def disc_branch(x_ref_, w1t_ref_, w2t_ref_, w3t_ref_):
        xv = x_ref_[...].astype(f32)                         # (p, 2*cols)
        cols = xv.shape[1] // 2
        w1t = w1t_ref_[...].astype(f32)                      # (C1, p)
        w2t = w2t_ref_[...].astype(f32)                      # (C2, C1)
        w3t = w3t_ref_[...].astype(f32)                      # (1, C2)
        h1 = jax.nn.leaky_relu(
            jnp.dot(w1t, xv, preferred_element_type=f32), 0.1)     # (C1, 2*cols)
        h2 = jax.nn.leaky_relu(
            jnp.dot(w2t, h1, preferred_element_type=f32), 0.1)     # (C2, 2*cols)
        logits = jnp.dot(w3t, h2, preferred_element_type=f32)      # (1, 2*cols)
        df = _mean11((1.0 - logits[:, cols:]) ** 2)
        fm = (_mean11(jnp.abs(h1[:, cols:] - h1[:, :cols]))
              + _mean11(jnp.abs(h2[:, cols:] - h2[:, :cols])))
        return df, fm

    df2, fm2 = disc_branch(x2_ref, w1t2_ref, w2t2_ref, w3t2_ref)
    df4, fm4 = disc_branch(x4_ref, w1t4_ref, w2t4_ref, w3t4_ref)
    d_fake = df2 + df4
    fmap = fm2 + fm4

    # ---------------- final loss combination ---------------------------------
    cw = cw_ref[...].astype(f32)                             # (1, 1)
    weight = recon / fmap                                    # .detach() in torch; forward-only here
    total = d_fake + weight * fmap + recon + cw * cont + pitch_l  # pitch requires_grad path

    # ---------------- pack metrics into one lane-dense (1, 128) store --------
    vals = (total, d_fake, fmap, recon, pitch_l, cont, mean_pos, mean_neg, weight)
    idx = lax.broadcasted_iota(jnp.int32, (1, 128), 1)
    vec = jnp.zeros((1, 128), f32)
    for i, v in enumerate(vals):
        vec = jnp.where(idx == i, v, vec)
    out_ref[...] = vec


# ============================ glue (jitted XLA) ==============================
def make_negative_sampling_mask(key, num_items, min_dist, num_candidates):
    upper = jnp.triu(jnp.ones((num_items, num_items), jnp.float32), k=min_dist + 1)
    all_mask = upper.T + upper
    rv = all_mask * jax.random.uniform(key, (num_items, num_items), jnp.float32)
    k = min(num_candidates, num_items)
    kth = lax.top_k(rv, k)[0][:, -1:]
    return (rv >= kth).astype(jnp.float32) * all_mask + jnp.eye(num_items, dtype=jnp.float32)


def analyze_linguistic_stub(audio, w_ling):
    # TODO(synk): stands in for Generator.analyze_linguistic (external module).
    bsz, length = audio.shape
    frames = audio.reshape(bsz, T_LING, length // T_LING)
    return jnp.tanh(jnp.einsum('btf,fd->btd', frames, w_ling))   # (B, T, D) channel-last


def _forward_impl(params, audio, synth, pitch, cqt, linguistic_features,
                  content_weight, rng, *,
                  temperature, num_candidates, neg_min_dist,
                  cqt_center, cqt_shift_min, cqt_shift_max, sigma, delta):
    bsz, length = audio.shape
    k_pitch, k_mask = jax.random.split(rng, 2)

    # -- reconstruction operand: audio/synth frames stacked into one matrix
    a = audio.reshape(bsz * T_MEL, FRAME_LEN)
    s = synth.reshape(bsz * T_MEL, FRAME_LEN)
    a_s = jnp.concatenate([a, s], axis=0)                    # (2*B*T_MEL, FRAME)

    # -- pitch: random transposition + dynamic slice of the CQT band
    transposition = jax.random.randint(k_pitch, (bsz,), cqt_shift_min, cqt_shift_max + 1)
    start = transposition + cqt_center
    tcqt = jax.vmap(
        lambda c, st: lax.dynamic_slice(c, (st, 0), (PITCH_FREQ, c.shape[-1]))
    )(cqt, start)
    tcqt_t = tcqt.transpose(0, 2, 1)                         # (B, T_CQT, PITCH_FREQ)
    shift = transposition.astype(jnp.float32).reshape(bsz, 1)
    w_pitch_row = params['w_pitch'].reshape(1, PITCH_FREQ)

    # -- contrastive: channel-last features for lane-axis contraction
    x_ling = linguistic_features.transpose(0, 2, 1)          # (B, T, D)
    y_ling = analyze_linguistic_stub(audio, params['w_ling'])
    mask = make_negative_sampling_mask(k_mask, x_ling.shape[1],
                                       neg_min_dist, num_candidates)

    # -- discriminator operands: (p, 2*B*n), real || fake along lane axis
    def per_period(p):
        n = length // p
        real = audio.reshape(bsz * n, p).T                   # (p, B*n)
        fake = synth.reshape(bsz * n, p).T
        return jnp.concatenate([real, fake], axis=1)         # (p, 2*B*n)

    x2 = per_period(2)
    x4 = per_period(4)
    w1t2, w2t2, w3t2 = params['disc']['p2']
    w1t4, w2t4, w3t4 = params['disc']['p4']

    cw = jnp.asarray(content_weight, jnp.float32).reshape(1, 1)

    kern = functools.partial(_fused_generator_loss_kernel,
                             temperature=temperature,
                             num_candidates=num_candidates,
                             sigma=sigma, delta=delta,
                             half_rows=bsz * T_MEL)
    # Single fused pallas_call (whole arrays in VMEM, no grid).
    # TODO(synk): on v7x a leading "parallel" grid axis over sub-losses could
    # engage both TensorCores; skipped since the whole kernel is < 1 MFLOP.
    vec = pl.pallas_call(
        kern,
        out_shape=jax.ShapeDtypeStruct((1, 128), jnp.float32),
    )(a_s, params['w_mel'], tcqt_t, pitch, shift, w_pitch_row,
      x_ling, y_ling, mask,
      x2, w1t2, w2t2, w3t2, x4, w1t4, w2t4, w3t4, cw)

    loss = vec[0, _IDX_LOSS]
    metrics = {
        'gen/loss': vec[0, _IDX_LOSS],
        'gen/d-fake': vec[0, _IDX_DFAKE],
        'gen/fmap': vec[0, _IDX_FMAP],
        'gen/rctor': vec[0, _IDX_RECON],
        'gen/pitch': vec[0, _IDX_PITCH],
        'gen/cont': vec[0, _IDX_CONT],
        'metric/cont-pos': vec[0, _IDX_POS],
        'metric/cont-neg': vec[0, _IDX_NEG],
        'common/weight': vec[0, _IDX_WEIGHT],
    }
    return loss, metrics


def init_params(key):
    ks = jax.random.split(key, 8)
    params = {
        'w_mel': 0.1 * jax.random.normal(ks[0], (FRAME_LEN, N_MELS), jnp.float32),
        'w_ling': 0.1 * jax.random.normal(ks[1], (L // T_LING, D_LING), jnp.float32),
        'w_pitch': 0.1 * jax.random.normal(ks[2], (PITCH_FREQ, 1), jnp.float32),
        'disc': {},
    }
    for i, p in enumerate(PERIODS):
        kk = jax.random.split(ks[3 + i], 3)
        # weights stored pre-transposed for the lane-dense (p, cols) layout
        params['disc'][f'p{p}'] = (
            0.2 * jax.random.normal(kk[0], (DISC_C1, p), jnp.float32),      # w1^T
            0.2 * jax.random.normal(kk[1], (DISC_C2, DISC_C1), jnp.float32),  # w2^T
            0.2 * jax.random.normal(kk[2], (1, DISC_C2), jnp.float32),      # w3^T
        )
    return params


class GeneratorLossPallas:
    """JAX/Pallas port of GeneratorLoss.forward (scalar-loss path only)."""

    def __init__(self, params, *,
                 num_candidates=4, neg_min_dist=2, temperature=0.1,
                 cqt_center=8, cqt_shift_min=-2, cqt_shift_max=2,
                 huber_delta=0.25, sigma=0.1,
                 linguistic_loss_start_weight=1e-3, linguistic_loss_end_weight=10.0,
                 initial_training_step=100, max_training_step=1000):
        self.params = params
        self.content_weight_increment = (
            (linguistic_loss_end_weight - linguistic_loss_start_weight) / max_training_step)
        self.content_weight = (linguistic_loss_start_weight
                               + initial_training_step * self.content_weight_increment)
        self._forward = jax.jit(functools.partial(
            _forward_impl,
            temperature=temperature, num_candidates=num_candidates,
            neg_min_dist=neg_min_dist, cqt_center=cqt_center,
            cqt_shift_min=cqt_shift_min, cqt_shift_max=cqt_shift_max,
            sigma=sigma, delta=huber_delta))

    def update_warmup(self):
        self.content_weight += self.content_weight_increment

    def forward(self, audio, synth, pitch, cqt, linguistic_features, it, rng):
        # Original calls update_warmup() *before* combining the loss, so the
        # incremented content_weight is the one used in this step's loss.
        self.update_warmup()
        cw = jnp.float32(self.content_weight)
        loss, metrics = self._forward(self.params, audio, synth, pitch, cqt,
                                      linguistic_features, cw, rng)
        metrics = dict(metrics)
        metrics['common/warmup'] = self.content_weight
        # TODO(synk): mel_img / plot_pitch / voice-conversion logging and the
        # optimizer learning-rate metrics (matplotlib, librosa, torchaudio,
        # torch optimizers) have no Pallas equivalent; returning empty dicts.
        images, audios, plots = {}, {}, {}
        return loss, metrics, images, audios, plots


# ================================ main =======================================
if __name__ == "__main__":
    key = jax.random.PRNGKey(0)
    ks = jax.random.split(key, 8)

    params = init_params(ks[0])

    audio = 0.1 * jax.random.normal(ks[1], (B, L), jnp.float32)
    synth = audio + 0.05 * jax.random.normal(ks[2], (B, L), jnp.float32)
    cqt = jax.random.uniform(ks[3], (B, F_TOTAL, T_CQT), jnp.float32, 1e-3, 1.0)
    pitch = jax.random.uniform(ks[4], (B, T_CQT), jnp.float32, 100.0, 400.0)
    # linguistic features (channel-first, PyTorch convention) correlated with
    # the audio-derived ones, as in training
    linguistic_features = (
        analyze_linguistic_stub(audio, params['w_ling']).transpose(0, 2, 1)
        + 0.05 * jax.random.normal(ks[5], (B, D_LING, T_LING), jnp.float32))

    gen_loss = GeneratorLossPallas(params)
    loss, metrics, images, audios, plots = gen_loss.forward(
        audio, synth, pitch, cqt, linguistic_features, it=1, rng=ks[6])

    jax.block_until_ready(loss)          # single host sync for the whole step
    assert bool(jnp.isfinite(loss)), "loss is not finite"
    print("KERNEL_OK")
</pallas_src>

<mosaic_0001>
module attributes {stable_mosaic.version = 11 : i64} {
  func.func @_fused_generator_loss_kernel(%arg0: memref<64x64xf32, #tpu.memory_space<vmem>>, %arg1: memref<64x32xf32, #tpu.memory_space<vmem>>, %arg2: memref<2x16x32xf32, #tpu.memory_space<vmem>>, %arg3: memref<2x16xf32, #tpu.memory_space<vmem>>, %arg4: memref<2x1xf32, #tpu.memory_space<vmem>>, %arg5: memref<1x32xf32, #tpu.memory_space<vmem>>, %arg6: memref<2x16x32xf32, #tpu.memory_space<vmem>>, %arg7: memref<2x16x32xf32, #tpu.memory_space<vmem>>, %arg8: memref<16x16xf32, #tpu.memory_space<vmem>>, %arg9: memref<2x2048xf32, #tpu.memory_space<vmem>>, %arg10: memref<16x2xf32, #tpu.memory_space<vmem>>, %arg11: memref<16x16xf32, #tpu.memory_space<vmem>>, %arg12: memref<1x16xf32, #tpu.memory_space<vmem>>, %arg13: memref<4x1024xf32, #tpu.memory_space<vmem>>, %arg14: memref<16x4xf32, #tpu.memory_space<vmem>>, %arg15: memref<16x16xf32, #tpu.memory_space<vmem>>, %arg16: memref<1x16xf32, #tpu.memory_space<vmem>>, %arg17: memref<1x1xf32, #tpu.memory_space<vmem>>, %arg18: memref<1x128xf32, #tpu.memory_space<vmem>>) attributes {dimension_semantics = [], scalar_prefetch = 0 : i64, scratch_operands = 0 : i64, tpu.core_type = #tpu.core_type<tc>} {
    %c0 = arith.constant 0 : index
    %c0_0 = arith.constant 0 : index
    %0 = vector.load %arg0[%c0, %c0_0] : memref<64x64xf32, #tpu.memory_space<vmem>>, vector<64x64xf32>
    %c0_1 = arith.constant 0 : index
    %c0_2 = arith.constant 0 : index
    %1 = vector.load %arg1[%c0_1, %c0_2] : memref<64x32xf32, #tpu.memory_space<vmem>>, vector<64x32xf32>
    %cst = arith.constant dense<0.000000e+00> : vector<64x32xf32>
    %2 = tpu.matmul %0, %1, %cst {dimension_numbers = #tpu.dot_dimension_numbers<[1], [0], [0], [1], [0, 0, 1, 1], [], []>} : vector<64x64xf32>, vector<64x32xf32>, vector<64x32xf32> -> vector<64x32xf32>
    %3 = math.absf %2 : vector<64x32xf32>
    %cst_3 = arith.constant 9.99999974E-6 : f32
    %4 = vector.broadcast %cst_3 : f32 to vector<64x32xf32>
    %5 = arith.addf %3, %4 : vector<64x32xf32>
    %6 = math.log %5 : vector<64x32xf32>
    %7 = vector.extract_strided_slice %6 {offsets = [0, 0], sizes = [32, 32], strides = [1, 1]} : vector<64x32xf32> to vector<32x32xf32>
    %8 = vector.extract_strided_slice %6 {offsets = [32, 0], sizes = [32, 32], strides = [1, 1]} : vector<64x32xf32> to vector<32x32xf32>
    %9 = arith.subf %7, %8 : vector<32x32xf32>
    %10 = math.absf %9 : vector<32x32xf32>
    %cst_4 = arith.constant dense<0.000000e+00> : vector<32xf32>
    %11 = vector.multi_reduction <add>, %10, %cst_4 [1] : vector<32x32xf32> to vector<32xf32>
    %12 = vector.shape_cast %11 : vector<32xf32> to vector<32x1xf32>
    %cst_5 = arith.constant dense<0.000000e+00> : vector<1xf32>
    %13 = vector.multi_reduction <add>, %12, %cst_5 [0] : vector<32x1xf32> to vector<1xf32>
    %14 = vector.shape_cast %13 : vector<1xf32> to vector<1x1xf32>
    %cst_6 = arith.constant 1.024000e+03 : f32
    %15 = vector.broadcast %cst_6 : f32 to vector<1x1xf32>
    %16 = arith.divf %14, %15 : vector<1x1xf32>
    %c0_7 = arith.constant 0 : index
    %c0_8 = arith.constant 0 : index
    %c0_9 = arith.constant 0 : index
    %17 = vector.load %arg2[%c0_7, %c0_8, %c0_9] : memref<2x16x32xf32, #tpu.memory_space<vmem>>, vector<2x16x32xf32>
    %c0_10 = arith.constant 0 : index
    %c0_11 = arith.constant 0 : index
    %18 = vector.load %arg5[%c0_10, %c0_11] : memref<1x32xf32, #tpu.memory_space<vmem>>, vector<1x32xf32>
    %19 = vector.shape_cast %18 : vector<1x32xf32> to vector<1x1x32xf32>
    %20 = vector.broadcast %19 : vector<1x1x32xf32> to vector<2x16x32xf32>
    %21 = arith.mulf %17, %20 : vector<2x16x32xf32>
    %cst_12 = arith.constant dense<0.000000e+00> : vector<2x16xf32>
    %22 = vector.multi_reduction <add>, %21, %cst_12 [2] : vector<2x16x32xf32> to vector<2x16xf32>
    %23 = math.exp %22 : vector<2x16xf32>
    %cst_13 = arith.constant 1.000000e+00 : f32
    %24 = vector.broadcast %cst_13 : f32 to vector<2x16xf32>
    %25 = arith.addf %24, %23 : vector<2x16xf32>
    %26 = math.log %25 : vector<2x16xf32>
    %cst_14 = arith.constant 1.000000e-03 : f32
    %27 = vector.broadcast %cst_14 : f32 to vector<2x16xf32>
    %28 = arith.addf %26, %27 : vector<2x16xf32>
    %29 = math.log %28 : vector<2x16xf32>
    %cst_15 = arith.constant 2.000000e+00 : f32
    %30 = math.log %cst_15 : f32
    %31 = vector.broadcast %30 : f32 to vector<2x16xf32>
    %32 = arith.divf %29, %31 : vector<2x16xf32>
    %c0_16 = arith.constant 0 : index
    %c0_17 = arith.constant 0 : index
    %33 = vector.load %arg4[%c0_16, %c0_17] : memref<2x1xf32, #tpu.memory_space<vmem>>, vector<2x1xf32>
    %cst_18 = arith.constant 1.000000e-01 : f32
    %34 = vector.broadcast %cst_18 : f32 to vector<2x1xf32>
    %35 = arith.mulf %34, %33 : vector<2x1xf32>
    %36 = vector.broadcast %35 : vector<2x1xf32> to vector<2x16xf32>
    %37 = arith.addf %32, %36 : vector<2x16xf32>
    %c0_19 = arith.constant 0 : index
    %c0_20 = arith.constant 0 : index
    %38 = vector.load %arg3[%c0_19, %c0_20] : memref<2x16xf32, #tpu.memory_space<vmem>>, vector<2x16xf32>
    %39 = math.log %38 : vector<2x16xf32>
    %cst_21 = arith.constant 2.000000e+00 : f32
    %40 = math.log %cst_21 : f32
    %41 = vector.broadcast %40 : f32 to vector<2x16xf32>
    %42 = arith.divf %39, %41 : vector<2x16xf32>
    %43 = arith.subf %37, %42 : vector<2x16xf32>
    %44 = math.absf %43 : vector<2x16xf32>
    %cst_22 = arith.constant 2.500000e-01 : f32
    %45 = vector.broadcast %cst_22 : f32 to vector<2x16xf32>
    %46 = arith.cmpf ole, %44, %45 : vector<2x16xf32>
    %cst_23 = arith.constant 5.000000e-01 : f32
    %47 = vector.broadcast %cst_23 : f32 to vector<2x16xf32>
    %48 = arith.mulf %47, %43 : vector<2x16xf32>
    %49 = arith.mulf %48, %43 : vector<2x16xf32>
    %cst_24 = arith.constant 1.250000e-01 : f32
    %50 = vector.broadcast %cst_24 : f32 to vector<2x16xf32>
    %51 = arith.subf %44, %50 : vector<2x16xf32>
    %cst_25 = arith.constant 2.500000e-01 : f32
    %52 = vector.broadcast %cst_25 : f32 to vector<2x16xf32>
    %53 = arith.mulf %52, %51 : vector<2x16xf32>
    %54 = arith.select %46, %49, %53 : vector<2x16xi1>, vector<2x16xf32>
    %cst_26 = arith.constant dense<0.000000e+00> : vector<2xf32>
    %55 = vector.multi_reduction <add>, %54, %cst_26 [1] : vector<2x16xf32> to vector<2xf32>
    %56 = vector.shape_cast %55 : vector<2xf32> to vector<2x1xf32>
    %cst_27 = arith.constant dense<0.000000e+00> : vector<1xf32>
    %57 = vector.multi_reduction <add>, %56, %cst_27 [0] : vector<2x1xf32> to vector<1xf32>
    %58 = vector.shape_cast %57 : vector<1xf32> to vector<1x1xf32>
    %cst_28 = arith.constant 3.200000e+01 : f32
    %59 = vector.broadcast %cst_28 : f32 to vector<1x1xf32>
    %60 = arith.divf %58, %59 : vector<1x1xf32>
    %c0_29 = arith.constant 0 : index
    %c0_30 = arith.constant 0 : index
    %c0_31 = arith.constant 0 : index
    %61 = vector.load %arg6[%c0_29, %c0_30, %c0_31] : memref<2x16x32xf32, #tpu.memory_space<vmem>>, vector<2x16x32xf32>
    %c0_32 = arith.constant 0 : index
    %c0_33 = arith.constant 0 : index
    %c0_34 = arith.constant 0 : index
    %62 = vector.load %arg7[%c0_32, %c0_33, %c0_34] : memref<2x16x32xf32, #tpu.memory_space<vmem>>, vector<2x16x32xf32>
    %c0_35 = arith.constant 0 : index
    %c0_36 = arith.constant 0 : index
    %63 = vector.load %arg8[%c0_35, %c0_36] : memref<16x16xf32, #tpu.memory_space<vmem>>, vector<16x16xf32>
    %64 = arith.mulf %61, %61 : vector<2x16x32xf32>
    %cst_37 = arith.constant dense<0.000000e+00> : vector<2x16xf32>
    %65 = vector.multi_reduction <add>, %64, %cst_37 [2] : vector<2x16x32xf32> to vector<2x16xf32>
    %66 = vector.shape_cast %65 : vector<2x16xf32> to vector<2x16x1xf32>
    %67 = math.sqrt %66 : vector<2x16x1xf32>
    %cst_38 = arith.constant 9.99999996E-13 : f32
    %68 = vector.broadcast %cst_38 : f32 to vector<2x16x1xf32>
    %69 = arith.maximumf %67, %68 : vector<2x16x1xf32>
    %70 = vector.broadcast %69 : vector<2x16x1xf32> to vector<2x16x32xf32>
    %71 = arith.divf %61, %70 : vector<2x16x32xf32>
    %72 = arith.mulf %62, %62 : vector<2x16x32xf32>
    %cst_39 = arith.constant dense<0.000000e+00> : vector<2x16xf32>
    %73 = vector.multi_reduction <add>, %72, %cst_39 [2] : vector<2x16x32xf32> to vector<2x16xf32>
    %74 = vector.shape_cast %73 : vector<2x16xf32> to vector<2x16x1xf32>
    %75 = math.sqrt %74 : vector<2x16x1xf32>
    %cst_40 = arith.constant 9.99999996E-13 : f32
    %76 = vector.broadcast %cst_40 : f32 to vector<2x16x1xf32>
    %77 = arith.maximumf %75, %76 : vector<2x16x1xf32>
    %78 = vector.broadcast %77 : vector<2x16x1xf32> to vector<2x16x32xf32>
    %79 = arith.divf %62, %78 : vector<2x16x32xf32>
    %80 = arith.mulf %71, %79 : vector<2x16x32xf32>
    %cst_41 = arith.constant dense<0.000000e+00> : vector<2x16xf32>
    %81 = vector.multi_reduction <add>, %80, %cst_41 [2] : vector<2x16x32xf32> to vector<2x16xf32>
    %cst_42 = arith.constant 1.000000e+01 : f32
    %82 = vector.broadcast %cst_42 : f32 to vector<2x16xf32>
    %83 = arith.mulf %81, %82 : vector<2x16xf32>
    "tpu.trace_start"() <{level = 10 : i32, message = "bti,bsi->bts"}> : () -> ()
    %cst_43 = arith.constant dense<0.000000e+00> : vector<2x16x16xf32>
    %84 = tpu.matmul %71, %71, %cst_43 {dimension_numbers = #tpu.dot_dimension_numbers<[2], [2], [1], [1], [0, 0, 0, 1, 1, 1], [0], [0]>} : vector<2x16x32xf32>, vector<2x16x32xf32>, vector<2x16x16xf32> -> vector<2x16x16xf32>
    "tpu.trace_stop"() : () -> ()
    %cst_44 = arith.constant 1.000000e+01 : f32
    %85 = vector.broadcast %cst_44 : f32 to vector<2x16x16xf32>
    %86 = arith.mulf %84, %85 : vector<2x16x16xf32>
    "tpu.trace_start"() <{level = 10 : i32, message = "bti,bsi->bts"}> : () -> ()
    %cst_45 = arith.constant dense<0.000000e+00> : vector<2x16x16xf32>
    %87 = tpu.matmul %79, %79, %cst_45 {dimension_numbers = #tpu.dot_dimension_numbers<[2], [2], [1], [1], [0, 0, 0, 1, 1, 1], [0], [0]>} : vector<2x16x32xf32>, vector<2x16x32xf32>, vector<2x16x16xf32> -> vector<2x16x16xf32>
    "tpu.trace_stop"() : () -> ()
    %cst_46 = arith.constant 1.000000e+01 : f32
    %88 = vector.broadcast %cst_46 : f32 to vector<2x16x16xf32>
    %89 = arith.mulf %87, %88 : vector<2x16x16xf32>
    %90 = vector.shape_cast %63 : vector<16x16xf32> to vector<1x16x16xf32>
    %91 = math.exp %86 : vector<2x16x16xf32>
    %92 = vector.broadcast %90 : vector<1x16x16xf32> to vector<2x16x16xf32>
    %93 = arith.mulf %91, %92 : vector<2x16x16xf32>
    %cst_47 = arith.constant dense<0.000000e+00> : vector<2x16xf32>
    %94 = vector.multi_reduction <add>, %93, %cst_47 [2] : vector<2x16x16xf32> to vector<2x16xf32>
    %95 = math.exp %89 : vector<2x16x16xf32>
    %96 = vector.broadcast %90 : vector<1x16x16xf32> to vector<2x16x16xf32>
    %97 = arith.mulf %95, %96 : vector<2x16x16xf32>
    %cst_48 = arith.constant dense<0.000000e+00> : vector<2x16xf32>
    %98 = vector.multi_reduction <add>, %97, %cst_48 [2] : vector<2x16x16xf32> to vector<2x16xf32>
    %99 = arith.divf %83, %94 : vector<2x16xf32>
    %cst_49 = arith.constant dense<0.000000e+00> : vector<2xf32>
    %100 = vector.multi_reduction <add>, %99, %cst_49 [1] : vector<2x16xf32> to vector<2xf32>
    %101 = vector.shape_cast %100 : vector<2xf32> to vector<2x1xf32>
    %102 = arith.divf %83, %98 : vector<2x16xf32>
    %cst_50 = arith.constant dense<0.000000e+00> : vector<2xf32>
    %103 = vector.multi_reduction <add>, %102, %cst_50 [1] : vector<2x16xf32> to vector<2xf32>
    %104 = vector.shape_cast %103 : vector<2xf32> to vector<2x1xf32>
    %105 = math.log %101 : vector<2x1xf32>
    %106 = math.log %104 : vector<2x1xf32>
    %107 = arith.addf %105, %106 : vector<2x1xf32>
    %cst_51 = arith.constant dense<0.000000e+00> : vector<1xf32>
    %108 = vector.multi_reduction <add>, %107, %cst_51 [0] : vector<2x1xf32> to vector<1xf32>
    %109 = vector.shape_cast %108 : vector<1xf32> to vector<1x1xf32>
    %cst_52 = arith.constant 0.000000e+00 : f32
    %110 = vector.broadcast %cst_52 : f32 to vector<1x1xf32>
    %111 = arith.subf %110, %109 : vector<1x1xf32>
    %cst_53 = arith.constant 2.000000e+00 : f32
    %112 = vector.broadcast %cst_53 : f32 to vector<1x1xf32>
    %113 = arith.divf %111, %112 : vector<1x1xf32>
    %cst_54 = arith.constant dense<0.000000e+00> : vector<2xf32>
    %114 = vector.multi_reduction <add>, %83, %cst_54 [1] : vector<2x16xf32> to vector<2xf32>
    %115 = vector.shape_cast %114 : vector<2xf32> to vector<2x1xf32>
    %cst_55 = arith.constant dense<0.000000e+00> : vector<1xf32>
    %116 = vector.multi_reduction <add>, %115, %cst_55 [0] : vector<2x1xf32> to vector<1xf32>
    %117 = vector.shape_cast %116 : vector<1xf32> to vector<1x1xf32>
    %cst_56 = arith.constant 3.200000e+01 : f32
    %118 = vector.broadcast %cst_56 : f32 to vector<1x1xf32>
    %119 = arith.divf %117, %118 : vector<1x1xf32>
    %cst_57 = arith.constant 1.000000e-01 : f32
    %120 = vector.broadcast %cst_57 : f32 to vector<1x1xf32>
    %121 = arith.mulf %119, %120 : vector<1x1xf32>
    %122 = vector.broadcast %90 : vector<1x16x16xf32> to vector<2x16x16xf32>
    %123 = arith.mulf %86, %122 : vector<2x16x16xf32>
    %cst_58 = arith.constant dense<0.000000e+00> : vector<2x16xf32>
    %124 = vector.multi_reduction <add>, %123, %cst_58 [2] : vector<2x16x16xf32> to vector<2x16xf32>
    %125 = vector.broadcast %90 : vector<1x16x16xf32> to vector<2x16x16xf32>
    %126 = arith.mulf %89, %125 : vector<2x16x16xf32>
    %cst_59 = arith.constant dense<0.000000e+00> : vector<2x16xf32>
    %127 = vector.multi_reduction <add>, %126, %cst_59 [2] : vector<2x16x16xf32> to vector<2x16xf32>
    %cst_60 = arith.constant dense<0.000000e+00> : vector<2xf32>
    %128 = vector.multi_reduction <add>, %124, %cst_60 [1] : vector<2x16xf32> to vector<2xf32>
    %129 = vector.shape_cast %128 : vector<2xf32> to vector<2x1xf32>
    %cst_61 = arith.constant dense<0.000000e+00> : vector<1xf32>
    %130 = vector.multi_reduction <add>, %129, %cst_61 [0] : vector<2x1xf32> to vector<1xf32>
    %131 = vector.shape_cast %130 : vector<1xf32> to vector<1x1xf32>
    %cst_62 = arith.constant 3.200000e+01 : f32
    %132 = vector.broadcast %cst_62 : f32 to vector<1x1xf32>
    %133 = arith.divf %131, %132 : vector<1x1xf32>
    %cst_63 = arith.constant dense<0.000000e+00> : vector<2xf32>
    %134 = vector.multi_reduction <add>, %127, %cst_63 [1] : vector<2x16xf32> to vector<2xf32>
    %135 = vector.shape_cast %134 : vector<2xf32> to vector<2x1xf32>
    %cst_64 = arith.constant dense<0.000000e+00> : vector<1xf32>
    %136 = vector.multi_reduction <add>, %135, %cst_64 [0] : vector<2x1xf32> to vector<1xf32>
    %137 = vector.shape_cast %136 : vector<1xf32> to vector<1x1xf32>
    %cst_65 = arith.constant 3.200000e+01 : f32
    %138 = vector.broadcast %cst_65 : f32 to vector<1x1xf32>
    %139 = arith.divf %137, %138 : vector<1x1xf32>
    %140 = arith.addf %133, %139 : vector<1x1xf32>
    %cst_66 = arith.constant 5.000000e-01 : f32
    %141 = vector.broadcast %cst_66 : f32 to vector<1x1xf32>
    %142 = arith.mulf %141, %140 : vector<1x1xf32>
    %cst_67 = arith.constant 4.000000e+00 : f32
    %143 = vector.broadcast %cst_67 : f32 to vector<1x1xf32>
    %144 = arith.divf %142, %143 : vector<1x1xf32>
    %cst_68 = arith.constant 1.000000e-01 : f32
    %145 = vector.broadcast %cst_68 : f32 to vector<1x1xf32>
    %146 = arith.mulf %144, %145 : vector<1x1xf32>
    %c0_69 = arith.constant 0 : index
    %c0_70 = arith.constant 0 : index
    %147 = vector.load %arg9[%c0_69, %c0_70] : memref<2x2048xf32, #tpu.memory_space<vmem>>, vector<2x2048xf32>
    %c0_71 = arith.constant 0 : index
    %c0_72 = arith.constant 0 : index
    %148 = vector.load %arg10[%c0_71, %c0_72] : memref<16x2xf32, #tpu.memory_space<vmem>>, vector<16x2xf32>
    %c0_73 = arith.constant 0 : index
    %c0_74 = arith.constant 0 : index
    %149 = vector.load %arg11[%c0_73, %c0_74] : memref<16x16xf32, #tpu.memory_space<vmem>>, vector<16x16xf32>
    %c0_75 = arith.constant 0 : index
    %c0_76 = arith.constant 0 : index
    %150 = vector.load %arg12[%c0_75, %c0_76] : memref<1x16xf32, #tpu.memory_space<vmem>>, vector<1x16xf32>
    %cst_77 = arith.constant dense<0.000000e+00> : vector<16x2048xf32>
    %151 = tpu.matmul %148, %147, %cst_77 {dimension_numbers = #tpu.dot_dimension_numbers<[1], [0], [0], [1], [0, 0, 1, 1], [], []>} : vector<16x2xf32>, vector<2x2048xf32>, vector<16x2048xf32> -> vector<16x2048xf32>
    %cst_78 = arith.constant 1.000000e-01 : f32
    %cst_79 = arith.constant 0.000000e+00 : f32
    %152 = vector.broadcast %cst_79 : f32 to vector<16x2048xf32>
    %153 = arith.cmpf oge, %151, %152 : vector<16x2048xf32>
    %154 = vector.broadcast %cst_78 : f32 to vector<16x2048xf32>
    %155 = arith.mulf %154, %151 : vector<16x2048xf32>
    %156 = arith.select %153, %151, %155 : vector<16x2048xi1>, vector<16x2048xf32>
    %cst_80 = arith.constant dense<0.000000e+00> : vector<16x2048xf32>
    %157 = tpu.matmul %149, %156, %cst_80 {dimension_numbers = #tpu.dot_dimension_numbers<[1], [0], [0], [1], [0, 0, 1, 1], [], []>} : vector<16x16xf32>, vector<16x2048xf32>, vector<16x2048xf32> -> vector<16x2048xf32>
    %cst_81 = arith.constant 1.000000e-01 : f32
    %cst_82 = arith.constant 0.000000e+00 : f32
    %158 = vector.broadcast %cst_82 : f32 to vector<16x2048xf32>
    %159 = arith.cmpf oge, %157, %158 : vector<16x2048xf32>
    %160 = vector.broadcast %cst_81 : f32 to vector<16x2048xf32>
    %161 = arith.mulf %160, %157 : vector<16x2048xf32>
    %162 = arith.select %159, %157, %161 : vector<16x2048xi1>, vector<16x2048xf32>
    %cst_83 = arith.constant dense<0.000000e+00> : vector<1x2048xf32>
    %163 = tpu.matmul %150, %162, %cst_83 {dimension_numbers = #tpu.dot_dimension_numbers<[1], [0], [0], [1], [0, 0, 1, 1], [], []>} : vector<1x16xf32>, vector<16x2048xf32>, vector<1x2048xf32> -> vector<1x2048xf32>
    %164 = vector.extract_strided_slice %163 {offsets = [0, 1024], sizes = [1, 1024], strides = [1, 1]} : vector<1x2048xf32> to vector<1x1024xf32>
    %cst_84 = arith.constant 1.000000e+00 : f32
    %165 = vector.broadcast %cst_84 : f32 to vector<1x1024xf32>
    %166 = arith.subf %165, %164 : vector<1x1024xf32>
    %167 = arith.mulf %166, %166 : vector<1x1024xf32>
    %cst_85 = arith.constant dense<0.000000e+00> : vector<1xf32>
    %168 = vector.multi_reduction <add>, %167, %cst_85 [1] : vector<1x1024xf32> to vector<1xf32>
    %169 = vector.shape_cast %168 : vector<1xf32> to vector<1x1xf32>
    %cst_86 = arith.constant dense<0.000000e+00> : vector<1xf32>
    %170 = vector.multi_reduction <add>, %169, %cst_86 [0] : vector<1x1xf32> to vector<1xf32>
    %171 = vector.shape_cast %170 : vector<1xf32> to vector<1x1xf32>
    %cst_87 = arith.constant 1.024000e+03 : f32
    %172 = vector.broadcast %cst_87 : f32 to vector<1x1xf32>
    %173 = arith.divf %171, %172 : vector<1x1xf32>
    %174 = vector.extract_strided_slice %156 {offsets = [0, 1024], sizes = [16, 1024], strides = [1, 1]} : vector<16x2048xf32> to vector<16x1024xf32>
    %175 = vector.extract_strided_slice %156 {offsets = [0, 0], sizes = [16, 1024], strides = [1, 1]} : vector<16x2048xf32> to vector<16x1024xf32>
    %176 = arith.subf %174, %175 : vector<16x1024xf32>
    %177 = math.absf %176 : vector<16x1024xf32>
    %cst_88 = arith.constant dense<0.000000e+00> : vector<16xf32>
    %178 = vector.multi_reduction <add>, %177, %cst_88 [1] : vector<16x1024xf32> to vector<16xf32>
    %179 = vector.shape_cast %178 : vector<16xf32> to vector<16x1xf32>
    %cst_89 = arith.constant dense<0.000000e+00> : vector<1xf32>
    %180 = vector.multi_reduction <add>, %179, %cst_89 [0] : vector<16x1xf32> to vector<1xf32>
    %181 = vector.shape_cast %180 : vector<1xf32> to vector<1x1xf32>
    %cst_90 = arith.constant 1.638400e+04 : f32
    %182 = vector.broadcast %cst_90 : f32 to vector<1x1xf32>
    %183 = arith.divf %181, %182 : vector<1x1xf32>
    %184 = vector.extract_strided_slice %162 {offsets = [0, 1024], sizes = [16, 1024], strides = [1, 1]} : vector<16x2048xf32> to vector<16x1024xf32>
    %185 = vector.extract_strided_slice %162 {offsets = [0, 0], sizes = [16, 1024], strides = [1, 1]} : vector<16x2048xf32> to vector<16x1024xf32>
    %186 = arith.subf %184, %185 : vector<16x1024xf32>
    %187 = math.absf %186 : vector<16x1024xf32>
    %cst_91 = arith.constant dense<0.000000e+00> : vector<16xf32>
    %188 = vector.multi_reduction <add>, %187, %cst_91 [1] : vector<16x1024xf32> to vector<16xf32>
    %189 = vector.shape_cast %188 : vector<16xf32> to vector<16x1xf32>
    %cst_92 = arith.constant dense<0.000000e+00> : vector<1xf32>
    %190 = vector.multi_reduction <add>, %189, %cst_92 [0] : vector<16x1xf32> to vector<1xf32>
    %191 = vector.shape_cast %190 : vector<1xf32> to vector<1x1xf32>
    %cst_93 = arith.constant 1.638400e+04 : f32
    %192 = vector.broadcast %cst_93 : f32 to vector<1x1xf32>
    %193 = arith.divf %191, %192 : vector<1x1xf32>
    %194 = arith.addf %183, %193 : vector<1x1xf32>
    %c0_94 = arith.constant 0 : index
    %c0_95 = arith.constant 0 : index
    %195 = vector.load %arg13[%c0_94, %c0_95] : memref<4x1024xf32, #tpu.memory_space<vmem>>, vector<4x1024xf32>
    %c0_96 = arith.constant 0 : index
    %c0_97 = arith.constant 0 : index
    %196 = vector.load %arg14[%c0_96, %c0_97] : memref<16x4xf32, #tpu.memory_space<vmem>>, vector<16x4xf32>
    %c0_98 = arith.constant 0 : index
    %c0_99 = arith.constant 0 : index
    %197 = vector.load %arg15[%c0_98, %c0_99] : memref<16x16xf32, #tpu.memory_space<vmem>>, vector<16x16xf32>
    %c0_100 = arith.constant 0 : index
    %c0_101 = arith.constant 0 : index
    %198 = vector.load %arg16[%c0_100, %c0_101] : memref<1x16xf32, #tpu.memory_space<vmem>>, vector<1x16xf32>
    %cst_102 = arith.constant dense<0.000000e+00> : vector<16x1024xf32>
    %199 = tpu.matmul %196, %195, %cst_102 {dimension_numbers = #tpu.dot_dimension_numbers<[1], [0], [0], [1], [0, 0, 1, 1], [], []>} : vector<16x4xf32>, vector<4x1024xf32>, vector<16x1024xf32> -> vector<16x1024xf32>
    %cst_103 = arith.constant 1.000000e-01 : f32
    %cst_104 = arith.constant 0.000000e+00 : f32
    %200 = vector.broadcast %cst_104 : f32 to vector<16x1024xf32>
    %201 = arith.cmpf oge, %199, %200 : vector<16x1024xf32>
    %202 = vector.broadcast %cst_103 : f32 to vector<16x1024xf32>
    %203 = arith.mulf %202, %199 : vector<16x1024xf32>
    %204 = arith.select %201, %199, %203 : vector<16x1024xi1>, vector<16x1024xf32>
    %cst_105 = arith.constant dense<0.000000e+00> : vector<16x1024xf32>
    %205 = tpu.matmul %197, %204, %cst_105 {dimension_numbers = #tpu.dot_dimension_numbers<[1], [0], [0], [1], [0, 0, 1, 1], [], []>} : vector<16x16xf32>, vector<16x1024xf32>, vector<16x1024xf32> -> vector<16x1024xf32>
    %cst_106 = arith.constant 1.000000e-01 : f32
    %cst_107 = arith.constant 0.000000e+00 : f32
    %206 = vector.broadcast %cst_107 : f32 to vector<16x1024xf32>
    %207 = arith.cmpf oge, %205, %206 : vector<16x1024xf32>
    %208 = vector.broadcast %cst_106 : f32 to vector<16x1024xf32>
    %209 = arith.mulf %208, %205 : vector<16x1024xf32>
    %210 = arith.select %207, %205, %209 : vector<16x1024xi1>, vector<16x1024xf32>
    %cst_108 = arith.constant dense<0.000000e+00> : vector<1x1024xf32>
    %211 = tpu.matmul %198, %210, %cst_108 {dimension_numbers = #tpu.dot_dimension_numbers<[1], [0], [0], [1], [0, 0, 1, 1], [], []>} : vector<1x16xf32>, vector<16x1024xf32>, vector<1x1024xf32> -> vector<1x1024xf32>
    %212 = vector.extract_strided_slice %211 {offsets = [0, 512], sizes = [1, 512], strides = [1, 1]} : vector<1x1024xf32> to vector<1x512xf32>
    %cst_109 = arith.constant 1.000000e+00 : f32
    %213 = vector.broadcast %cst_109 : f32 to vector<1x512xf32>
    %214 = arith.subf %213, %212 : vector<1x512xf32>
    %215 = arith.mulf %214, %214 : vector<1x512xf32>
    %cst_110 = arith.constant dense<0.000000e+00> : vector<1xf32>
    %216 = vector.multi_reduction <add>, %215, %cst_110 [1] : vector<1x512xf32> to vector<1xf32>
    %217 = vector.shape_cast %216 : vector<1xf32> to vector<1x1xf32>
    %cst_111 = arith.constant dense<0.000000e+00> : vector<1xf32>
    %218 = vector.multi_reduction <add>, %217, %cst_111 [0] : vector<1x1xf32> to vector<1xf32>
    %219 = vector.shape_cast %218 : vector<1xf32> to vector<1x1xf32>
    %cst_112 = arith.constant 5.120000e+02 : f32
    %220 = vector.broadcast %cst_112 : f32 to vector<1x1xf32>
    %221 = arith.divf %219, %220 : vector<1x1xf32>
    %222 = vector.extract_strided_slice %204 {offsets = [0, 512], sizes = [16, 512], strides = [1, 1]} : vector<16x1024xf32> to vector<16x512xf32>
    %223 = vector.extract_strided_slice %204 {offsets = [0, 0], sizes = [16, 512], strides = [1, 1]} : vector<16x1024xf32> to vector<16x512xf32>
    %224 = arith.subf %222, %223 : vector<16x512xf32>
    %225 = math.absf %224 : vector<16x512xf32>
    %cst_113 = arith.constant dense<0.000000e+00> : vector<16xf32>
    %226 = vector.multi_reduction <add>, %225, %cst_113 [1] : vector<16x512xf32> to vector<16xf32>
    %227 = vector.shape_cast %226 : vector<16xf32> to vector<16x1xf32>
    %cst_114 = arith.constant dense<0.000000e+00> : vector<1xf32>
    %228 = vector.multi_reduction <add>, %227, %cst_114 [0] : vector<16x1xf32> to vector<1xf32>
    %229 = vector.shape_cast %228 : vector<1xf32> to vector<1x1xf32>
    %cst_115 = arith.constant 8.192000e+03 : f32
    %230 = vector.broadcast %cst_115 : f32 to vector<1x1xf32>
    %231 = arith.divf %229, %230 : vector<1x1xf32>
    %232 = vector.extract_strided_slice %210 {offsets = [0, 512], sizes = [16, 512], strides = [1, 1]} : vector<16x1024xf32> to vector<16x512xf32>
    %233 = vector.extract_strided_slice %210 {offsets = [0, 0], sizes = [16, 512], strides = [1, 1]} : vector<16x1024xf32> to vector<16x512xf32>
    %234 = arith.subf %232, %233 : vector<16x512xf32>
    %235 = math.absf %234 : vector<16x512xf32>
    %cst_116 = arith.constant dense<0.000000e+00> : vector<16xf32>
    %236 = vector.multi_reduction <add>, %235, %cst_116 [1] : vector<16x512xf32> to vector<16xf32>
    %237 = vector.shape_cast %236 : vector<16xf32> to vector<16x1xf32>
    %cst_117 = arith.constant dense<0.000000e+00> : vector<1xf32>
    %238 = vector.multi_reduction <add>, %237, %cst_117 [0] : vector<16x1xf32> to vector<1xf32>
    %239 = vector.shape_cast %238 : vector<1xf32> to vector<1x1xf32>
    %cst_118 = arith.constant 8.192000e+03 : f32
    %240 = vector.broadcast %cst_118 : f32 to vector<1x1xf32>
    %241 = arith.divf %239, %240 : vector<1x1xf32>
    %242 = arith.addf %231, %241 : vector<1x1xf32>
    %243 = arith.addf %173, %221 : vector<1x1xf32>
    %244 = arith.addf %194, %242 : vector<1x1xf32>
    %c0_119 = arith.constant 0 : index
    %c0_120 = arith.constant 0 : index
    %245 = vector.load %arg17[%c0_119, %c0_120] : memref<1x1xf32, #tpu.memory_space<vmem>>, vector<1x1xf32>
    %246 = arith.divf %16, %244 : vector<1x1xf32>
    %247 = arith.mulf %246, %244 : vector<1x1xf32>
    %248 = arith.addf %243, %247 : vector<1x1xf32>
    %249 = arith.addf %248, %16 : vector<1x1xf32>
    %250 = arith.mulf %245, %113 : vector<1x1xf32>
    %251 = arith.addf %249, %250 : vector<1x1xf32>
    %252 = arith.addf %251, %60 : vector<1x1xf32>
    %253 = tpu.iota {dimensions = array<i32: 1>} : vector<1x128xi32>
    %cst_121 = arith.constant 0.000000e+00 : f32
    %254 = vector.broadcast %cst_121 : f32 to vector<1x128xf32>
    %c0_i32 = arith.constant 0 : i32
    %255 = vector.broadcast %c0_i32 : i32 to vector<1x128xi32>
    %256 = arith.cmpi eq, %253, %255 : vector<1x128xi32>
    %257 = vector.shape_cast %252 : vector<1x1xf32> to vector<1x1xf32>
    %258 = vector.broadcast %257 : vector<1x1xf32> to vector<1x128xf32>
    %259 = arith.select %256, %258, %254 : vector<1x128xi1>, vector<1x128xf32>
    %c1_i32 = arith.constant 1 : i32
    %260 = vector.broadcast %c1_i32 : i32 to vector<1x128xi32>
    %261 = arith.cmpi eq, %253, %260 : vector<1x128xi32>
    %262 = vector.shape_cast %243 : vector<1x1xf32> to vector<1x1xf32>
    %263 = vector.broadcast %262 : vector<1x1xf32> to vector<1x128xf32>
    %264 = arith.select %261, %263, %259 : vector<1x128xi1>, vector<1x128xf32>
    %c2_i32 = arith.constant 2 : i32
    %265 = vector.broadcast %c2_i32 : i32 to vector<1x128xi32>
    %266 = arith.cmpi eq, %253, %265 : vector<1x128xi32>
    %267 = vector.shape_cast %244 : vector<1x1xf32> to vector<1x1xf32>
    %268 = vector.broadcast %267 : vector<1x1xf32> to vector<1x128xf32>
    %269 = arith.select %266, %268, %264 : vector<1x128xi1>, vector<1x128xf32>
    %c3_i32 = arith.constant 3 : i32
    %270 = vector.broadcast %c3_i32 : i32 to vector<1x128xi32>
    %271 = arith.cmpi eq, %253, %270 : vector<1x128xi32>
    %272 = vector.shape_cast %16 : vector<1x1xf32> to vector<1x1xf32>
    %273 = vector.broadcast %272 : vector<1x1xf32> to vector<1x128xf32>
    %274 = arith.select %271, %273, %269 : vector<1x128xi1>, vector<1x128xf32>
    %c4_i32 = arith.constant 4 : i32
    %275 = vector.broadcast %c4_i32 : i32 to vector<1x128xi32>
    %276 = arith.cmpi eq, %253, %275 : vector<1x128xi32>
    %277 = vector.shape_cast %60 : vector<1x1xf32> to vector<1x1xf32>
    %278 = vector.broadcast %277 : vector<1x1xf32> to vector<1x128xf32>
    %279 = arith.select %276, %278, %274 : vector<1x128xi1>, vector<1x128xf32>
    %c5_i32 = arith.constant 5 : i32
    %280 = vector.broadcast %c5_i32 : i32 to vector<1x128xi32>
    %281 = arith.cmpi eq, %253, %280 : vector<1x128xi32>
    %282 = vector.shape_cast %113 : vector<1x1xf32> to vector<1x1xf32>
    %283 = vector.broadcast %282 : vector<1x1xf32> to vector<1x128xf32>
    %284 = arith.select %281, %283, %279 : vector<1x128xi1>, vector<1x128xf32>
    %c6_i32 = arith.constant 6 : i32
    %285 = vector.broadcast %c6_i32 : i32 to vector<1x128xi32>
    %286 = arith.cmpi eq, %253, %285 : vector<1x128xi32>
    %287 = vector.shape_cast %121 : vector<1x1xf32> to vector<1x1xf32>
    %288 = vector.broadcast %287 : vector<1x1xf32> to vector<1x128xf32>
    %289 = arith.select %286, %288, %284 : vector<1x128xi1>, vector<1x128xf32>
    %c7_i32 = arith.constant 7 : i32
    %290 = vector.broadcast %c7_i32 : i32 to vector<1x128xi32>
    %291 = arith.cmpi eq, %253, %290 : vector<1x128xi32>
    %292 = vector.shape_cast %146 : vector<1x1xf32> to vector<1x1xf32>
    %293 = vector.broadcast %292 : vector<1x1xf32> to vector<1x128xf32>
    %294 = arith.select %291, %293, %289 : vector<1x128xi1>, vector<1x128xf32>
    %c8_i32 = arith.constant 8 : i32
    %295 = vector.broadcast %c8_i32 : i32 to vector<1x128xi32>
    %296 = arith.cmpi eq, %253, %295 : vector<1x128xi32>
    %297 = vector.shape_cast %246 : vector<1x1xf32> to vector<1x1xf32>
    %298 = vector.broadcast %297 : vector<1x1xf32> to vector<1x128xf32>
    %299 = arith.select %296, %298, %294 : vector<1x128xi1>, vector<1x128xf32>
    %c0_122 = arith.constant 0 : index
    %c0_123 = arith.constant 0 : index
    %300 = vector.load %arg18[%c0_122, %c0_123] : memref<1x128xf32, #tpu.memory_space<vmem>>, vector<1x128xf32>
    tpu.vector_store %arg18[%c0_122, %c0_123], %299 {strides = array<i32>} : memref<1x128xf32, #tpu.memory_space<vmem>>, vector<1x128xf32>,
    return
  }
}

</mosaic_0001>

<bundles_post_ra>
// kernel: _forward_impl.21
= control target key start
LH: loop header
LB: loop body
LE: loop exit
PB: predicated region body
PF: predicated region fallthrough
CT: control target
= control target key end

     0   :  { %vm247_vm0 = vcmask 261120   ;;  %v5866_v38 = vlaneseq  ;;  %v4568_v42 = vmov 0   ;;  %vm77_vm1 = vcmask 523264   ;;  %s5844_s6 = inlined_call_operand.vmem [shape: f32[2,16,32], index: 6, kind: input, shape index: {}]   ;;  %s5845_s7 = inlined_call_operand.vmem [shape: f32[2,16,32], index: 7, kind: input, shape index: {}]   ;;  %s5846_s2 = inlined_call_operand.vmem [shape: f32[2,16,32], index: 2, kind: input, shape index: {}]   ;;  %s5847_s5 = inlined_call_operand.vmem [shape: f32[1,32], index: 5, kind: input, shape index: {}]   ;;  %s5848_s3 = inlined_call_operand.vmem [shape: f32[2,16], index: 3, kind: input, shape index: {}]   ;;  %s5849_s1 = inlined_call_operand.vmem [shape: f32[64,32], index: 1, kind: input, shape index: {}]   ;;  %s5850_s4 = inlined_call_operand.vmem [shape: f32[2,1], index: 4, kind: input, shape index: {}]   ;;  %s5851_s0 = inlined_call_operand.vmem [shape: f32[64,64], index: 0, kind: input, shape index: {}]   ;;  %s5852_s9 = inlined_call_operand.vmem [shape: f32[2,2048], index: 9, kind: input, shape index: {}]   ;;  %s5853_s10 = inlined_call_operand.vmem [shape: f32[16,2], index: 10, kind: input, shape index: {}]   ;;  %s5854_s8 = inlined_call_operand.vmem [shape: f32[16,16], index: 8, kind: input, shape index: {}]   ;;  %s5855_s11 = inlined_call_operand.vmem [shape: f32[16,16], index: 11, kind: input, shape index: {}]   ;;  %s5856_s13 = inlined_call_operand.vmem [shape: f32[4,1024], index: 13, kind: input, shape index: {}]   ;;  %s5857_s12 = inlined_call_operand.vmem [shape: f32[1,16], index: 12, kind: input, shape index: {}]   ;;  %s5858_s14 = inlined_call_operand.vmem [shape: f32[16,4], index: 14, kind: input, shape index: {}]   ;;  %s5859_s17 = inlined_call_operand.<no memory space> [shape: f32[1,1], index: 17, kind: input, shape index: {}]   ;;  %s5860_s15 = inlined_call_operand.vmem [shape: f32[16,16], index: 15, kind: input, shape index: {}]   ;;  %s5861_s16 = inlined_call_operand.vmem [shape: f32[1,16], index: 16, kind: input, shape index: {}]   ;;  %s5862_s18 = inlined_call_operand.vmem [shape: f32[1,128], index: 18, kind: output, shape index: {}]  }
   0x1   :  { %5875 = sst [smem:[#allocation11_spill]] %s5844_s6  ;;  %v4256_v23 = vld [vmem:[%s5847_s5] ss:$0 sm:$0xff]  ;;  %4446 = vset.pattern.permute.xlu0 %v4568_v42  ;;  %4447 = vset.pattern.permute.xlu1 %v4568_v42  ;;  %v76_v45 = vld [vmem:[%s5849_s1 + $0x38] sm:$0xff]  ;;  %v75_v46 = vld [vmem:[%s5849_s1 + $0x30] sm:$0xff] }
   0x2   :  { %5876 = sst [smem:[#allocation12_spill]] %s5845_s7  ;;  %v355_v25 = vld [vmem:[%s5848_s3] sm:$0x3]  ;;  %v4753_v40 = vshrl.u32 %v5866_v38, 7  ;;  %4387 = vmatprep.subr.mxu0 %v76_v45  ;;  %v74_v48 = vld [vmem:[%s5849_s1 + $0x28] sm:$0xff]  ;;  %v72_v52 = vld [vmem:[%s5849_s1 + $0x18] sm:$0xff] }
   0x3   :  { %5877 = sst [smem:[#allocation13_spill]] %s5846_s2  ;;  %4456 = vlog2.f32 %v355_v25  ;;  %4388 = vmatpush3.msra.mxu0 %v76_v45  ;;  %v335_v49 = vld [vmem:[%s5850_s4] sm:$0x3]  ;;  %v71_v54 = vld [vmem:[%s5849_s1 + $0x10] sm:$0xff]  ;;  %v70_v56 = vld [vmem:[%s5849_s1 + $0x8] sm:$0xff] }
   0x4   :  { %s5878_s29 = sld [smem:[#allocation11_spill]]  ;;  %v343_v43 = vsub.s32 0, %v4753_v40  ;;  %4389 = vmatprep.subr.mxu0 %v75_v46  ;;  %v73_v50 = vld [vmem:[%s5849_s1 + $0x20] sm:$0xff]  ;;  %v347_v51 = vsub.s32 1, %v4753_v40  ;;  %v336_v53 = vmul.f32 0.1, %v335_v49 }
   0x5   :  { %s5879_s23 = sld [smem:[#allocation12_spill]]  ;;  %4390 = vmatpush3.msra.mxu0 %v75_v46  ;;  %v69_v57 = vld [vmem:[%s5849_s1] sm:$0xff]  ;;  %v62_v59 = vld [vmem:[%s5851_s0 + $0x8] sm:$0xff]  ;;  %v63_v60 = vld [vmem:[%s5851_s0 + $0x10] sm:$0xff] }
   0x6   :  { %s5880_s19 = sld [smem:[#allocation13_spill]]  ;;  %4391 = vmatprep.subr.mxu0 %v74_v48  ;;  %v61_v58 = vld [vmem:[%s5851_s0] sm:$0xff]  ;;  %v64_v61 = vld [vmem:[%s5851_s0 + $0x18] sm:$0xff]  ;;  %v66_v63 = vld [vmem:[%s5851_s0 + $0x28] sm:$0xff] }
   0x7   :  { %4392 = vmatpush3.msra.mxu0 %v74_v48  ;;  %4403 = vmatprep.mubr.msk.f32.mxu0 %vm77_vm1, %v61_v58  ;;  %v65_v62 = vld [vmem:[%s5851_s0 + $0x20] sm:$0xff] }
   0x8   :  { %4393 = vmatprep.subr.mxu0 %v73_v50 }
   0x9   :  { %4394 = vmatpush3.msra.mxu0 %v73_v50 }
   0xa   :  { %v4669_v0 = vld [vmem:[%s5878_s29 + $0x18] sm:$0xff]  ;;  %v4674_v1 = vld [vmem:[%s5878_s29 + $0x8] sm:$0xff]  ;;  %v4679_v2 = vld [vmem:[%s5878_s29 + $0x10] sm:$0xff]  ;;  %4395 = vmatprep.subr.mxu0 %v72_v52 }
   0xb   :  { %v486_v3 = vmul.f32 %v4669_v0, %v4669_v0  ;;  %v484_v4 = vmul.f32 %v4674_v1, %v4674_v1  ;;  %v485_v5 = vmul.f32 %v4679_v2, %v4679_v2  ;;  %v4690_v6 = vld [vmem:[%s5878_s29] sm:$0xff]  ;;  %v4702_v9 = vld [vmem:[%s5879_s23 + $0x8] sm:$0xff]  ;;  %v4715_v16 = vld [vmem:[%s5879_s23 + $0x10] sm:$0xff]  ;;  %4396 = vmatpush3.msra.mxu0 %v72_v52 }
   0xc   :  { %v483_v7 = vmul.f32 %v4690_v6, %v4690_v6  ;;  %v4697_v8 = vld [vmem:[%s5879_s23] sm:$0xff]  ;;  %v540_v15 = vmul.f32 %v4702_v9, %v4702_v9  ;;  %v4720_v17 = vld [vmem:[%s5879_s23 + $0x18] sm:$0xff]  ;;  %v541_v18 = vmul.f32 %v4715_v16, %v4715_v16  ;;  %v272_v22 = vld [vmem:[%s5880_s19 + $0x8] sm:$0xff]  ;;  %4397 = vmatprep.subr.mxu0 %v71_v54 }
   0xd   :  { %v496_v10 = vsel %vm247_vm0, %v486_v3, 0.0  ;;  %v490_v11 = vsel %vm247_vm0, %v484_v4, 0.0  ;;  %v493_v12 = vsel %vm247_vm0, %v485_v5, 0.0  ;;  %v539_v14 = vmul.f32 %v4697_v8, %v4697_v8  ;;  %v271_v24 = vld [vmem:[%s5880_s19] sm:$0xff]  ;;  %v274_v30 = vld [vmem:[%s5880_s19 + $0x18] sm:$0xff]  ;;  %v273_v31 = vld [vmem:[%s5880_s19 + $0x10] sm:$0xff]  ;;  %4398 = vmatpush3.msra.mxu0 %v71_v54 }
   0xe   :  { %497 = vadd.xlane.f32.xlu1 %v496_v10  ;;  %491 = vadd.xlane.f32.xlu0 %v490_v11  ;;  %v487_v13 = vsel %vm247_vm0, %v483_v7, 0.0  ;;  %v546_v20 = vsel %vm247_vm0, %v540_v15, 0.0  ;;  %v542_v21 = vmul.f32 %v4720_v17, %v4720_v17  ;;  %v549_v26 = vsel %vm247_vm0, %v541_v18, 0.0  ;;  %v67_v3 = vld [vmem:[%s5851_s0 + $0x30] sm:$0xff]  ;;  %v68_v4 = vld [vmem:[%s5851_s0 + $0x38] sm:$0xff] }
   0xf   :  { %v543_v19 = vsel %vm247_vm0, %v539_v14, 0.0  ;;  %v283_v28 = vmul.f32 %v4256_v23, %v272_v22  ;;  %v282_v29 = vmul.f32 %v4256_v23, %v271_v24  ;;  %v285_v33 = vmul.f32 %v4256_v23, %v274_v30  ;;  %4399 = vmatprep.subr.mxu0 %v70_v56 }
  0x10   :  { %v552_v27 = vsel %vm247_vm0, %v542_v21, 0.0  ;;  %v284_v35 = vmul.f32 %v4256_v23, %v273_v31  ;;  %v4457_v39 = vpop.eup %4456  ;;  %4400 = vmatpush3.msra.mxu0 %v70_v56 }
  0x11   :  { %v289_v32 = vsel %vm247_vm0, %v283_v28, 0.0  ;;  %v286_v34 = vsel %vm247_vm0, %v282_v29, 0.0  ;;  %v295_v36 = vsel %vm247_vm0, %v285_v33, 0.0  ;;  %v357_v41 = vmul.f32 0.6931472, %v4457_v39  ;;  %4401 = vmatprep.subr.mxu0 %v69_v57 }
  0x12   :  { %494 = vadd.xlane.f32.xlu1 %v493_v12  ;;  %488 = vadd.xlane.f32.xlu0 %v487_v13  ;;  %v292_v37 = vsel %vm247_vm0, %v284_v35, 0.0 }
  0x13   :  { %v358_v44 = vmul.f32 1.442695, %v357_v41  ;;  %4402 = vmatpush3.msra.mxu0 %v69_v57 }
  0x14   :  { %4404 = vmatmul.mubr.msk.f32.vlgmr.msra.gmra.mxu0 %vm77_vm1, %v62_v59 }
  0x15   :  { %v363_v47 = vrot.slane %v358_v44, %v343_v43  ;;  %v374_v55 = vrot.slane %v358_v44, %v347_v51  ;;  %4406 = vmatprep.mubr.msk.f32.mxu0 %vm77_vm1, %v63_v60 }
  0x16   :  { %544 = vadd.xlane.f32.xlu1 %v543_v19  ;;  %547 = vadd.xlane.f32.xlu0 %v546_v20 }
  0x18   :  { %4407 = vmatmul.mubr.msk.f32.gmra.mxu0 %vm77_vm1, %v64_v61 }
  0x19   :  { %4409 = vmatprep.mubr.msk.f32.mxu0 %vm77_vm1, %v65_v62 }
  0x1a   :  { %550 = vadd.xlane.f32.xlu1 %v549_v26  ;;  %553 = vadd.xlane.f32.xlu0 %v552_v27 }
  0x1c   :  { %4410 = vmatmul.mubr.msk.f32.gmra.mxu0 %vm77_vm1, %v66_v63 }
  0x1d   :  { %4412 = vmatprep.mubr.msk.f32.mxu0 %vm77_vm1, %v67_v3 }
  0x1e   :  { %290 = vadd.xlane.f32.xlu1 %v289_v32  ;;  %287 = vadd.xlane.f32.xlu0 %v286_v34 }
  0x20   :  { %4413 = vmatmul.mubr.msk.f32.gmra.mxu0 %vm77_vm1, %v68_v4 }
  0x22   :  { %296 = vadd.xlane.f32.xlu1 %v295_v36  ;;  %293 = vadd.xlane.f32.xlu0 %v292_v37 }
  0x33   :  { %365 = vbcast.lane.b32.xlu1 %v363_v47, 256 }
  0x37   :  { %369 = vbcast.lane.b32.xlu1 %v363_v47, 264 }
  0x38   :  { %339 = vperm.xlu0 %4446, %v336_v53  }
  0x3b   :  { %376 = vbcast.lane.b32.xlu1 %v374_v55, 256 }
  0x3f   :  { %380 = vbcast.lane.b32.xlu1 %v374_v55, 264 }
  0x97   :  { %v498_v5 = vpop.xlane.xlu1 %497  ;;  %v492_v7 = vpop.xlane.xlu0 %491 }
  0x98   :  { %4458 = vrsqrt.f32 %v498_v5  ;;  %vm522_vm2 = vcmp.eq.f32.partialorder %v498_v5, inf  ;;  %v525_v21 = vand.u32 2147483648, %v498_v5  ;;  %vm524_vm3 = vcmp.eq.f32.partialorder %v498_v5, 0.0 }
  0x99   :  { %4460 = vrsqrt.f32 %v492_v7  ;;  %vm508_vm4 = vcmp.eq.f32.partialorder %v492_v7, inf  ;;  %v511_v24 = vand.u32 2147483648, %v492_v7  ;;  %vm510_vm5 = vcmp.eq.f32.partialorder %v492_v7, 0.0 }
  0x9b   :  { %v495_v10 = vpop.xlane.xlu1 %494  ;;  %v489_v11 = vpop.xlane.xlu0 %488 }
  0x9c   :  { %4462 = vrsqrt.f32 %v495_v10  ;;  %vm515_vm6 = vcmp.eq.f32.partialorder %v495_v10, inf  ;;  %vm517_vm7 = vcmp.eq.f32.partialorder %v495_v10, 0.0  ;;  %v518_v32 = vand.u32 2147483648, %v495_v10 }
  0x9d   :  { %4464 = vrsqrt.f32 %v489_v11  ;;  %vm501_vm8 = vcmp.eq.f32.partialorder %v489_v11, inf  ;;  %vm503_vm9 = vcmp.eq.f32.partialorder %v489_v11, 0.0  ;;  %v504_v36 = vand.u32 2147483648, %v489_v11 }
  0x9f   :  { %v545_v12 = vpop.xlane.xlu1 %544  ;;  %v548_v13 = vpop.xlane.xlu0 %547 }
  0xa0   :  { %4466 = vrsqrt.f32 %v545_v12  ;;  %vm557_vm10 = vcmp.eq.f32.partialorder %v545_v12, inf  ;;  %vm559_vm11 = vcmp.eq.f32.partialorder %v545_v12, 0.0  ;;  %v560_v46 = vand.u32 2147483648, %v545_v12 }
  0xa1   :  { %4468 = vrsqrt.f32 %v548_v13  ;;  %vm564_vm12 = vcmp.eq.f32.partialorder %v548_v13, inf  ;;  %vm566_vm13 = vcmp.eq.f32.partialorder %v548_v13, 0.0  ;;  %v567_v52 = vand.u32 2147483648, %v548_v13 }
  0xa3   :  { %v4820_v14 = vpop.xlane.xlu1 %550  ;;  %v4822_v15 = vpop.xlane.xlu0 %553 }
  0xa4   :  { %4470 = vrsqrt.f32 %v4820_v14  ;;  %vm571_vm14 = vcmp.eq.f32.partialorder %v4820_v14, inf  ;;  %vm573_vm15 = vcmp.eq.f32.partialorder %v4820_v14, 0.0  ;;  %v574_v61 = vand.u32 2147483648, %v4820_v14 }
  0xa5   :  { %v4459_v18 = vpop.eup %4458  ;;  %4472 = vrsqrt.f32 %v4822_v15  ;;  %vm578_vm1 = vcmp.eq.f32.partialorder %v4822_v15, inf  ;;  %v581_v3 = vand.u32 2147483648, %v4822_v15 }
  0xa6   :  { %v4461_v19 = vpop.eup %4460  ;;  %v521_v20 = vmul.f32 %v4459_v18, %v498_v5  ;;  %v4569_v18 = vmov 1983009808  }
  0xa7   :  { %v507_v22 = vmul.f32 %v4461_v19, %v492_v7 }
  0xa8   :  { %v523_v23 = vsel %vm522_vm2, %v498_v5, %v521_v20  ;;  %vm580_vm2 = vcmp.eq.f32.partialorder %v4822_v15, 0.0 }
  0xa9   :  { %v4463_v25 = vpop.eup %4462  ;;  %v526_v26 = vsel %vm524_vm3, %v525_v21, %v523_v23  ;;  %v509_v27 = vsel %vm508_vm4, %v492_v7, %v507_v22  ;;  %vm5873_vm3 = vcmask 1041408   ;;  %vm1305_vm4 = vcmask 15360  }
  0xaa   :  { %v4465_v28 = vpop.eup %4464  ;;  %v512_v29 = vsel %vm510_vm5, %v511_v24, %v509_v27  ;;  %v514_v30 = vmul.f32 %v4463_v25, %v495_v10  ;;  %v530_v34 = vmax.f32 %v526_v26, 1e-12  ;;  %vm959_vm5 = vcmask 130048  }
  0xab   :  { %v528_v31 = vmax.f32 %v512_v29, 1e-12  ;;  %v500_v33 = vmul.f32 %v4465_v28, %v489_v11 }
  0xac   :  { %v516_v35 = vsel %vm515_vm6, %v495_v10, %v514_v30 }
  0xad   :  { %v4467_v37 = vpop.eup %4466  ;;  %4474 = vrcp.f32 %v528_v31  ;;  %v519_v39 = vsel %vm517_vm7, %v518_v32, %v516_v35  ;;  %v502_v41 = vsel %vm501_vm8, %v489_v11, %v500_v33  ;;  %v1225_v32 = vld [vmem:[%s5852_s9 + $0x8] sm:$0xff] }
  0xae   :  { %v4469_v42 = vpop.eup %4468  ;;  %v505_v44 = vsel %vm503_vm9, %v504_v36, %v502_v41  ;;  %v556_v45 = vmul.f32 %v4467_v37, %v545_v12  ;;  %v529_v47 = vmax.f32 %v519_v39, 1e-12  ;;  %4476 = vrcp.f32 %v530_v34 }
  0xaf   :  { %v527_v48 = vmax.f32 %v505_v44, 1e-12  ;;  %v563_v49 = vmul.f32 %v4469_v42, %v548_v13  ;;  %v1254_v36 = vcombine.high %v1225_v32, %v1225_v32 }
  0xb0   :  { %v558_v50 = vsel %vm557_vm10, %v545_v12, %v556_v45 }
  0xb1   :  { %v4471_v53 = vpop.eup %4470  ;;  %4478 = vrcp.f32 %v527_v48  ;;  %v561_v54 = vsel %vm559_vm11, %v560_v46, %v558_v50  ;;  %v565_v55 = vsel %vm564_vm12, %v548_v13, %v563_v49  ;;  %v1227_v49 = vld [vmem:[%s5852_s9 + $0x18] sm:$0xff]  ;;  %v5867_v50 = vmov 0.0  }
  0xb2   :  { %v4473_v56 = vpop.eup %4472  ;;  %v583_v57 = vmax.f32 %v561_v54, 1e-12  ;;  %v568_v58 = vsel %vm566_vm13, %v567_v52, %v565_v55  ;;  %v570_v59 = vmul.f32 %v4471_v53, %v4820_v14  ;;  %4480 = vrcp.f32 %v529_v47  ;;  %v1228_v52 = vld [vmem:[%s5853_s10] sm:$0xff] }
  0xb3   :  { %v584_v60 = vmax.f32 %v568_v58, 1e-12  ;;  %v577_v62 = vmul.f32 %v4473_v56, %v4822_v15  ;;  %v1288_v55 = vcombine.high %v1227_v49, %v1227_v49 }
  0xb4   :  { %4482 = vrcp.f32 %v583_v57  ;;  %v572_v63 = vsel %vm571_vm14, %v4820_v14, %v570_v59  ;;  %v1239_v14 = vunpack.c.l.s4 %v4569_v18  ;;  %v1229_v57 = vld [vmem:[%s5853_s10 + $0x8] sm:$0xff] }
  0xb5   :  { %4484 = vrcp.f32 %v584_v60  ;;  %v575_v4 = vsel %vm573_vm15, %v574_v61, %v572_v63  ;;  %v579_v5 = vsel %vm578_vm1, %v4822_v15, %v577_v62 }
  0xb6   :  { %v585_v7 = vmax.f32 %v575_v4, 1e-12  ;;  %v582_v10 = vsel %vm580_vm2, %v581_v3, %v579_v5  ;;  %v1240_v15 = vunpack.c.0.s8 %v1239_v14 }
  0xb7   :  { %v586_v11 = vmax.f32 %v582_v10, 1e-12 }
  0xb8   :  { %4486 = vrcp.f32 %v585_v7  ;;  %v4851_v27 = vsub.s32 %v1240_v15, %v4753_v40 }
  0xb9   :  { %4488 = vrcp.f32 %v586_v11 }
  0xba   :  { %v4475_v12 = vpop.eup %4474  ;;  %v1268_v42 = vrot.slane %v1254_v36, %v4851_v27  ;;  %v1261_v47 = vrot.slane %v1225_v32, %v4851_v27  ;;  %v1302_v59 = vrot.slane %v1288_v55, %v4851_v27  ;;  %v1295_v61 = vrot.slane %v1227_v49, %v4851_v27 }
  0xbb   :  { %v534_v13 = vmul.f32 %v4475_v12, %v4674_v1  ;;  %v4477_v19 = vpop.eup %4476  ;;  %v1224_v1 = vld [vmem:[%s5852_s9] sm:$0xff] }
  0xbc   :  { %v538_v24 = vmul.f32 %v4477_v19, %v4669_v0  ;;  %v1237_v0 = vcombine.high %v1224_v1, %v1224_v1  ;;  %v1244_v41 = vrot.slane %v1224_v1, %v4851_v27  ;;  %v1270_v46 = vcombine.high %v1268_v42, %v1268_v42 }
  0xbd   :  { %4415 = vmatprep.subr.msk.mxu1 %vm247_vm0, %v534_v13  ;;  %v1269_v53 = vcombine.high %v1261_v47, %v1261_v47  ;;  %v1304_v60 = vcombine.high %v1302_v59, %v1302_v59  ;;  %v1303_v62 = vcombine.high %v1295_v61, %v1295_v61 }
  0xbe   :  { %v4479_v20 = vpop.eup %4478  ;;  %4416 = vmatpush3.xpose.msk.msra.mxu1 %vm247_vm0, %v534_v13  ;;  %v1251_v35 = vrot.slane %v1237_v0, %v4851_v27  ;;  %v1252_v45 = vcombine.high %v1244_v41, %v1244_v41 }
  0xbf   :  { %v532_v21 = vmul.f32 %v4479_v20, %v4690_v6  ;;  %v4481_v22 = vpop.eup %4480 }
  0xc0   :  { %v536_v28 = vmul.f32 %v4481_v22, %v4679_v2 }
  0xc1   :  { %v4483_v23 = vpop.eup %4482  ;;  %4417 = vmatprep.subr.msk.mxu1 %vm247_vm0, %v532_v21  ;;  %4419 = vmatprep.mubr.msk.f32.mxu1 %vm247_vm0, %v532_v21 }
  0xc2   :  { %v4485_v25 = vpop.eup %4484  ;;  %4418 = vmatpush3.xpose.msk.msra.mxu1 %vm247_vm0, %v532_v21  ;;  %v588_v26 = vmul.f32 %v4483_v23, %v4697_v8 }
  0xc3   :  { %4422 = vmatprep.subr.msk.mxu1 %vm247_vm0, %v538_v24  ;;  %v590_v6 = vmul.f32 %v4485_v25, %v4702_v9 }
  0xc4   :  { %v595_v29 = vmul.f32 %v588_v26, %v532_v21 }
  0xc5   :  { %v4487_v30 = vpop.eup %4486  ;;  %4420 = vmatmul.mubr.msk.f32.vlgmr.msra.gmra.mxu1 %vm247_vm0, %v534_v13  ;;  %v596_v31 = vmul.f32 %v590_v6, %v534_v13 }
  0xc6   :  { %v4489_v8 = vpop.eup %4488  ;;  %4423 = vmatpush3.xpose.msk.msra.mxu1 %vm247_vm0, %v538_v24  ;;  %4426 = vmatprep.mubr.msk.f32.mxu1 %vm247_vm0, %v536_v28  ;;  %v599_v9 = vsel %vm247_vm0, %v595_v29, 0.0  ;;  %v592_v33 = vmul.f32 %v4487_v30, %v4715_v16  ;;  %v1226_v16 = vld [vmem:[%s5852_s9 + $0x10] sm:$0xff] }
  0xc7   :  { %4424 = vmatprep.subr.msk.mxu1 %vm247_vm0, %v536_v28  ;;  %600 = vadd.xlane.f32.xlu1 %v599_v9  ;;  %v602_v2 = vsel %vm247_vm0, %v596_v31, 0.0  ;;  %v594_v34 = vmul.f32 %v4489_v8, %v4720_v17  ;;  %v1253_v17 = vcombine.high %v1251_v35, %v1251_v35  ;;  %v1271_v44 = vcombine.high %v1226_v16, %v1226_v16 }
  0xc8   :  { %603 = vadd.xlane.f32.xlu0 %v602_v2  ;;  %4440 = vmatprep.mubr.msk.f32.mxu0 %vm247_vm0, %v592_v33  ;;  %v4867_v37 = vmul.f32 %v592_v33, %v536_v28  ;;  %v1278_v54 = vrot.slane %v1226_v16, %v4851_v27  ;;  %v288_v16 = vpop.xlane.xlu0 %287 }
  0xc9   :  { %4436 = vmatprep.subr.msk.mxu0 %vm247_vm0, %v594_v34  ;;  %v4870_v39 = vmul.f32 %v594_v34, %v538_v24  ;;  %v1285_v48 = vrot.slane %v1271_v44, %v4851_v27 }
  0xca   :  { %4425 = vmatpush3.xpose.msk.msra.mxu1 %vm247_vm0, %v536_v28  ;;  %4437 = vmatpush3.xpose.msk.msra.mxu0 %vm247_vm0, %v594_v34  ;;  %v1286_v58 = vcombine.high %v1278_v54, %v1278_v54 }
  0xcb   :  { %4429 = vmatprep.subr.msk.mxu1 %vm247_vm0, %v590_v6  ;;  %4438 = vmatprep.subr.msk.mxu0 %vm247_vm0, %v592_v33  ;;  %v1287_v56 = vcombine.high %v1285_v48, %v1285_v48 }
  0xcc   :  { %v294_v44 = vpop.xlane.xlu0 %293 }
  0xcd   :  { %4427 = vmatmul.mubr.msk.f32.vlgmr.msra.gmra.mxu1 %vm247_vm0, %v538_v24 }
  0xce   :  { %4430 = vmatpush3.xpose.msk.msra.mxu1 %vm247_vm0, %v590_v6  ;;  %4433 = vmatprep.mubr.msk.f32.mxu1 %vm247_vm0, %v588_v26 }
  0xcf   :  { %4439 = vmatpush3.xpose.msk.msra.mxu0 %vm247_vm0, %v592_v33  ;;  %4431 = vmatprep.subr.msk.mxu1 %vm247_vm0, %v588_v26 }
  0xd0   :  { %4281 = vmatprep.subr.msk.mxu0 %vm5873_vm3, %v1253_v17  ;;  %v298_v17 = vmul.f32 1.442695, %v288_v16 }
  0xd2   :  { %4441 = vmatmul.mubr.msk.f32.vlgmr.msra.gmra.mxu0 %vm247_vm0, %v594_v34  ;;  %4432 = vmatpush3.xpose.msk.msra.mxu1 %vm247_vm0, %v588_v26 }
  0xd3   :  { %4282 = vmatpush1.msk.msra.mxu0 %vm5873_vm3, %v1251_v35  ;;  %1485 = vmatprep.mubr.f32.mxu0 %v5867_v50  ;;  %v291_v35 = vpop.xlane.xlu1 %290 }
  0xd4   :  { %4277 = vmatprep.subr.msk.mxu1 %vm5873_vm3, %v1252_v45  ;;  %4289 = vmatprep.subr.msk.mxu0 %vm5873_vm3, %v1270_v46  ;;  %v4405_v63 = vpop.f32.mrf.mxu0  ;;  %v300_v36 = vmul.f32 1.442695, %v291_v35  ;;  %v302_v45 = vmul.f32 1.442695, %v294_v44 }
  0xd5   :  { %4434 = vmatmul.mubr.msk.f32.vlgmr.msra.gmra.mxu1 %vm247_vm0, %v590_v6  ;;  %v208_v10 = vand.u32 2147483647, %v4405_v63 }
  0xd6   :  { %4283 = vmatmul.mubr.msk.f32.vlgmr.msra.gmra.mxu0 %vm1305_vm4, %v1228_v52  ;;  %4278 = vmatpush1.msk.msra.mxu1 %vm5873_vm3, %v1244_v41  ;;  %v168_v3 = vpop.f32.mrf.mxu0 }
  0xd7   :  { %1408 = vmatprep.mubr.f32.mxu1 %v5867_v50  ;;  %1491 = vmatprep.mubr.f32.mxu0 %v5867_v50  ;;  %v207_v12 = vand.u32 2147483647, %v168_v3  ;;  %v216_v14 = vadd.f32 1e-05, %v208_v10  ;;  %v297_v41 = vpop.xlane.xlu1 %296  ;;  %v4981_v10 = vld [vmem:[%s5854_s8] sm:$0xff] }
  0xd8   :  { %4290 = vmatpush1.msk.msra.mxu0 %vm5873_vm3, %v1268_v42  ;;  %4285 = vmatprep.subr.msk.mxu1 %vm5873_vm3, %v1269_v53  ;;  %v4408_v4 = vpop.f32.mrf.mxu0  ;;  %v304_v42 = vmul.f32 1.442695, %v297_v41 }
  0xd9   :  { %4279 = vmatmul.mubr.msk.f32.vlgmr.msra.gmra.mxu1 %vm1305_vm4, %v1228_v52  ;;  %4297 = vmatprep.subr.msk.mxu0 %vm5873_vm3, %v1287_v56  ;;  %v215_v19 = vadd.f32 1e-05, %v207_v12  ;;  %4490 = vlog2.f32 %v216_v14  ;;  %v210_v22 = vand.u32 2147483647, %v4408_v4 }
  0xda   :  { %4284 = vmatmul.mubr.msk.f32.gmra.mxu0 %vm1305_vm4, %v1229_v57  ;;  %1414 = vmatprep.mubr.f32.mxu1 %v5867_v50  ;;  %v4953_v5 = vpop.f32.mrf.mxu0 }
  0xdb   :  { %1639 = vmatprep.mubr.f32.mxu0 %v5867_v50  ;;  %4286 = vmatpush1.msk.msra.mxu1 %vm5873_vm3, %v1261_v47  ;;  %4492 = vlog2.f32 %v215_v19  ;;  %v218_v24 = vadd.f32 1e-05, %v210_v22 }
  0xdc   :  { %4293 = vmatprep.subr.msk.mxu1 %vm5873_vm3, %v1286_v58  ;;  %v4411_v7 = vpop.f32.mrf.mxu0 }
  0xdd   :  { %4280 = vmatmul.mubr.msk.f32.gmra.mxu1 %vm1305_vm4, %v1229_v57  ;;  %v212_v13 = vand.u32 2147483647, %v4411_v7 }
  0xde   :  { %4291 = vmatmul.mubr.msk.f32.vlgmr.msra.gmra.mxu0 %vm1305_vm4, %v1228_v52  ;;  %1562 = vmatprep.mubr.f32.mxu1 %v5867_v50  ;;  %v188_v11 = vpop.f32.mrf.mxu0 }
  0xdf   :  { %1645 = vmatprep.mubr.f32.mxu0 %v5867_v50  ;;  %4298 = vmatpush1.msk.msra.mxu0 %vm5873_vm3, %v1285_v48  ;;  %v211_v18 = vand.u32 2147483647, %v188_v11  ;;  %v220_v20 = vadd.f32 1e-05, %v212_v13 }
  0xe0   :  { %4305 = vmatprep.subr.msk.mxu0 %vm5873_vm3, %v1304_v60  ;;  %v4414_v15 = vpop.f32.mrf.mxu0 }
  0xe1   :  { %4287 = vmatmul.mubr.msk.f32.vlgmr.msra.gmra.mxu1 %vm1305_vm4, %v1228_v52  ;;  %v219_v21 = vadd.f32 1e-05, %v211_v18  ;;  %4494 = vlog2.f32 %v220_v20  ;;  %v214_v23 = vand.u32 2147483647, %v4414_v15 }
  0xe2   :  { %4292 = vmatmul.mubr.msk.f32.gmra.mxu0 %vm1305_vm4, %v1229_v57  ;;  %1568 = vmatprep.mubr.f32.mxu1 %v5867_v50 }
  0xe3   :  { %1793 = vmatprep.mubr.f32.mxu0 %v5867_v50  ;;  %4294 = vmatpush1.msk.msra.mxu1 %vm5873_vm3, %v1278_v54  ;;  %4496 = vlog2.f32 %v219_v21  ;;  %v222_v1 = vadd.f32 1e-05, %v214_v23 }
  0xe4   :  { %4301 = vmatprep.subr.msk.mxu1 %vm5873_vm3, %v1303_v62  ;;  %4498 = vlog2.f32 %v218_v24  ;;  %v4976_v62 = vld [vmem:[%s5854_s8 + $0x8] sm:$0xff] }
  0xe5   :  { %4288 = vmatmul.mubr.msk.f32.gmra.mxu1 %vm1305_vm4, %v1229_v57  ;;  %4500 = vlog2.f32 %v222_v1 }
  0xe6   :  { %4299 = vmatmul.mubr.msk.f32.vlgmr.msra.gmra.mxu0 %vm1305_vm4, %v1228_v52  ;;  %1716 = vmatprep.mubr.f32.mxu1 %v5867_v50  ;;  %v4491_v25 = vpop.eup %4490  ;;  %4502 = vpow2.f32 %v300_v36 }
  0xe7   :  { %1799 = vmatprep.mubr.f32.mxu0 %v5867_v50  ;;  %4306 = vmatpush1.msk.msra.mxu0 %vm5873_vm3, %v1302_v59  ;;  %v4955_v28 = vmul.f32 0.6931472, %v4491_v25  ;;  %4504 = vpow2.f32 %v298_v17  ;;  %v4989_v25 = vpop.f32.mrf.mxu0 }
  0xe8   :  { %v4493_v26 = vpop.eup %4492  ;;  %4506 = vpow2.f32 %v304_v42 }
  0xe9   :  { %4295 = vmatmul.mubr.msk.f32.vlgmr.msra.gmra.mxu1 %vm1305_vm4, %v1228_v52  ;;  %v4959_v0 = vmul.f32 0.6931472, %v4493_v26  ;;  %4508 = vpow2.f32 %v302_v45 }
  0xea   :  { %4300 = vmatmul.mubr.msk.f32.gmra.mxu0 %vm1305_vm4, %v1229_v57  ;;  %1722 = vmatprep.mubr.f32.mxu1 %v5867_v50 }
  0xeb   :  { %1947 = vmatprep.mubr.f32.mxu0 %v5867_v50  ;;  %4302 = vmatpush1.msk.msra.mxu1 %vm5873_vm3, %v1295_v61 }
  0xed   :  { %4296 = vmatmul.mubr.msk.f32.gmra.mxu1 %vm1305_vm4, %v1229_v57 }
  0xee   :  { %4307 = vmatmul.mubr.msk.f32.vlgmr.msra.gmra.mxu0 %vm1305_vm4, %v1228_v52  ;;  %1870 = vmatprep.mubr.f32.mxu1 %v5867_v50  ;;  %v4495_v6 = vpop.eup %4494 }
  0xef   :  { %1953 = vmatprep.mubr.f32.mxu0 %v5867_v50  ;;  %v4957_v29 = vmul.f32 0.6931472, %v4495_v6 }
  0xf0   :  { %v4497_v27 = vpop.eup %4496 }
  0xf1   :  { %4303 = vmatmul.mubr.msk.f32.vlgmr.msra.gmra.mxu1 %vm1305_vm4, %v1228_v52  ;;  %v4961_v30 = vmul.f32 0.6931472, %v4497_v27  ;;  %v4499_v8 = vpop.eup %4498 }
  0xf2   :  { %4308 = vmatmul.mubr.msk.f32.gmra.mxu0 %vm1305_vm4, %v1229_v57  ;;  %1876 = vmatprep.mubr.f32.mxu1 %v5867_v50  ;;  %v4501_v9 = vpop.eup %4500  ;;  %v4967_v33 = vmul.f32 0.6931472, %v4499_v8 }
  0xf3   :  { %2203 = vmatprep.mubr.f32.mxu0 %v5867_v50  ;;  %v4969_v2 = vmul.f32 0.6931472, %v4501_v9  ;;  %v4503_v46 = vpop.eup %4502 }
  0xf4   :  { %v307_v47 = vadd.f32 1.0, %v4503_v46  ;;  %v4505_v48 = vpop.eup %4504 }
  0xf5   :  { %4304 = vmatmul.mubr.msk.f32.gmra.mxu1 %vm1305_vm4, %v1229_v57  ;;  %v306_v49 = vadd.f32 1.0, %v4505_v48  ;;  %v4507_v52 = vpop.eup %4506 }
  0xf6   :  { %2126 = vmatprep.mubr.f32.mxu1 %v5867_v50  ;;  %4510 = vlog2.f32 %v307_v47  ;;  %v4509_v53 = vpop.eup %4508  ;;  %v309_v54 = vadd.f32 1.0, %v4507_v52 }
  0xf7   :  { %4512 = vlog2.f32 %v306_v49  ;;  %v308_v55 = vadd.f32 1.0, %v4509_v53 }
  0xf8   :  { %4514 = vlog2.f32 %v309_v54  ;;  %v340_v54 = vpop.permute.xlu0 %339 }
  0xf9   :  { %4516 = vlog2.f32 %v308_v55 }
 0x103   :  { %v4511_v56 = vpop.eup %4510 }
 0x104   :  { %v313_v57 = vmul.f32 0.6931472, %v4511_v56  ;;  %v4513_v58 = vpop.eup %4512 }
 0x105   :  { %v311_v60 = vmul.f32 0.6931472, %v4513_v58  ;;  %v4515_v3 = vpop.eup %4514 }
 0x106   :  { %v319_v59 = vadd.f32 0.001, %v313_v57  ;;  %v4517_v11 = vpop.eup %4516  ;;  %v317_v14 = vmul.f32 0.6931472, %v4515_v3 }
 0x107   :  { %v318_v4 = vadd.f32 0.001, %v311_v60  ;;  %v315_v21 = vmul.f32 0.6931472, %v4517_v11  ;;  %v5021_v11 = vsel %vm247_vm0, %v4867_v37, 0.0 }
 0x108   :  { %4518 = vlog2.f32 %v319_v59  ;;  %v321_v15 = vadd.f32 0.001, %v317_v14 }
 0x109   :  { %v320_v24 = vadd.f32 0.001, %v315_v21 }
 0x115   :  { %v4519_v36 = vpop.eup %4518 }
 0x116   :  { %v325_v48 = vmul.f32 0.6931472, %v4519_v36 }
 0x185   :  { %v4421_v61 = vpop.f32.mrf.mxu1 }
 0x186   :  { %v778_v63 = vmul.f32 10.0, %v4421_v61  ;;  %v5011_v61 = vrot.slane %v340_v54, %v343_v43 }
 0x187   :  { %v687_v7 = vpop.f32.mrf.mxu1 }
 0x188   :  { %v949_v12 = vmul.f32 1.442695, %v778_v63  ;;  %v777_v13 = vmul.f32 10.0, %v687_v7  ;;  %v4984_v18 = vmul.f32 %v778_v63, %v4976_v62  ;;  %v5015_v63 = vrot.slane %v340_v54, %v347_v51 }
 0x18a   :  { %4520 = vpow2.f32 %v949_v12  ;;  %v947_v19 = vmul.f32 1.442695, %v777_v13  ;;  %v4987_v20 = vmul.f32 %v777_v13, %v4981_v10 }
 0x18b   :  { %4522 = vlog2.f32 %v318_v4 }
 0x18c   :  { %4524 = vpow2.f32 %v947_v19  ;;  %v332_v19 = vmul.f32 1.442695, %v325_v48 }
 0x18d   :  { %v4428_v22 = vpop.f32.mrf.mxu1  ;;  %4526 = vlog2.f32 %v321_v15 }
 0x18e   :  { %v780_v23 = vmul.f32 10.0, %v4428_v22  ;;  %4528 = vlog2.f32 %v320_v24 }
 0x18f   :  { %v768_v1 = vpop.f32.mrf.mxu1 }
 0x190   :  { %v779_v26 = vmul.f32 10.0, %v768_v1  ;;  %v4992_v6 = vmul.f32 %v780_v23, %v4976_v62  ;;  %v953_v27 = vmul.f32 1.442695, %v780_v23 }
 0x192   :  { %5881 = vst [vmem:[#allocation3_spill] sm:$0xff] %v4992_v6  ;;  %v4442_v8 = vpop.f32.mrf.mxu0  ;;  %v4995_v9 = vmul.f32 %v779_v26, %v4981_v10  ;;  %4530 = vpow2.f32 %v953_v27  ;;  %v951_v55 = vmul.f32 1.442695, %v779_v26 }
 0x193   :  { %v946_v35 = vmul.f32 10.0, %v4442_v8 }
 0x194   :  { %v934_v16 = vpop.f32.mrf.mxu0 }
 0x195   :  { %v978_v17 = vmul.f32 1.442695, %v946_v35  ;;  %v4997_v41 = vmul.f32 10.0, %v934_v16  ;;  %v4435_v42 = vpop.f32.mrf.mxu1  ;;  %v5000_v44 = vmul.f32 %v946_v35, %v4976_v62 }
 0x196   :  { %v944_v45 = vmul.f32 10.0, %v4435_v42  ;;  %v5002_v46 = vpop.f32.mrf.mxu0 }
 0x197   :  { %5882 = vst [vmem:[#allocation4_spill] sm:$0xff] %v5000_v44  ;;  %v4521_v47 = vpop.eup %4520  ;;  %4532 = vpow2.f32 %v978_v17  ;;  %v976_v49 = vmul.f32 1.442695, %v4997_v41  ;;  %v853_v52 = vpop.f32.mrf.mxu1  ;;  %vm1962_vm7 = vcmp.ge.f32.partialorder %v5002_v46, 0.0  ;;  %v1994_v24 = vmul.f32 0.1, %v5002_v46 }
 0x198   :  { %v4523_v53 = vpop.eup %4522  ;;  %v974_v56 = vmul.f32 1.442695, %v944_v45  ;;  %v1489_v57 = vpop.f32.mrf.mxu0  ;;  %v956_v58 = vmul.f32 %v4521_v47, %v4976_v62  ;;  %v5007_v59 = vmul.f32 %v944_v45, %v4976_v62  ;;  %v943_v4 = vmul.f32 10.0, %v853_v52 }
 0x199   :  { %v4525_v60 = vpop.eup %4524  ;;  %4534 = vpow2.f32 %v976_v49  ;;  %v5017_v3 = vpop.f32.mrf.mxu1  ;;  %v323_v14 = vmul.f32 0.6931472, %v4523_v53  ;;  %v1995_v22 = vmul.f32 0.1, %v1489_v57  ;;  %vm1963_vm9 = vcmp.ge.f32.partialorder %v1489_v57, 0.0 }
 0x19a   :  { %5883 = vst [vmem:[#allocation5_spill] sm:$0xff] %v5007_v59  ;;  %4536 = vpow2.f32 %v974_v56  ;;  %v1493_v7 = vpop.f32.mrf.mxu0  ;;  %v963_v43 = vsel %vm959_vm5, %v956_v58, 0.0  ;;  %v955_v51 = vmul.f32 %v4525_v60, %v4981_v10  ;;  %v972_v1 = vmul.f32 1.442695, %v943_v4  ;;  %v4527_v8 = vpop.eup %4526  ;;  %v5058_v56 = vld [vmem:[%s5855_s11] sm:$0xff] }
 0x19b   :  { %vm1978_vm6 = vcmp.ge.f32.partialorder %v1493_v7, 0.0  ;;  %v2010_v12 = vmul.f32 0.1, %v1493_v7  ;;  %v5023_v13 = vpop.f32.mrf.mxu1  ;;  %4538 = vpow2.f32 %v951_v55  ;;  %964 = vadd.xlane.f32.xlu0 %v963_v43  ;;  %v1992_v35 = vmul.f32 0.1, %v5017_v3  ;;  %v4529_v45 = vpop.eup %4528 }
 0x19c   :  { %v1495_v21 = vpop.f32.mrf.mxu0  ;;  %v960_v23 = vsel %vm959_vm5, %v955_v51, 0.0  ;;  %v5039_v42 = vmul.f32 %v943_v4, %v4981_v10  ;;  %v5041_v47 = vpop.permute.xlu1 %365  ;;  %v1993_v48 = vmul.f32 0.1, %v5023_v13  ;;  %v331_v53 = vmul.f32 1.442695, %v323_v14 }
 0x19d   :  { %vm1979_vm8 = vcmp.ge.f32.partialorder %v1495_v21, 0.0  ;;  %v2011_v15 = vmul.f32 0.1, %v1495_v21  ;;  %v1416_v37 = vpop.f32.mrf.mxu1  ;;  %961 = vadd.xlane.f32.xlu1 %v960_v23  ;;  %v5033_v27 = vsel %vm1978_vm6, %v1493_v7, %v2010_v12  ;;  %vm1960_vm12 = vcmp.ge.f32.partialorder %v5017_v3, 0.0 }
 0x19e   :  { %v5030_v26 = vpop.f32.mrf.mxu0  ;;  %v2008_v36 = vmul.f32 0.1, %v1416_v37  ;;  %5884 = vst [vmem:[#allocation6_spill] sm:$0xff] %v5039_v42  ;;  %vm1976_vm10 = vcmp.ge.f32.partialorder %v1416_v37, 0.0  ;;  %vm1961_vm13 = vcmp.ge.f32.partialorder %v5023_v13, 0.0  ;;  %v5053_v55 = vsel %vm1963_vm9, %v1489_v57, %v1995_v22 }
 0x19f   :  { %v1418_v16 = vpop.f32.mrf.mxu1  ;;  %v5036_v17 = vsel %vm1979_vm8, %v1495_v21, %v2011_v15  ;;  %v329_v58 = vmul.f32 0.6931472, %v4527_v8  ;;  %v352_v60 = vadd.f32 %v5011_v61, %v332_v19  ;;  %v5065_v7 = vsel %vm1962_vm7, %v5002_v46, %v1994_v24  ;;  %v4531_v57 = vpop.eup %4530 }
 0x1a0   :  { %vm1977_vm11 = vcmp.ge.f32.partialorder %v1418_v16, 0.0  ;;  %v2009_v49 = vmul.f32 0.1, %v1418_v16  ;;  %v5044_v52 = vpop.f32.mrf.mxu0  ;;  %2167 = vmatprep.subr.mxu0 %v5036_v17  ;;  %v5070_v43 = vmul.f32 0.6931472, %v4529_v45  ;;  %4540 = vpow2.f32 %v972_v1 }
 0x1a1   :  { %2168 = vmatpush1.msra.mxu0 %v5033_v27  ;;  %v5050_v54 = vpop.f32.mrf.mxu1  ;;  %v5077_v19 = vsel %vm1976_vm10, %v1416_v37, %v2008_v36  ;;  %v1998_v46 = vmul.f32 0.1, %v5030_v26  ;;  %v5086_v15 = vsel %vm1961_vm13, %v5023_v13, %v1993_v48  ;;  %v5091_v37 = vsel %vm1960_vm12, %v5017_v3, %v1992_v35  ;;  %v5100_v13 = vld [vmem:[%s5855_s11 + $0x8] sm:$0xff] }
 0x1a2   :  { %v1647_v4 = vpop.f32.mrf.mxu0  ;;  %2169 = vmatprep.subr.mxu0 %v5053_v55  ;;  %v5068_v12 = vsel %vm1977_vm11, %v1418_v16, %v2009_v49  ;;  %v1999_v23 = vmul.f32 0.1, %v5044_v52  ;;  %v370_v16 = vpop.permute.xlu1 %369  ;;  %v5102_v3 = vmul.f32 1.442695, %v329_v58  ;;  %v351_v35 = vadd.f32 %v5011_v61, %v331_v53 }
 0x1a3   :  { %v2014_v51 = vmul.f32 0.1, %v1647_v4  ;;  %2170 = vmatpush1.msra.mxu0 %v5065_v7  ;;  %v5073_v14 = vpop.f32.mrf.mxu1  ;;  %2090 = vmatprep.subr.mxu1 %v5068_v12  ;;  %vm1982_vm14 = vcmp.ge.f32.partialorder %v1647_v4, 0.0  ;;  %vm1966_vm1 = vcmp.ge.f32.partialorder %v5030_v26, 0.0  ;;  %vm1967_vm2 = vcmp.ge.f32.partialorder %v5044_v52, 0.0 }
 0x1a4   :  { %v4533_v21 = vpop.eup %4532  ;;  %v1649_v22 = vpop.f32.mrf.mxu0  ;;  %4311 = vmatmul.mubr.msk.f32.vlgmr.msra.gmra.mxu0 %vm959_vm5, %v5058_v56  ;;  %2091 = vmatpush1.msra.mxu1 %v5077_v19  ;;  %v5110_v49 = vsub.f32 %v352_v60, %v370_v16  ;;  %vm1965_vm7 = vcmp.ge.f32.partialorder %v5073_v14, 0.0  ;;  %vm1964_vm8 = vcmp.ge.f32.partialorder %v5050_v54, 0.0 }
 0x1a5   :  { %vm1983_vm15 = vcmp.ge.f32.partialorder %v1649_v22, 0.0  ;;  %v2015_v24 = vmul.f32 0.1, %v1649_v22  ;;  %v1570_v1 = vpop.f32.mrf.mxu1  ;;  %2092 = vmatprep.subr.mxu1 %v5086_v15  ;;  %2209 = vmatprep.mubr.f32.mxu0 %v5867_v50  ;;  %v983_v8 = vmul.f32 %v4533_v21, %v4976_v62  ;;  %v5119_v61 = vsel %vm1982_vm14, %v1647_v4, %v2014_v51 }
 0x1a6   :  { %v4535_v36 = vpop.eup %4534  ;;  %v5107_v45 = vpop.f32.mrf.mxu0  ;;  %2093 = vmatpush1.msra.mxu1 %v5091_v37  ;;  %v5133_v4 = vsel %vm1967_vm2, %v5044_v52, %v1999_v23  ;;  %v5139_v51 = vsel %vm1966_vm1, %v5030_v26, %v1998_v46  ;;  %vm1980_vm6 = vcmp.ge.f32.partialorder %v1570_v1, 0.0  ;;  %v1996_v23 = vmul.f32 0.1, %v5050_v54 }
 0x1a7   :  { %v4537_v48 = vpop.eup %4536  ;;  %v1572_v21 = vpop.f32.mrf.mxu1  ;;  %4309 = vmatmul.mubr.msk.f32.vlgmr.msra.gmra.mxu1 %vm959_vm5, %v5058_v56  ;;  %v993_v58 = vsel %vm959_vm5, %v983_v8, 0.0  ;;  %v5116_v34 = vsel %vm1983_vm15, %v1649_v22, %v2015_v24  ;;  %v982_v60 = vmul.f32 %v4535_v36, %v4981_v10  ;;  %v2012_v8 = vmul.f32 0.1, %v1570_v1 }
 0x1a8   :  { %vm1981_vm4 = vcmp.ge.f32.partialorder %v1572_v21, 0.0  ;;  %v2013_v53 = vmul.f32 0.1, %v1572_v21  ;;  %994 = vadd.xlane.f32.xlu0 %v993_v58  ;;  %v5121_v38 = vpop.f32.mrf.mxu0  ;;  %4312 = vmatmul.mubr.msk.f32.gmra.mxu0 %vm959_vm5, %v5100_v13  ;;  %v981_v16 = vmul.f32 %v4537_v48, %v4976_v62  ;;  %v4539_v32 = vpop.eup %4538  ;;  %v958_v24 = vmul.f32 %v4531_v57, %v4976_v62 }
 0x1a9   :  { %2321 = vmatprep.subr.mxu0 %v5116_v34  ;;  %v5128_v22 = vpop.f32.mrf.mxu1  ;;  %2132 = vmatprep.mubr.f32.mxu1 %v5867_v50  ;;  %v1997_v36 = vmul.f32 0.1, %v5073_v14  ;;  %v990_v58 = vsel %vm959_vm5, %v982_v60, 0.0  ;;  %v333_v46 = vmul.f32 1.442695, %v5070_v43  ;;  %v5157_v60 = vsub.f32 %v351_v35, %v5041_v47  ;;  %v377_v6 = vpop.permute.xlu1 %376 }
 0x1aa   :  { %2322 = vmatpush1.msra.mxu0 %v5119_v61  ;;  %v1801_v48 = vpop.f32.mrf.mxu0  ;;  %2357 = vmatprep.mubr.f32.mxu0 %v5867_v50  ;;  %v5147_v52 = vsel %vm1981_vm4, %v1572_v21, %v2013_v53  ;;  %v987_v57 = vsel %vm959_vm5, %v981_v16, 0.0  ;;  %v5165_v16 = vsel %vm1980_vm6, %v1570_v1, %v2012_v8  ;;  %v969_v47 = vsel %vm959_vm5, %v958_v24, 0.0 }
 0x1ab   :  { %v2018_v26 = vmul.f32 0.1, %v1801_v48  ;;  %2323 = vmatprep.subr.mxu0 %v5133_v4  ;;  %991 = vadd.xlane.f32.xlu1 %v990_v58  ;;  %v5152_v62 = vpop.f32.mrf.mxu1  ;;  %vm1986_vm9 = vcmp.ge.f32.partialorder %v1801_v48, 0.0  ;;  %v957_v1 = vmul.f32 %v4539_v32, %v4981_v10  ;;  %v5181_v8 = vadd.f32 %v5015_v63, %v5102_v3 }
 0x1ac   :  { %2324 = vmatpush1.msra.mxu0 %v5139_v51  ;;  %4310 = vmatmul.mubr.msk.f32.gmra.mxu1 %vm959_vm5, %v5100_v13  ;;  %v1803_v21 = vpop.f32.mrf.mxu0  ;;  %v5187_v24 = vsel %vm1964_vm8, %v5050_v54, %v1996_v23  ;;  %v608_v50 = vsel %vm247_vm0, %v4870_v39, 0.0  ;;  %v2003_v32 = vmul.f32 0.1, %v5121_v38  ;;  %v5885_v3 = vmov 0.0  }
 0x1ad   :  { %2244 = vmatprep.subr.mxu1 %v5147_v52  ;;  %988 = vadd.xlane.f32.xlu0 %v987_v57  ;;  %vm1987_vm10 = vcmp.ge.f32.partialorder %v1803_v21, 0.0  ;;  %v2019_v53 = vmul.f32 0.1, %v1803_v21  ;;  %v1724_v43 = vpop.f32.mrf.mxu1  ;;  %v5176_v57 = vsel %vm1965_vm7, %v5073_v14, %v1997_v36  ;;  %v2050_v14 = vsel %vm1986_vm9, %v1801_v48, %v2018_v26  ;;  %v4541_v36 = vpop.eup %4540 }
 0x1ae   :  { %4315 = vmatmul.mubr.msk.f32.vlgmr.msra.gmra.mxu0 %vm959_vm5, %v5058_v56  ;;  %2245 = vmatpush1.msra.mxu1 %v5165_v16  ;;  %vm1984_vm11 = vcmp.ge.f32.partialorder %v1724_v43, 0.0  ;;  %v2016_v35 = vmul.f32 0.1, %v1724_v43  ;;  %v5171_v58 = vpop.f32.mrf.mxu0  ;;  %v353_v23 = vadd.f32 %v5015_v63, %v333_v46  ;;  %v2002_v39 = vmul.f32 0.1, %v5107_v45 }
 0x1af   :  { %2246 = vmatprep.subr.mxu1 %v5176_v57  ;;  %970 = vadd.xlane.f32.xlu1 %v969_v47  ;;  %v1726_v31 = vpop.f32.mrf.mxu1  ;;  %v5198_v54 = vsel %vm1987_vm10, %v1803_v21, %v2019_v53  ;;  %vm1971_vm13 = vcmp.ge.f32.partialorder %v5121_v38, 0.0  ;;  %vm1970_vm14 = vcmp.ge.f32.partialorder %v5107_v45, 0.0  ;;  %v3107_v63 = vsub.f32 %v2050_v14, %v5033_v27 }
 0x1b0   :  { %2247 = vmatpush1.msra.mxu1 %v5187_v24  ;;  %2280 = vmatprep.mubr.f32.mxu1 %v5885_v3  ;;  %vm1985_vm12 = vcmp.ge.f32.partialorder %v1726_v31, 0.0  ;;  %v2017_v47 = vmul.f32 0.1, %v1726_v31  ;;  %v5195_v44 = vpop.f32.mrf.mxu0  ;;  %v2048_v26 = vsel %vm1984_vm11, %v1724_v43, %v2016_v35  ;;  %v966_v21 = vsel %vm959_vm5, %v957_v1, 0.0 }
 0x1b1   :  { %2363 = vmatprep.mubr.f32.mxu0 %v5885_v3  ;;  %4313 = vmatmul.mubr.msk.f32.vlgmr.msra.gmra.mxu1 %vm959_vm5, %v5058_v56  ;;  %v5206_v48 = vpop.f32.mrf.mxu1  ;;  %v2001_v59 = vmul.f32 0.1, %v5152_v62  ;;  %v3105_v35 = vsub.f32 %v2048_v26, %v5077_v19  ;;  %v980_v42 = vmul.f32 %v4541_v36, %v4981_v10  ;;  %vm1968_vm15 = vcmp.ge.f32.partialorder %v5128_v22, 0.0 }
 0x1b2   :  { %609 = vadd.xlane.f32.xlu0 %v608_v50  ;;  %4316 = vmatmul.mubr.msk.f32.gmra.mxu0 %vm959_vm5, %v5100_v13  ;;  %v5213_v46 = vpop.f32.mrf.mxu0  ;;  %v2049_v53 = vsel %vm1985_vm12, %v1726_v31, %v2017_v47  ;;  %vm1969_vm1 = vcmp.ge.f32.partialorder %v5152_v62, 0.0  ;;  %v5229_v31 = vsel %vm1971_vm13, %v5121_v38, %v2003_v32  ;;  %v5238_v19 = vsel %vm1970_vm14, %v5107_v45, %v2002_v39 }
 0x1b3   :  { %2475 = vmatprep.subr.mxu0 %v5198_v54  ;;  %967 = vadd.xlane.f32.xlu1 %v966_v21  ;;  %v5219_v43 = vpop.f32.mrf.mxu1  ;;  %v3106_v50 = vsub.f32 %v2049_v53, %v5068_v12  ;;  %v2000_v12 = vmul.f32 0.1, %v5128_v22  ;;  %v3108_v32 = vsub.f32 %v5198_v54, %v5036_v17  ;;  %v3123_v47 = vand.u32 2147483647, %v3107_v63 }
 0x1b4   :  { %2476 = vmatpush1.msra.mxu0 %v2050_v14  ;;  %2286 = vmatprep.mubr.f32.mxu1 %v5885_v3  ;;  %v1957_v27 = vpop.f32.mrf.mxu0  ;;  %v3121_v21 = vand.u32 2147483647, %v3105_v35  ;;  %v2007_v1 = vmul.f32 0.1, %v5195_v44  ;;  %vm1990_vm4 = vcmp.ge.f32.partialorder %v5213_v46, 0.0  ;;  %v5253_v17 = vsel %vm1969_vm1, %v5152_v62, %v2001_v59 }
 0x1b5   :  { %2477 = vmatprep.subr.mxu0 %v5229_v31  ;;  %2511 = vmatprep.mubr.f32.mxu0 %v5885_v3  ;;  %v2023_v14 = vmul.f32 0.1, %v1957_v27  ;;  %v3122_v36 = vand.u32 2147483647, %v3106_v50  ;;  %v1878_v38 = vpop.f32.mrf.mxu1  ;;  %vm1991_vm2 = vcmp.ge.f32.partialorder %v1957_v27, 0.0  ;;  %v984_v45 = vsel %vm959_vm5, %v980_v42, 0.0 }
 0x1b6   :  { %2478 = vmatpush1.msra.mxu0 %v5238_v19  ;;  %4314 = vmatmul.mubr.msk.f32.gmra.mxu1 %vm959_vm5, %v5100_v13  ;;  %v2022_v39 = vmul.f32 0.1, %v5213_v46  ;;  %v2020_v50 = vmul.f32 0.1, %v1878_v38  ;;  %vm1988_vm6 = vcmp.ge.f32.partialorder %v1878_v38, 0.0  ;;  %v5265_v42 = vsub.f32 %v353_v23, %v377_v6 }
 0x1b7   :  { %2398 = vmatprep.subr.mxu1 %v2049_v53  ;;  %4319 = vmatmul.mubr.msk.f32.vlgmr.msra.gmra.mxu0 %vm959_vm5, %v5058_v56  ;;  %v1880_v54 = vpop.f32.mrf.mxu1  ;;  %v3138_v63 = vadd.f32 %v3122_v36, %v3121_v21  ;;  %v5261_v53 = vsel %vm1968_vm15, %v5128_v22, %v2000_v12  ;;  %v2055_v59 = vsel %vm1991_vm2, %v1957_v27, %v2023_v14  ;;  %v2006_v62 = vmul.f32 0.1, %v5171_v58 }
 0x1b8   :  { %2399 = vmatpush1.msra.mxu1 %v2048_v26  ;;  %985 = vadd.xlane.f32.xlu1 %v984_v45  ;;  %v2021_v35 = vmul.f32 0.1, %v1880_v54  ;;  %vm1989_vm7 = vcmp.ge.f32.partialorder %v1880_v54, 0.0  ;;  %vm1975_vm8 = vcmp.ge.f32.partialorder %v5195_v44, 0.0  ;;  %vm1974_vm9 = vcmp.ge.f32.partialorder %v5171_v58, 0.0 }
 0x1b9   :  { %2400 = vmatprep.subr.mxu1 %v5253_v17  ;;  %2434 = vmatprep.mubr.f32.mxu1 %v5885_v3  ;;  %v3139_v26 = vadd.f32 %v3138_v63, %v3123_v47  ;;  %v399_v6 = vmul.f32 0.5, %v5110_v49  ;;  %v5886_v22 = vand.u32 2147483647, %v5110_v49  ;;  %v390_v27 = vand.u32 2147483647, %v5157_v60  ;;  %v381_v63 = vpop.permute.xlu1 %380 }
 0x1ba   :  { %2401 = vmatpush1.msra.mxu1 %v5261_v53  ;;  %2517 = vmatprep.mubr.f32.mxu0 %v5885_v3  ;;  %v3124_v12 = vand.u32 2147483647, %v3108_v32  ;;  %v2054_v14 = vsel %vm1990_vm4, %v5213_v46, %v2022_v39  ;;  %v2053_v36 = vsel %vm1989_vm7, %v1880_v54, %v2021_v35  ;;  %v2052_v47 = vsel %vm1988_vm6, %v1878_v38, %v2020_v50 }
 0x1bb   :  { %4317 = vmatmul.mubr.msk.f32.vlgmr.msra.gmra.mxu1 %vm959_vm5, %v5058_v56  ;;  %4320 = vmatmul.mubr.msk.f32.gmra.mxu0 %vm959_vm5, %v5100_v13  ;;  %v4258_v23 = vadd.f32 -0.125, %v5886_v22  ;;  %v2005_v21 = vmul.f32 0.1, %v5219_v43  ;;  %v5290_v45 = vsel %vm1975_vm8, %v5195_v44, %v2007_v1  ;;  %v3110_v32 = vsub.f32 %v2053_v36, %v5147_v52 }
 0x1bc   :  { %2629 = vmatprep.subr.mxu0 %v2055_v59  ;;  %606 = vadd.xlane.f32.xlu1 %v5021_v11  ;;  %v3109_v46 = vsub.f32 %v2052_v47, %v5165_v16  ;;  %vm1972_vm10 = vcmp.ge.f32.partialorder %v5206_v48, 0.0  ;;  %v2004_v11 = vmul.f32 0.1, %v5206_v48  ;;  %vm1973_vm11 = vcmp.ge.f32.partialorder %v5219_v43, 0.0 }
 0x1bd   :  { %2630 = vmatpush1.msra.mxu0 %v2054_v14  ;;  %2440 = vmatprep.mubr.f32.mxu1 %v5885_v3  ;;  %v5302_v38 = vsel %vm1974_vm9, %v5171_v58, %v2006_v62  ;;  %v3111_v44 = vsub.f32 %v2054_v14, %v5119_v61  ;;  %v3126_v52 = vand.u32 2147483647, %v3110_v32  ;;  %v3140_v1 = vadd.f32 %v3139_v26, %v3124_v12 }
 0x1be   :  { %2631 = vmatprep.subr.mxu0 %v5290_v45  ;;  %2665 = vmatprep.mubr.f32.mxu0 %v5885_v3  ;;  %v3125_v16 = vand.u32 2147483647, %v3109_v46  ;;  %v403_v54 = vmul.f32 %v399_v6, %v5110_v49  ;;  %v398_v58 = vmul.f32 0.5, %v5157_v60  ;;  %v4257_v39 = vadd.f32 -0.125, %v390_v27 }
 0x1bf   :  { %2632 = vmatpush1.msra.mxu0 %v5302_v38  ;;  %4318 = vmatmul.mubr.msk.f32.gmra.mxu1 %vm959_vm5, %v5100_v13  ;;  %v5315_v61 = vmul.f32 %v4997_v41, %v4981_v10  ;;  %v3112_v50 = vsub.f32 %v2055_v59, %v5116_v34  ;;  %v2037_v35 = vsel %vm1973_vm11, %v5219_v43, %v2005_v21  ;;  %v411_v62 = vmul.f32 0.25, %v4258_v23 }
 0x1c0   :  { %2552 = vmatprep.subr.mxu1 %v2053_v36  ;;  %4323 = vmatmul.mubr.msk.f32.vlgmr.msra.gmra.mxu0 %vm959_vm5, %v5058_v56  ;;  %v3141_v26 = vadd.f32 %v3140_v1, %v3125_v16  ;;  %v389_v6 = vsub.f32 %v5181_v8, %v381_v63  ;;  %v2036_v10 = vsel %vm1972_vm10, %v5206_v48, %v2004_v11  ;;  %v392_v43 = vand.u32 2147483647, %v5265_v42 }
 0x1c1   :  { %2553 = vmatpush1.msra.mxu1 %v2052_v47  ;;  %2588 = vmatprep.mubr.f32.mxu1 %v5885_v3  ;;  %v5887_v34 = vmov %v5886_v22  ;;  %v3127_v59 = vand.u32 2147483647, %v3111_v44  ;;  %v402_v8 = vmul.f32 %v398_v58, %v5157_v60  ;;  %v3128_v48 = vand.u32 2147483647, %v3112_v50 }
 0x1c2   :  { %2554 = vmatprep.subr.mxu1 %v2037_v35  ;;  %2671 = vmatprep.mubr.f32.mxu0 %v5885_v3  ;;  %vm5329_vm12 = vcmp.le.f32.partialorder %v5887_v34, 0.25  ;;  %v3142_v22 = vadd.f32 %v3141_v26, %v3126_v52  ;;  %v410_v23 = vmul.f32 0.25, %v4257_v39  ;;  %vm5343_vm13 = vcmp.le.f32.partialorder %v390_v27, 0.25 }
 0x1c3   :  { %2555 = vmatpush1.msra.mxu1 %v2036_v10  ;;  %v415_v49 = vsel %vm5329_vm12, %v403_v54, %v411_v62  ;;  %v4259_v36 = vadd.f32 -0.125, %v392_v43  ;;  %v393_v47 = vand.u32 2147483647, %v389_v6  ;;  %v3098_v60 = vsub.f32 %v5253_v17, %v5086_v15 }
 0x1c4   :  { %4321 = vmatmul.mubr.msk.f32.vlgmr.msra.gmra.mxu1 %vm959_vm5, %v5058_v56  ;;  %4324 = vmatmul.mubr.msk.f32.gmra.mxu0 %vm959_vm5, %v5100_v13  ;;  %v3143_v12 = vadd.f32 %v3142_v22, %v3127_v59  ;;  %v400_v56 = vmul.f32 0.5, %v5265_v42  ;;  %v414_v32 = vsel %vm5343_vm13, %v402_v8, %v410_v23  ;;  %v401_v11 = vmul.f32 0.5, %v389_v6 }
 0x1c5   :  { %2594 = vmatprep.mubr.f32.mxu1 %v5885_v3  ;;  %2983 = vmatprep.mubr.f32.mxu0 %v5885_v3  ;;  %v412_v46 = vmul.f32 0.25, %v4259_v36  ;;  %v4260_v44 = vadd.f32 -0.125, %v393_v47  ;;  %v3097_v52 = vsub.f32 %v5261_v53, %v5091_v37  ;;  %vm396_vm14 = vcmp.le.f32.partialorder %v392_v43, 0.25 }
 0x1c6   :  { %v3144_v21 = vadd.f32 %v3143_v12, %v3128_v48  ;;  %v404_v27 = vmul.f32 %v400_v56, %v5265_v42  ;;  %v3114_v16 = vand.u32 2147483647, %v3098_v60  ;;  %v405_v1 = vmul.f32 %v401_v11, %v389_v6 }
 0x1c7   :  { %v413_v54 = vmul.f32 0.25, %v4260_v44  ;;  %v3099_v15 = vsub.f32 %v5238_v19, %v5065_v7  ;;  %v3113_v17 = vand.u32 2147483647, %v3097_v52  ;;  %vm397_vm15 = vcmp.le.f32.partialorder %v393_v47, 0.25 }
 0x1c8   :  { %4322 = vmatmul.mubr.msk.f32.gmra.mxu1 %vm959_vm5, %v5100_v13  ;;  %426 = vperm.xlu0 %4446, %v415_v49   ;;  %v416_v13 = vsel %vm396_vm14, %v404_v27, %v412_v46  ;;  %v3100_v39 = vsub.f32 %v5229_v31, %v5053_v55  ;;  %v3101_v37 = vsub.f32 %v2036_v10, %v5187_v24  ;;  %vm445_vm1 = vcmask 130112  }
 0x1c9   :  { %2841 = vmatprep.mubr.f32.mxu1 %v5885_v3  ;;  %v3129_v58 = vadd.f32 %v3114_v16, %v3113_v17  ;;  %v417_v42 = vsel %vm397_vm15, %v405_v1, %v413_v54  ;;  %v3115_v63 = vand.u32 2147483647, %v3099_v15  ;;  %v3102_v62 = vsub.f32 %v2037_v35, %v5176_v57 }
 0x1ca   :  { %v3116_v53 = vand.u32 2147483647, %v3100_v39  ;;  %v3117_v26 = vand.u32 2147483647, %v3101_v37  ;;  %v3103_v19 = vsub.f32 %v5302_v38, %v5139_v51  ;;  %v5892_v43 = vsub.f32 %v4955_v28, %v4957_v29  ;;  %v601_v28 = vpop.xlane.xlu1 %600  ;;  %v604_v29 = vpop.xlane.xlu0 %603 }
 0x1cb   :  { %v3130_v50 = vadd.f32 %v3129_v58, %v3115_v63  ;;  %v3118_v34 = vand.u32 2147483647, %v3102_v62  ;;  %v3104_v31 = vsub.f32 %v5290_v45, %v5133_v4  ;;  %v5893_v22 = vsub.f32 %v4959_v0, %v4961_v30 }
 0x1cc   :  { %v244_v55 = vand.u32 2147483647, %v5892_v43  ;;  %v3119_v24 = vand.u32 2147483647, %v3103_v19  ;;  %v5894_v0 = vlaneseq  ;;  %v5389_v16 = vmul.f32 10.0, %v604_v29 }
 0x1cd   :  { %423 = vperm.xlu1 %4447, %v414_v32   ;;  %v3131_v6 = vadd.f32 %v3130_v50, %v3116_v53  ;;  %v3120_v57 = vand.u32 2147483647, %v3104_v31  ;;  %v243_v51 = vand.u32 2147483647, %v5893_v22  ;;  %v5380_v32 = vmul.f32 10.0, %v601_v28 }
 0x1ce   :  { %v251_v59 = vsel %vm247_vm0, %v244_v55, 0.0  ;;  %v5377_v30 = vand.u32 127, %v5894_v0  ;;  %5897 = vst [vmem:[#allocation9_spill] sm:$0xff] %v5389_v16  ;;  %vm456_vm2 = vcmask 1041409   ;;  %vm5874_vm4 = vcmask 123904  }
 0x1cf   :  { %v3132_v7 = vadd.f32 %v3131_v6, %v3117_v26  ;;  %v248_v38 = vsel %vm247_vm0, %v243_v51, 0.0  ;;  %5896 = vst [vmem:[#allocation8_spill] sm:$0xff] %v5380_v32 }
 0x1d0   :  { %5895 = vst [vmem:[#allocation7_spill] sm:$0xff] %v5377_v30  ;;  %v440_v36 = vadd.s32 4294967288, %v5377_v30  ;;  %v5384_v11 = vsub.s32 %v5377_v30, %v4753_v40 }
 0x1d1   :  { %429 = vperm.xlu1 %4447, %v416_v13   ;;  %v3133_v41 = vadd.f32 %v3132_v7, %v3118_v34 }
 0x1d2   :  { %v5387_v44 = vsub.s32 %v440_v36, %v4753_v40 }
 0x1d3   :  { %v3134_v10 = vadd.f32 %v3133_v41, %v3119_v24 }
 0x1d5   :  { %432 = vperm.xlu1 %4447, %v417_v42   ;;  %v3135_v35 = vadd.f32 %v3134_v10, %v3120_v57 }
 0x1e7   :  { %252 = vadd.xlane.f32.xlu0 %v251_v59 }
 0x1eb   :  { %3136 = vadd.xlane.f32.xlu0 %v3135_v35 }
 0x1f9   :  { %249 = vadd.xlane.f32.xlu1 %v248_v38 }
 0x1fd   :  { %3145 = vadd.xlane.f32.xlu1 %v3144_v21 }
 0x224   :  { %v965_v4 = vpop.xlane.xlu0 %964 }
 0x226   :  { %v962_v8 = vpop.xlane.xlu1 %961 }
 0x227   :  { %4542 = vrcp.f32 %v962_v8 }
 0x228   :  { %4544 = vrcp.f32 %v965_v4 }
 0x231   :  { %v995_v48 = vpop.xlane.xlu0 %994 }
 0x234   :  { %v992_v45 = vpop.xlane.xlu1 %991  ;;  %v4543_v47 = vpop.eup %4542 }
 0x235   :  { %v4545_v60 = vpop.eup %4544  ;;  %v997_v13 = vmul.f32 %v4543_v47, %v5380_v32 }
 0x236   :  { %v989_v23 = vpop.xlane.xlu0 %988  ;;  %v999_v42 = vmul.f32 %v4545_v60, %v5389_v16  ;;  %v5431_v60 = vld [vmem:[%s5856_s13] sm:$0xff] }
 0x237   :  { %v1011_v37 = vrot.slane %v997_v13, %v5384_v11 }
 0x238   :  { %v971_v49 = vpop.xlane.xlu1 %970  ;;  %v1015_v6 = vrot.slane %v999_v42, %v5387_v44 }
 0x239   :  { %4546 = vrcp.f32 %v971_v49 }
 0x23a   :  { %4548 = vrcp.f32 %v995_v48  ;;  %v1016_v41 = vsel %vm445_vm1, %v1015_v6, %v1011_v37 }
 0x23b   :  { %4550 = vrcp.f32 %v992_v45  ;;  %v610_v14 = vpop.xlane.xlu0 %609 }
 0x23c   :  { %v968_v12 = vpop.xlane.xlu1 %967  ;;  %v614_v21 = vmul.f32 10.0, %v610_v14 }
 0x23d   :  { %4552 = vrcp.f32 %v968_v12 }
 0x23e   :  { %4554 = vrcp.f32 %v989_v23  ;;  %v1101_v54 = vrot.slane %v614_v21, %v5387_v44 }
 0x241   :  { %v986_v56 = vpop.xlane.xlu1 %985 }
 0x242   :  { %4556 = vrcp.f32 %v986_v56 }
 0x245   :  { %v607_v27 = vpop.xlane.xlu1 %606 }
 0x246   :  { %v4547_v46 = vpop.eup %4546  ;;  %v613_v52 = vmul.f32 10.0, %v607_v27  ;;  %v5436_v27 = vld [vmem:[%s5856_s13 + $0x8] sm:$0xff] }
 0x247   :  { %v4549_v1 = vpop.eup %4548  ;;  %v1003_v58 = vmul.f32 %v4547_v46, %v614_v21 }
 0x248   :  { %v1097_v15 = vrot.slane %v613_v52, %v5384_v11  ;;  %v4551_v17 = vpop.eup %4550  ;;  %v1038_v34 = vmul.f32 %v4549_v1, %v614_v21 }
 0x249   :  { %v1036_v53 = vmul.f32 %v4551_v17, %v613_v52  ;;  %v1024_v62 = vrot.slane %v1003_v58, %v5387_v44  ;;  %v5420_v56 = vpop.permute.xlu1 %423 }
 0x24a   :  { %v4553_v39 = vpop.eup %4552  ;;  %v5396_v63 = vsel %vm445_vm1, %v1101_v54, %v1097_v15  ;;  %v1059_v59 = vrot.slane %v1038_v34, %v5387_v44 }
 0x24b   :  { %5898 = vst [vmem:[#allocation10_spill] sm:$0xff] %v5396_v63  ;;  %v4555_v40 = vpop.eup %4554  ;;  %v1001_v50 = vmul.f32 %v4553_v39, %v613_v52  ;;  %v1055_v55 = vrot.slane %v1036_v53, %v5384_v11 }
 0x24c   :  { %v1034_v7 = vmul.f32 %v4555_v40, %v5389_v16 }
 0x24d   :  { %v1020_v26 = vrot.slane %v1001_v50, %v5384_v11  ;;  %v1060_v51 = vsel %vm445_vm1, %v1059_v59, %v1055_v55  ;;  %v5442_v39 = vpop.permute.xlu1 %429 }
 0x24e   :  { %v1050_v35 = vrot.slane %v1034_v7, %v5387_v44 }
 0x24f   :  { %v4557_v19 = vpop.eup %4556  ;;  %v1025_v43 = vsel %vm445_vm1, %v1024_v62, %v1020_v26 }
 0x250   :  { %v1026_v31 = vsel %vm456_vm2, %v1025_v43, %v1016_v41  ;;  %v1032_v24 = vmul.f32 %v4557_v19, %v5380_v32  ;;  %v5463_v43 = vpop.permute.xlu0 %426 }
 0x251   :  { %v1028_v10 = vsel %vm5874_vm4, %v1026_v31, 0.0 }
 0x252   :  { %1029 = vadd.xlane.f32.xlu1 %v1028_v10  ;;  %v1046_v57 = vrot.slane %v1032_v24, %v5384_v11 }
 0x254   :  { %v1051_v22 = vsel %vm445_vm1, %v1050_v35, %v1046_v57 }
 0x255   :  { %v1061_v38 = vsel %vm456_vm2, %v1060_v51, %v1051_v22 }
 0x256   :  { %v1063_v28 = vsel %vm5874_vm4, %v1061_v38, 0.0  ;;  %vm3232_vm4 = vcmask 31744  }
 0x257   :  { %1064 = vadd.xlane.f32.xlu0 %v1063_v28 }
 0x264   :  { %v2205_v29 = vpop.f32.mrf.mxu0 }
 0x265   :  { %vm2680_vm6 = vcmp.ge.f32.partialorder %v2205_v29, 0.0  ;;  %v2712_v46 = vmul.f32 0.1, %v2205_v29 }
 0x266   :  { %v2207_v8 = vpop.f32.mrf.mxu0 }
 0x267   :  { %v2128_v4 = vpop.f32.mrf.mxu1  ;;  %vm2681_vm7 = vcmp.ge.f32.partialorder %v2207_v8, 0.0  ;;  %v2713_v52 = vmul.f32 0.1, %v2207_v8  ;;  %v5445_v37 = vsel %vm2680_vm6, %v2205_v29, %v2712_v46  ;;  %v5482_v29 = vpop.permute.xlu1 %432 }
 0x268   :  { %v2211_v45 = vpop.f32.mrf.mxu0  ;;  %vm2678_vm8 = vcmp.ge.f32.partialorder %v2128_v4, 0.0  ;;  %v2710_v1 = vmul.f32 0.1, %v2128_v4 }
 0x269   :  { %v2130_v48 = vpop.f32.mrf.mxu1  ;;  %v2728_v54 = vmul.f32 0.1, %v2211_v45  ;;  %vm2696_vm9 = vcmp.ge.f32.partialorder %v2211_v45, 0.0  ;;  %v5454_v6 = vsel %vm2681_vm7, %v2207_v8, %v2713_v52 }
 0x26a   :  { %v2213_v49 = vpop.f32.mrf.mxu0  ;;  %v2711_v15 = vmul.f32 0.1, %v2130_v48  ;;  %vm2679_vm10 = vcmp.ge.f32.partialorder %v2130_v48, 0.0  ;;  %v5457_v34 = vsel %vm2678_vm8, %v2128_v4, %v2710_v1 }
 0x26b   :  { %v2729_v17 = vmul.f32 0.1, %v2213_v49  ;;  %vm2697_vm11 = vcmp.ge.f32.partialorder %v2213_v49, 0.0  ;;  %v5460_v7 = vsel %vm2696_vm9, %v2211_v45, %v2728_v54 }
 0x26c   :  { %v2134_v23 = vpop.f32.mrf.mxu1  ;;  %v2743_v19 = vsel %vm2679_vm10, %v2130_v48, %v2711_v15 }
 0x26d   :  { %v2726_v58 = vmul.f32 0.1, %v2134_v23  ;;  %vm2694_vm12 = vcmp.ge.f32.partialorder %v2134_v23, 0.0  ;;  %v5465_v55 = vsel %vm2697_vm11, %v2213_v49, %v2729_v17 }
 0x26e   :  { %v5416_v12 = vpop.f32.mrf.mxu0  ;;  %v2136_v0 = vpop.f32.mrf.mxu1 }
 0x26f   :  { %v2727_v40 = vmul.f32 0.1, %v2136_v0  ;;  %vm2695_vm13 = vcmp.ge.f32.partialorder %v2136_v0, 0.0  ;;  %v5467_v31 = vsel %vm2694_vm12, %v2134_v23, %v2726_v58  ;;  %v5470_v24 = vmul.f32 0.1, %v5416_v12 }
 0x270   :  { %v5418_v14 = vpop.f32.mrf.mxu0 }
 0x271   :  { %v5422_v36 = vpop.f32.mrf.mxu1  ;;  %v5472_v59 = vsel %vm2695_vm13, %v2136_v0, %v2727_v40  ;;  %v253_v40 = vpop.xlane.xlu0 %252 }
 0x272   :  { %v5424_v47 = vpop.f32.mrf.mxu0  ;;  %v5475_v57 = vmul.f32 0.1, %v5422_v36 }
 0x273   :  { %v5426_v21 = vpop.f32.mrf.mxu1  ;;  %v5478_v35 = vmul.f32 0.1, %v5424_v47 }
 0x274   :  { %v5438_v13 = vpop.f32.mrf.mxu0  ;;  %vm2683_vm15 = vcmp.ge.f32.partialorder %v5426_v21, 0.0  ;;  %v2715_v38 = vmul.f32 0.1, %v5426_v21 }
 0x276   :  { %v5440_v42 = vpop.f32.mrf.mxu1 }
 0x277   :  { %v2513_v50 = vpop.f32.mrf.mxu0  ;;  %vm2698_vm7 = vcmp.ge.f32.partialorder %v5440_v42, 0.0  ;;  %v2730_v8 = vmul.f32 0.1, %v5440_v42 }
 0x278   :  { %v5447_v53 = vpop.f32.mrf.mxu1  ;;  %v2720_v10 = vmul.f32 0.1, %v2513_v50  ;;  %vm2688_vm14 = vcmp.ge.f32.partialorder %v2513_v50, 0.0 }
 0x279   :  { %v2515_v41 = vpop.f32.mrf.mxu0  ;;  %vm2699_vm8 = vcmp.ge.f32.partialorder %v5447_v53, 0.0  ;;  %v2731_v4 = vmul.f32 0.1, %v5447_v53 }
 0x27a   :  { %v2721_v49 = vmul.f32 0.1, %v2515_v41  ;;  %v5489_v0 = vsel %vm2688_vm14, %v2513_v50, %v2720_v10  ;;  %vm2689_vm10 = vcmp.ge.f32.partialorder %v2515_v41, 0.0 }
 0x27b   :  { %v2436_v22 = vpop.f32.mrf.mxu1  ;;  %v2519_v51 = vpop.f32.mrf.mxu0  ;;  %v3158_v50 = vsub.f32 %v5489_v0, %v5445_v37 }
 0x27c   :  { %vm2686_vm6 = vcmp.ge.f32.partialorder %v2436_v22, 0.0  ;;  %v2718_v28 = vmul.f32 0.1, %v2436_v22  ;;  %vm2704_vm11 = vcmp.ge.f32.partialorder %v2519_v51, 0.0  ;;  %v2736_v46 = vmul.f32 0.1, %v2519_v51 }
 0x27d   :  { %v2438_v45 = vpop.f32.mrf.mxu1  ;;  %v2521_v48 = vpop.f32.mrf.mxu0  ;;  %v5500_v16 = vsel %vm2689_vm10, %v2515_v41, %v2721_v49  ;;  %vm3239_vm10 = vcmask 1043456  }
 0x27e   :  { %vm2687_vm9 = vcmp.ge.f32.partialorder %v2438_v45, 0.0  ;;  %v2719_v23 = vmul.f32 0.1, %v2438_v45  ;;  %v2750_v1 = vsel %vm2686_vm6, %v2436_v22, %v2718_v28  ;;  %v2737_v54 = vmul.f32 0.1, %v2521_v48 }
 0x27f   :  { %v2442_v52 = vpop.f32.mrf.mxu1  ;;  %vm2705_vm13 = vcmp.ge.f32.partialorder %v2521_v48, 0.0  ;;  %v3156_v30 = vsub.f32 %v2750_v1, %v5457_v34  ;;  %v5510_v34 = vsel %vm2698_vm7, %v5440_v42, %v2730_v8 }
 0x280   :  { %vm2702_vm12 = vcmp.ge.f32.partialorder %v2442_v52, 0.0  ;;  %v2734_v15 = vmul.f32 0.1, %v2442_v52  ;;  %v5492_v17 = vpop.f32.mrf.mxu0  ;;  %v2751_v58 = vsel %vm2687_vm9, %v2438_v45, %v2719_v23  ;;  %v5505_v45 = vsel %vm2683_vm15, %v5426_v21, %v2715_v38 }
 0x281   :  { %v2444_v26 = vpop.f32.mrf.mxu1  ;;  %v3157_v62 = vsub.f32 %v2751_v58, %v2743_v19  ;;  %v2768_v19 = vsel %vm2704_vm11, %v2519_v51, %v2736_v46  ;;  %v2769_v32 = vsel %vm2705_vm13, %v2521_v48, %v2737_v54  ;;  %vm2682_vm15 = vcmp.ge.f32.partialorder %v5422_v36, 0.0 }
 0x282   :  { %vm2703_vm14 = vcmp.ge.f32.partialorder %v2444_v26, 0.0  ;;  %v2735_v10 = vmul.f32 0.1, %v2444_v26  ;;  %v5497_v63 = vpop.f32.mrf.mxu0  ;;  %v250_v22 = vpop.xlane.xlu1 %249  ;;  %v2766_v28 = vsel %vm2702_vm12, %v2442_v52, %v2734_v15  ;;  %v5523_v21 = vsel %vm2699_vm8, %v5447_v53, %v2731_v4  ;;  %v5534_v53 = vld [vmem:[%s5857_s12] sm:$0x1] }
 0x283   :  { %v5512_v37 = vadd.f32 %v253_v40, %v250_v22  ;;  %v3164_v41 = vsub.f32 %v2766_v28, %v5467_v31  ;;  %v3173_v49 = vand.u32 2147483647, %v3157_v62  ;;  %v3172_v42 = vand.u32 2147483647, %v3156_v30 }
 0x284   :  { %v5515_v23 = vpop.f32.mrf.mxu1  ;;  %v2673_v52 = vpop.f32.mrf.mxu0  ;;  %v2767_v15 = vsel %vm2703_vm14, %v2444_v26, %v2735_v10  ;;  %v3159_v51 = vsub.f32 %v5500_v16, %v5454_v6  ;;  %v3174_v38 = vand.u32 2147483647, %v3158_v50  ;;  %vm2692_vm6 = vcmp.ge.f32.partialorder %v5492_v17, 0.0 }
 0x285   :  { %2805 = vmatprep.subr.mxu1 %v2767_v15  ;;  %vm2693_vm7 = vcmp.ge.f32.partialorder %v5497_v63, 0.0  ;;  %v2725_v62 = vmul.f32 0.1, %v5497_v63  ;;  %v3165_v8 = vsub.f32 %v2767_v15, %v5472_v59  ;;  %v3166_v30 = vsub.f32 %v2768_v19, %v5460_v7 }
 0x286   :  { %v2592_v26 = vpop.f32.mrf.mxu1  ;;  %v2675_v31 = vpop.f32.mrf.mxu0  ;;  %2806 = vmatpush1.msra.mxu1 %v2766_v28  ;;  %vm2684_vm8 = vcmp.ge.f32.partialorder %v5416_v12, 0.0  ;;  %vm2690_vm9 = vcmp.ge.f32.partialorder %v5515_v23, 0.0  ;;  %v2722_v6 = vmul.f32 0.1, %v5515_v23  ;;  %v2740_v4 = vmul.f32 0.1, %v2673_v52 }
 0x287   :  { %2807 = vmatprep.subr.mxu1 %v2751_v58  ;;  %v3167_v48 = vsub.f32 %v2769_v32, %v5465_v55  ;;  %v2741_v46 = vmul.f32 0.1, %v2675_v31  ;;  %v3181_v59 = vand.u32 2147483647, %v3165_v8  ;;  %v3180_v54 = vand.u32 2147483647, %v3164_v41 }
 0x288   :  { %v2596_v40 = vpop.f32.mrf.mxu1  ;;  %2808 = vmatpush1.msra.mxu1 %v2750_v1  ;;  %v3188_v50 = vadd.f32 %v3173_v49, %v3172_v42  ;;  %v2723_v10 = vmul.f32 0.1, %v2592_v26  ;;  %vm2709_vm11 = vcmp.ge.f32.partialorder %v2675_v31, 0.0  ;;  %vm2708_vm13 = vcmp.ge.f32.partialorder %v2673_v52, 0.0 }
 0x289   :  { %vm2706_vm12 = vcmp.ge.f32.partialorder %v2596_v40, 0.0  ;;  %v2738_v7 = vmul.f32 0.1, %v2596_v40  ;;  %4325 = vmatmul.mubr.msk.f32.vlgmr.msra.gmra.mxu1 %vm959_vm5, %v5534_v53  ;;  %2876 = vmatprep.subr.mxu1 %v2769_v32  ;;  %vm2691_vm14 = vcmp.ge.f32.partialorder %v2592_v26, 0.0  ;;  %v3197_v58 = vadd.f32 %v3181_v59, %v3180_v54 }
 0x28a   :  { %v2598_v22 = vpop.f32.mrf.mxu1  ;;  %2877 = vmatpush1.msra.mxu1 %v2768_v19  ;;  %v3182_v55 = vand.u32 2147483647, %v3166_v30  ;;  %2912 = vmatprep.mubr.f32.mxu1 %v5885_v3  ;;  %v3183_v28 = vand.u32 2147483647, %v3167_v48  ;;  %v3189_v49 = vadd.f32 %v3188_v50, %v3174_v38  ;;  %v5547_v32 = vsel %vm2709_vm11, %v2675_v31, %v2741_v46 }
 0x28b   :  { %vm2707_vm3 = vcmp.ge.f32.partialorder %v2598_v22, 0.0  ;;  %v2739_v1 = vmul.f32 0.1, %v2598_v22  ;;  %2878 = vmatprep.subr.mxu1 %v5500_v16  ;;  %v2770_v15 = vsel %vm2706_vm12, %v2596_v40, %v2738_v7  ;;  %v2724_v19 = vmul.f32 0.1, %v5492_v17 }
 0x28c   :  { %v3198_v41 = vadd.f32 %v3197_v58, %v3182_v55  ;;  %2879 = vmatpush1.msra.mxu1 %v5489_v0  ;;  %v3168_v42 = vsub.f32 %v2770_v15, %v5510_v34  ;;  %v2772_v16 = vsel %vm2708_vm13, %v2673_v52, %v2740_v4  ;;  %v2755_v30 = vsel %vm2691_vm14, %v2592_v26, %v2723_v10  ;;  %v3218_v4 = vld [vmem:[%s5856_s13 + $0x18] sm:$0xff] }
 0x28d   :  { %4326 = vmatmul.mubr.msk.f32.vlgmr.msra.gmra.mxu1 %vm959_vm5, %v5534_v53  ;;  %v2771_v8 = vsel %vm2707_vm3, %v2598_v22, %v2739_v1  ;;  %3018 = vmatprep.subr.mxu1 %v5547_v32  ;;  %v3175_v0 = vand.u32 2147483647, %v3159_v51  ;;  %vm2700_vm11 = vcmp.ge.f32.partialorder %v5424_v47, 0.0  ;;  %v3161_v34 = vsub.f32 %v2755_v30, %v5505_v45 }
 0x28e   :  { %v3199_v48 = vadd.f32 %v3198_v41, %v3183_v28  ;;  %2947 = vmatprep.subr.mxu0 %v2771_v8  ;;  %v3169_v38 = vsub.f32 %v2771_v8, %v5523_v21  ;;  %v3184_v31 = vand.u32 2147483647, %v3168_v42  ;;  %3019 = vmatpush1.msra.mxu1 %v2772_v16  ;;  %v2757_v46 = vsel %vm2693_vm7, %v5497_v63, %v2725_v62 }
 0x28f   :  { %2948 = vmatpush1.msra.mxu0 %v2770_v15  ;;  %v2754_v52 = vsel %vm2690_vm9, %v5515_v23, %v2722_v6  ;;  %3054 = vmatprep.mubr.f32.mxu1 %v5885_v3  ;;  %vm2685_vm3 = vcmp.ge.f32.partialorder %v5418_v14, 0.0  ;;  %v2717_v21 = vmul.f32 0.1, %v5418_v14  ;;  %v2746_v51 = vsel %vm2682_vm15, %v5422_v36, %v5475_v57  ;;  %v3217_v6 = vld [vmem:[%s5856_s13 + $0x10] sm:$0xff] }
 0x290   :  { %v3190_v45 = vadd.f32 %v3189_v49, %v3175_v0  ;;  %2949 = vmatprep.subr.mxu0 %v2755_v30  ;;  %3020 = vmatprep.subr.mxu1 %v2757_v46  ;;  %v3185_v26 = vand.u32 2147483647, %v3169_v38  ;;  %v3200_v63 = vadd.f32 %v3199_v48, %v3184_v31  ;;  %v3160_v62 = vsub.f32 %v2754_v52, %v2746_v51 }
 0x291   :  { %2950 = vmatpush1.msra.mxu0 %v2754_v52  ;;  %v2756_v23 = vsel %vm2692_vm6, %v5492_v17, %v2724_v19  ;;  %v2748_v36 = vsel %vm2684_vm8, %v5416_v12, %v5470_v24  ;;  %v2764_v57 = vsel %vm2700_vm11, %v5424_v47, %v5478_v35  ;;  %vm2701_vm15 = vcmp.ge.f32.partialorder %v5438_v13, 0.0  ;;  %v3219_v47 = vld [vmem:[%s5858_s14] sm:$0xff] }
 0x292   :  { %v2733_v17 = vmul.f32 0.1, %v5438_v13  ;;  %3021 = vmatpush1.msra.mxu1 %v2756_v23  ;;  %4327 = vmatmul.mubr.msk.f32.vlgmr.msra.gmra.mxu0 %vm959_vm5, %v5534_v53  ;;  %v3170_v59 = vsub.f32 %v2772_v16, %v2764_v57  ;;  %v3177_v54 = vand.u32 2147483647, %v3161_v34  ;;  %v3176_v40 = vand.u32 2147483647, %v3160_v62 }
 0x293   :  { %v3162_v50 = vsub.f32 %v2756_v23, %v2748_v36  ;;  %4328 = vmatmul.mubr.msk.f32.vlgmr.msra.gmra.mxu1 %vm959_vm5, %v5534_v53  ;;  %v5899_v12 = vcombine.high %v5431_v60, %v5431_v60  ;;  %v2749_v24 = vsel %vm2685_vm3, %v5418_v14, %v2717_v21  ;;  %v5900_v35 = vcombine.high %v5436_v27, %v5436_v27 }
 0x294   :  { %v3230_v53 = vcombine.high %v3217_v6, %v3217_v6  ;;  %v3231_v10 = vcombine.high %v3218_v4, %v3218_v4  ;;  %v3163_v7 = vsub.f32 %v2757_v46, %v2749_v24  ;;  %v3191_v58 = vadd.f32 %v3190_v45, %v3176_v40  ;;  %3320 = vmatprep.mubr.f32.mxu0 %v5885_v3 }
 0x295   :  { %4329 = vmatprep.subr.msk.mxu0 %vm3239_vm10, %v5899_v12  ;;  %4333 = vmatprep.subr.msk.mxu1 %vm3239_vm10, %v5900_v35  ;;  %v3201_v22 = vadd.f32 %v3200_v63, %v3185_v26  ;;  %v2765_v14 = vsel %vm2701_vm15, %v5438_v13, %v2733_v17  ;;  %v3186_v55 = vand.u32 2147483647, %v3170_v59  ;;  %v3178_v1 = vand.u32 2147483647, %v3162_v50 }
 0x296   :  { %4330 = vmatpush1.msk.msra.mxu0 %vm3239_vm10, %v5431_v60  ;;  %4334 = vmatpush1.msk.msra.mxu1 %vm3239_vm10, %v5436_v27  ;;  %v3171_v60 = vsub.f32 %v5547_v32, %v2765_v14  ;;  %v3192_v28 = vadd.f32 %v3191_v58, %v3177_v54  ;;  %v3220_v27 = vld [vmem:[%s5858_s14 + $0x8] sm:$0xff]  ;;  %v3179_v13 = vand.u32 2147483647, %v3163_v7  ;;  %v23_v19 = vstv %s5859_s17 }
 0x297   :  { %3397 = vmatprep.mubr.f32.mxu1 %v5885_v3  ;;  %4331 = vmatmul.mubr.msk.f32.vlgmr.msra.gmra.mxu0 %vm3232_vm4, %v3219_v47  ;;  %v3202_v41 = vadd.f32 %v3201_v22, %v3186_v55  ;;  %24 = vst [vmem:[#allocation2] sm:$0x1] %v23_v19  ;;  %vm3077_vm6 = vcmask 1040384  }
 0x298   :  { %4335 = vmatmul.mubr.msk.f32.vlgmr.msra.gmra.mxu1 %vm3232_vm4, %v3219_v47  ;;  %3326 = vmatprep.mubr.f32.mxu0 %v5885_v3  ;;  %v3193_v15 = vadd.f32 %v3192_v28, %v3178_v1  ;;  %v3187_v49 = vand.u32 2147483647, %v3171_v60 }
 0x299   :  { %3403 = vmatprep.mubr.f32.mxu1 %v5885_v3  ;;  %4337 = vmatprep.subr.msk.mxu0 %vm3239_vm10, %v3230_v53 }
 0x29a   :  { %4338 = vmatpush1.msk.msra.mxu0 %vm3239_vm10, %v3217_v6  ;;  %4341 = vmatprep.subr.msk.mxu1 %vm3239_vm10, %v3231_v10  ;;  %v3194_v32 = vadd.f32 %v3193_v15, %v3179_v13  ;;  %v3203_v42 = vadd.f32 %v3202_v41, %v3187_v49 }
 0x29b   :  { %4332 = vmatmul.mubr.msk.f32.gmra.mxu0 %vm3232_vm4, %v3220_v27  ;;  %4342 = vmatpush1.msk.msra.mxu1 %vm3239_vm10, %v3218_v4 }
 0x29c   :  { %4336 = vmatmul.mubr.msk.f32.gmra.mxu1 %vm3232_vm4, %v3220_v27  ;;  %3474 = vmatprep.mubr.f32.mxu0 %v5885_v3 }
 0x29d   :  { %3551 = vmatprep.mubr.f32.mxu1 %v5885_v3  ;;  %3195 = vadd.xlane.f32.xlu0 %v3194_v32 }
 0x29f   :  { %4339 = vmatmul.mubr.msk.f32.vlgmr.msra.gmra.mxu0 %vm3232_vm4, %v3219_v47 }
 0x2a0   :  { %4343 = vmatmul.mubr.msk.f32.vlgmr.msra.gmra.mxu1 %vm3232_vm4, %v3219_v47  ;;  %3480 = vmatprep.mubr.f32.mxu0 %v5885_v3 }
 0x2a1   :  { %3557 = vmatprep.mubr.f32.mxu1 %v5885_v3  ;;  %3204 = vadd.xlane.f32.xlu0 %v3203_v42 }
 0x2a3   :  { %4340 = vmatmul.mubr.msk.f32.gmra.mxu0 %vm3232_vm4, %v3220_v27 }
 0x2a4   :  { %4344 = vmatmul.mubr.msk.f32.gmra.mxu1 %vm3232_vm4, %v3220_v27  ;;  %3682 = vmatprep.mubr.f32.mxu0 %v5885_v3 }
 0x2a5   :  { %3759 = vmatprep.mubr.f32.mxu1 %v5885_v3 }
 0x349   :  { %v2843_v8 = vpop.f32.mrf.mxu1 }
 0x34a   :  { %v3061_v16 = vsub.f32 1.0, %v2843_v8 }
 0x34b   :  { %v2845_v30 = vpop.f32.mrf.mxu1 }
 0x34c   :  { %v3069_v48 = vmul.f32 %v3061_v16, %v3061_v16  ;;  %v3062_v0 = vsub.f32 1.0, %v2845_v30 }
 0x34d   :  { %v2914_v38 = vpop.f32.mrf.mxu1 }
 0x34e   :  { %v3078_v31 = vsel %vm3077_vm6, %v3069_v48, 0.0  ;;  %v3070_v34 = vmul.f32 %v3062_v0, %v3062_v0  ;;  %v3063_v46 = vsub.f32 1.0, %v2914_v38 }
 0x34f   :  { %v2916_v52 = vpop.f32.mrf.mxu1 }
 0x350   :  { %v3079_v21 = vsel %vm3077_vm6, %v3070_v34, 0.0  ;;  %v3071_v51 = vmul.f32 %v3063_v46, %v3063_v46  ;;  %v3064_v45 = vsub.f32 1.0, %v2916_v52 }
 0x351   :  { %v3080_v26 = vadd.f32 %v3079_v21, %v3078_v31 }
 0x352   :  { %v3081_v63 = vsel %vm3077_vm6, %v3071_v51, 0.0  ;;  %v3072_v62 = vmul.f32 %v3064_v45, %v3064_v45  ;;  %v2985_v23 = vpop.f32.mrf.mxu0 }
 0x353   :  { %v3082_v6 = vadd.f32 %v3081_v63, %v3080_v26  ;;  %v3065_v4 = vsub.f32 1.0, %v2985_v23  ;;  %v3056_v36 = vpop.f32.mrf.mxu1 }
 0x354   :  { %v3083_v57 = vsel %vm3077_vm6, %v3072_v62, 0.0  ;;  %v3067_v17 = vsub.f32 1.0, %v3056_v36  ;;  %v2987_v59 = vpop.f32.mrf.mxu0 }
 0x355   :  { %v3084_v54 = vadd.f32 %v3083_v57, %v3082_v6  ;;  %v3073_v40 = vmul.f32 %v3065_v4, %v3065_v4  ;;  %v3066_v50 = vsub.f32 1.0, %v2987_v59  ;;  %v3058_v12 = vpop.f32.mrf.mxu1 }
 0x356   :  { %v3075_v47 = vmul.f32 %v3067_v17, %v3067_v17  ;;  %v3068_v24 = vsub.f32 1.0, %v3058_v12  ;;  %v5669_v17 = vld [vmem:[%s5860_s15] sm:$0xff] }
 0x357   :  { %v3322_v35 = vpop.f32.mrf.mxu0  ;;  %v3085_v53 = vsel %vm3077_vm6, %v3073_v40, 0.0  ;;  %v3074_v10 = vmul.f32 %v3066_v50, %v3066_v50 }
 0x358   :  { %v3580_v7 = vmul.f32 0.1, %v3322_v35  ;;  %v3399_v58 = vpop.f32.mrf.mxu1  ;;  %v3086_v22 = vadd.f32 %v3085_v53, %v3084_v54  ;;  %vm3564_vm4 = vcmp.ge.f32.partialorder %v3322_v35, 0.0  ;;  %v3089_v60 = vsel %vm3077_vm6, %v3075_v47, 0.0 }
 0x359   :  { %v3324_v14 = vpop.f32.mrf.mxu0  ;;  %v3087_v55 = vsel %vm3077_vm6, %v3074_v10, 0.0  ;;  %v3076_v1 = vmul.f32 %v3068_v24, %v3068_v24  ;;  %vm3566_vm7 = vcmp.ge.f32.partialorder %v3399_v58, 0.0  ;;  %v3582_v13 = vmul.f32 0.1, %v3399_v58 }
 0x35a   :  { %v3401_v28 = vpop.f32.mrf.mxu1  ;;  %v3088_v27 = vadd.f32 %v3087_v55, %v3086_v22  ;;  %v3581_v15 = vmul.f32 0.1, %v3324_v14  ;;  %vm3565_vm8 = vcmp.ge.f32.partialorder %v3324_v14, 0.0  ;;  %v5652_v42 = vsel %vm3564_vm4, %v3322_v35, %v3580_v7  ;;  %v3222_v55 = vld [vmem:[%s5860_s15 + $0x8] sm:$0xff] }
 0x35b   :  { %v3328_v41 = vpop.f32.mrf.mxu0  ;;  %vm3567_vm9 = vcmp.ge.f32.partialorder %v3401_v28, 0.0  ;;  %v3583_v49 = vmul.f32 0.1, %v3401_v28  ;;  %v3091_v38 = vsel %vm3077_vm6, %v3076_v1, 0.0  ;;  %v3598_v57 = vsel %vm3566_vm7, %v3399_v58, %v3582_v13 }
 0x35c   :  { %v3405_v32 = vpop.f32.mrf.mxu1  ;;  %v3588_v19 = vmul.f32 0.1, %v3328_v41  ;;  %v3090_v30 = vadd.f32 %v3089_v60, %v3088_v27  ;;  %vm3572_vm12 = vcmp.ge.f32.partialorder %v3328_v41, 0.0  ;;  %v3597_v46 = vsel %vm3565_vm8, %v3324_v14, %v3581_v15 }
 0x35d   :  { %vm3574_vm10 = vcmp.ge.f32.partialorder %v3405_v32, 0.0  ;;  %v3590_v8 = vmul.f32 0.1, %v3405_v32  ;;  %v3330_v16 = vpop.f32.mrf.mxu0  ;;  %v3599_v50 = vsel %vm3567_vm9, %v3401_v28, %v3583_v49 }
 0x35e   :  { %vm3573_vm13 = vcmp.ge.f32.partialorder %v3330_v16, 0.0  ;;  %v3589_v48 = vmul.f32 0.1, %v3330_v16  ;;  %v3407_v0 = vpop.f32.mrf.mxu1  ;;  %v5656_v52 = vadd.f32 %v3091_v38, %v3090_v30  ;;  %v3604_v6 = vsel %vm3572_vm12, %v3328_v41, %v3588_v19 }
 0x35f   :  { %vm3575_vm14 = vcmp.ge.f32.partialorder %v3407_v0, 0.0  ;;  %v3591_v31 = vmul.f32 0.1, %v3407_v0  ;;  %v3476_v34 = vpop.f32.mrf.mxu0  ;;  %v5659_v26 = vsel %vm3574_vm10, %v3405_v32, %v3590_v8 }
 0x360   :  { %vm3568_vm11 = vcmp.ge.f32.partialorder %v3476_v34, 0.0  ;;  %v3584_v21 = vmul.f32 0.1, %v3476_v34  ;;  %v3553_v51 = vpop.f32.mrf.mxu1  ;;  %v3605_v45 = vsel %vm3573_vm13, %v3330_v16, %v3589_v48 }
 0x361   :  { %vm3570_vm3 = vcmp.ge.f32.partialorder %v3553_v51, 0.0  ;;  %v3586_v63 = vmul.f32 0.1, %v3553_v51  ;;  %v3478_v62 = vpop.f32.mrf.mxu0  ;;  %3646 = vmatprep.subr.mxu0 %v3605_v45  ;;  %v5661_v23 = vsel %vm3575_vm14, %v3407_v0, %v3591_v31 }
 0x362   :  { %vm3569_vm15 = vcmp.ge.f32.partialorder %v3478_v62, 0.0  ;;  %v3585_v4 = vmul.f32 0.1, %v3478_v62  ;;  %v3555_v36 = vpop.f32.mrf.mxu1  ;;  %3723 = vmatprep.subr.mxu1 %v5661_v23  ;;  %3647 = vmatpush1.msra.mxu0 %v3604_v6  ;;  %v3600_v59 = vsel %vm3568_vm11, %v3476_v34, %v3584_v21 }
 0x363   :  { %vm3571_vm4 = vcmp.ge.f32.partialorder %v3555_v36, 0.0  ;;  %v3587_v54 = vmul.f32 0.1, %v3555_v36  ;;  %3724 = vmatpush1.msra.mxu1 %v5659_v26  ;;  %v3482_v40 = vpop.f32.mrf.mxu0  ;;  %3648 = vmatprep.subr.mxu0 %v3597_v46  ;;  %v3602_v12 = vsel %vm3570_vm3, %v3553_v51, %v3586_v63  ;;  %v4139_v53 = vsub.f32 %v3600_v59, %v5652_v42 }
 0x364   :  { %vm3576_vm8 = vcmp.ge.f32.partialorder %v3482_v40, 0.0  ;;  %v3592_v47 = vmul.f32 0.1, %v3482_v40  ;;  %v3559_v24 = vpop.f32.mrf.mxu1  ;;  %3725 = vmatprep.subr.mxu1 %v3599_v50  ;;  %3649 = vmatpush1.msra.mxu0 %v5652_v42  ;;  %v3601_v35 = vsel %vm3569_vm15, %v3478_v62, %v3585_v4  ;;  %v4141_v28 = vsub.f32 %v3602_v12, %v3598_v57 }
 0x365   :  { %vm3578_vm7 = vcmp.ge.f32.partialorder %v3559_v24, 0.0  ;;  %v3594_v10 = vmul.f32 0.1, %v3559_v24  ;;  %3726 = vmatpush1.msra.mxu1 %v3598_v57  ;;  %v3484_v7 = vpop.f32.mrf.mxu0  ;;  %4345 = vmatmul.mubr.msk.f32.vlgmr.msra.gmra.mxu0 %vm959_vm5, %v5669_v17  ;;  %v4140_v58 = vsub.f32 %v3601_v35, %v3597_v46  ;;  %v3603_v22 = vsel %vm3571_vm4, %v3555_v36, %v3587_v54 }
 0x366   :  { %vm3577_vm9 = vcmp.ge.f32.partialorder %v3484_v7, 0.0  ;;  %v3593_v14 = vmul.f32 0.1, %v3484_v7  ;;  %v3561_v60 = vpop.f32.mrf.mxu1  ;;  %4347 = vmatmul.mubr.msk.f32.vlgmr.msra.gmra.mxu1 %vm959_vm5, %v5669_v17  ;;  %3688 = vmatprep.mubr.f32.mxu0 %v5885_v3  ;;  %v3608_v1 = vsel %vm3576_vm8, %v3482_v40, %v3592_v47  ;;  %v4142_v32 = vsub.f32 %v3603_v22, %v3599_v50 }
 0x367   :  { %vm3579_vm10 = vcmp.ge.f32.partialorder %v3561_v60, 0.0  ;;  %v3595_v27 = vmul.f32 0.1, %v3561_v60  ;;  %3765 = vmatprep.mubr.f32.mxu1 %v5885_v3  ;;  %v4143_v13 = vsub.f32 %v3608_v1, %v3604_v6  ;;  %v3610_v15 = vsel %vm3578_vm7, %v3559_v24, %v3594_v10 }
 0x368   :  { %v3609_v41 = vsel %vm3577_vm9, %v3484_v7, %v3593_v14  ;;  %v4148_v49 = vand.u32 2147483647, %v4140_v58  ;;  %v4145_v8 = vsub.f32 %v3610_v15, %v5659_v26  ;;  %v4147_v16 = vand.u32 2147483647, %v4139_v53 }
 0x369   :  { %4346 = vmatmul.mubr.msk.f32.gmra.mxu0 %vm959_vm5, %v3222_v55  ;;  %3800 = vmatprep.subr.mxu0 %v3609_v41  ;;  %v4144_v42 = vsub.f32 %v3609_v41, %v3605_v45  ;;  %v3611_v19 = vsel %vm3579_vm10, %v3561_v60, %v3595_v27  ;;  %v4151_v30 = vand.u32 2147483647, %v4143_v13  ;;  %v4149_v38 = vand.u32 2147483647, %v4141_v28 }
 0x36a   :  { %4348 = vmatmul.mubr.msk.f32.gmra.mxu1 %vm959_vm5, %v3222_v55  ;;  %3877 = vmatprep.subr.mxu1 %v3611_v19  ;;  %v4146_v0 = vsub.f32 %v3611_v19, %v5661_v23  ;;  %v4155_v31 = vadd.f32 %v4148_v49, %v4147_v16  ;;  %v4153_v34 = vand.u32 2147483647, %v4145_v8  ;;  %v4150_v46 = vand.u32 2147483647, %v4142_v32 }
 0x36b   :  { %v4152_v48 = vand.u32 2147483647, %v4144_v42  ;;  %3801 = vmatpush1.msra.mxu0 %v3608_v1  ;;  %3878 = vmatpush1.msra.mxu1 %v3610_v15  ;;  %v209_v23 = vand.u32 2147483647, %v4953_v5  ;;  %v213_v6 = vand.u32 2147483647, %v4989_v25 }
 0x36c   :  { %3802 = vmatprep.subr.mxu0 %v3601_v35  ;;  %3879 = vmatprep.subr.mxu1 %v3603_v22  ;;  %v4156_v21 = vadd.f32 %v4155_v31, %v4149_v38  ;;  %v4154_v45 = vand.u32 2147483647, %v4146_v0 }
 0x36d   :  { %3803 = vmatpush1.msra.mxu0 %v3600_v59  ;;  %3836 = vmatprep.mubr.f32.mxu0 %v5885_v3  ;;  %v4160_v51 = vadd.f32 %v4152_v48, %v4151_v30  ;;  %v217_v4 = vadd.f32 1e-05, %v209_v23  ;;  %v221_v36 = vadd.f32 1e-05, %v213_v6 }
 0x36e   :  { %3880 = vmatpush1.msra.mxu1 %v3602_v12  ;;  %3913 = vmatprep.mubr.f32.mxu1 %v5885_v3  ;;  %v4157_v26 = vadd.f32 %v4156_v21, %v4150_v46 }
 0x36f   :  { %4349 = vmatmul.mubr.msk.f32.vlgmr.msra.gmra.mxu0 %vm959_vm5, %v5669_v17  ;;  %4351 = vmatmul.mubr.msk.f32.vlgmr.msra.gmra.mxu1 %vm959_vm5, %v5669_v17  ;;  %v4161_v63 = vadd.f32 %v4160_v51, %v4153_v34  ;;  %4558 = vlog2.f32 %v217_v4 }
 0x370   :  { %3842 = vmatprep.mubr.f32.mxu0 %v5885_v3  ;;  %3919 = vmatprep.mubr.f32.mxu1 %v5885_v3  ;;  %4560 = vlog2.f32 %v221_v36 }
 0x371   :  { %4158 = vadd.xlane.f32.xlu1 %v4157_v26  ;;  %v4162_v62 = vadd.f32 %v4161_v63, %v4154_v45 }
 0x373   :  { %4350 = vmatmul.mubr.msk.f32.gmra.mxu0 %vm959_vm5, %v3222_v55  ;;  %4352 = vmatmul.mubr.msk.f32.gmra.mxu1 %vm959_vm5, %v3222_v55 }
 0x374   :  { %4163 = vadd.xlane.f32.xlu0 %v4162_v62  ;;  %4041 = vmatprep.mubr.f32.mxu0 %v5885_v3 }
 0x375   :  { %4112 = vmatprep.mubr.f32.mxu1 %v5885_v3 }
 0x37c   :  { %v4559_v50 = vpop.eup %4558 }
 0x37d   :  { %v4561_v47 = vpop.eup %4560  ;;  %v5712_v7 = vmul.f32 0.6931472, %v4559_v50 }
 0x37e   :  { %v5714_v58 = vmul.f32 0.6931472, %v4561_v47 }
 0x425   :  { %v3684_v57 = vpop.f32.mrf.mxu0 }
 0x426   :  { %v3761_v17 = vpop.f32.mrf.mxu1  ;;  %v3942_v24 = vmul.f32 0.1, %v3684_v57  ;;  %vm3926_vm12 = vcmp.ge.f32.partialorder %v3684_v57, 0.0 }
 0x427   :  { %v3686_v59 = vpop.f32.mrf.mxu0  ;;  %v3944_v35 = vmul.f32 0.1, %v3761_v17  ;;  %vm3928_vm13 = vcmp.ge.f32.partialorder %v3761_v17, 0.0 }
 0x428   :  { %v5708_v54 = vpop.f32.mrf.mxu1  ;;  %v3943_v5 = vmul.f32 0.1, %v3686_v59  ;;  %vm3927_vm14 = vcmp.ge.f32.partialorder %v3686_v59, 0.0  ;;  %v3958_v22 = vsel %vm3926_vm12, %v3684_v57, %v3942_v24 }
 0x429   :  { %v3690_v40 = vpop.f32.mrf.mxu0  ;;  %v5716_v14 = vsel %vm3928_vm13, %v3761_v17, %v3944_v35  ;;  %vm3929_vm15 = vcmp.ge.f32.partialorder %v5708_v54, 0.0  ;;  %v3945_v60 = vmul.f32 0.1, %v5708_v54 }
 0x42a   :  { %v3767_v12 = vpop.f32.mrf.mxu1  ;;  %v3950_v25 = vmul.f32 0.1, %v3690_v40  ;;  %vm3934_vm11 = vcmp.ge.f32.partialorder %v3690_v40, 0.0  ;;  %v3959_v28 = vsel %vm3927_vm14, %v3686_v59, %v3943_v5 }
 0x42b   :  { %v3692_v3 = vpop.f32.mrf.mxu0  ;;  %v3952_v10 = vmul.f32 0.1, %v3767_v12  ;;  %vm3936_vm3 = vcmp.ge.f32.partialorder %v3767_v12, 0.0  ;;  %v3961_v50 = vsel %vm3929_vm15, %v5708_v54, %v3945_v60 }
 0x42c   :  { %v5710_v53 = vpop.f32.mrf.mxu1  ;;  %v3966_v27 = vsel %vm3934_vm11, %v3690_v40, %v3950_v25  ;;  %vm3935_vm8 = vcmp.ge.f32.partialorder %v3692_v3, 0.0  ;;  %v3951_v41 = vmul.f32 0.1, %v3692_v3  ;;  %v3223_v25 = vld [vmem:[%s5861_s16] sm:$0x1] }
 0x42d   :  { %v3968_v15 = vsel %vm3936_vm3, %v3767_v12, %v3952_v10  ;;  %vm3937_vm7 = vcmp.ge.f32.partialorder %v5710_v53, 0.0  ;;  %v3953_v8 = vmul.f32 0.1, %v5710_v53 }
 0x42e   :  { %v3967_v34 = vsel %vm3935_vm8, %v3692_v3, %v3951_v41 }
 0x42f   :  { %v3838_v55 = vpop.f32.mrf.mxu0  ;;  %v3915_v1 = vpop.f32.mrf.mxu1  ;;  %v3969_v35 = vsel %vm3937_vm7, %v5710_v53, %v3953_v8 }
 0x430   :  { %vm3930_vm4 = vcmp.ge.f32.partialorder %v3838_v55, 0.0  ;;  %v3946_v13 = vmul.f32 0.1, %v3838_v55  ;;  %v3948_v49 = vmul.f32 0.1, %v3915_v1  ;;  %vm3932_vm9 = vcmp.ge.f32.partialorder %v3915_v1, 0.0 }
 0x431   :  { %v3840_v32 = vpop.f32.mrf.mxu0  ;;  %v3917_v42 = vpop.f32.mrf.mxu1 }
 0x432   :  { %vm3931_vm10 = vcmp.ge.f32.partialorder %v3840_v32, 0.0  ;;  %v3947_v19 = vmul.f32 0.1, %v3840_v32  ;;  %vm3933_vm12 = vcmp.ge.f32.partialorder %v3917_v42, 0.0  ;;  %v3949_v16 = vmul.f32 0.1, %v3917_v42 }
 0x433   :  { %v3844_v30 = vpop.f32.mrf.mxu0  ;;  %v3921_v48 = vpop.f32.mrf.mxu1  ;;  %v3962_v0 = vsel %vm3930_vm4, %v3838_v55, %v3946_v13  ;;  %v3964_v26 = vsel %vm3932_vm9, %v3915_v1, %v3948_v49  ;;  %v241_v1 = vsub.f32 %v5712_v7, %v5714_v58  ;;  %v1121_v7 = vsel %vm959_vm5, %v4987_v20, 0.0 }
 0x434   :  { %vm3938_vm13 = vcmp.ge.f32.partialorder %v3844_v30, 0.0  ;;  %v3954_v38 = vmul.f32 0.1, %v3844_v30  ;;  %vm3940_vm14 = vcmp.ge.f32.partialorder %v3921_v48, 0.0  ;;  %v3956_v31 = vmul.f32 0.1, %v3921_v48 }
 0x435   :  { %v3846_v46 = vpop.f32.mrf.mxu0  ;;  %v3923_v21 = vpop.f32.mrf.mxu1  ;;  %v3963_v51 = vsel %vm3931_vm10, %v3840_v32, %v3947_v19  ;;  %v4174_v45 = vsub.f32 %v3962_v0, %v3958_v22  ;;  %v3965_v36 = vsel %vm3933_vm12, %v3917_v42, %v3949_v16  ;;  %v4176_v40 = vsub.f32 %v3964_v26, %v5716_v14 }
 0x436   :  { %vm3939_vm11 = vcmp.ge.f32.partialorder %v3846_v46, 0.0  ;;  %v3955_v63 = vmul.f32 0.1, %v3846_v46  ;;  %vm3941_vm3 = vcmp.ge.f32.partialorder %v3923_v21, 0.0  ;;  %v3957_v62 = vmul.f32 0.1, %v3923_v21 }
 0x437   :  { %v3970_v23 = vsel %vm3938_vm13, %v3844_v30, %v3954_v38  ;;  %v3972_v6 = vsel %vm3940_vm14, %v3921_v48, %v3956_v31  ;;  %v4175_v4 = vsub.f32 %v3963_v51, %v3959_v28  ;;  %v4177_v3 = vsub.f32 %v3965_v36, %v3961_v50  ;;  %v5903_v38 = vld [vmem:[#allocation6_spill] sm:$0xff] }
 0x438   :  { %v3971_v57 = vsel %vm3939_vm11, %v3846_v46, %v3955_v63  ;;  %v3973_v17 = vsel %vm3941_vm3, %v3923_v21, %v3957_v62  ;;  %v4178_v59 = vsub.f32 %v3970_v23, %v3966_v27  ;;  %v4180_v47 = vsub.f32 %v3972_v6, %v3968_v15  ;;  %v5905_v46 = vld [vmem:[#allocation4_spill] sm:$0xff]  ;;  %v3146_v62 = vpop.xlane.xlu1 %3145 }
 0x439   :  { %4005 = vmatprep.subr.mxu0 %v3971_v57  ;;  %v4179_v12 = vsub.f32 %v3971_v57, %v3967_v34  ;;  %4076 = vmatprep.subr.mxu1 %v3973_v17  ;;  %v4183_v24 = vand.u32 2147483647, %v4175_v4  ;;  %v4182_v5 = vand.u32 2147483647, %v4174_v45  ;;  %v4181_v22 = vsub.f32 %v3973_v17, %v3969_v35  ;;  %v3137_v45 = vpop.xlane.xlu0 %3136 }
 0x43a   :  { %4006 = vmatpush1.msra.mxu0 %v3970_v23  ;;  %4077 = vmatpush1.msra.mxu1 %v3972_v6  ;;  %v4186_v54 = vand.u32 2147483647, %v4178_v59  ;;  %v4184_v14 = vand.u32 2147483647, %v4176_v40  ;;  %v4188_v55 = vand.u32 2147483647, %v4180_v47  ;;  %v5901_v42 = vsub.f32 %v4967_v33, %v4969_v2 }
 0x43b   :  { %v4187_v10 = vand.u32 2147483647, %v4179_v12  ;;  %4007 = vmatprep.subr.mxu0 %v3963_v51  ;;  %4078 = vmatprep.subr.mxu1 %v3965_v36  ;;  %v4190_v60 = vadd.f32 %v4183_v24, %v4182_v5  ;;  %v4185_v28 = vand.u32 2147483647, %v4177_v3  ;;  %v4189_v13 = vand.u32 2147483647, %v4181_v22 }
 0x43c   :  { %4008 = vmatpush1.msra.mxu0 %v3962_v0  ;;  %4079 = vmatpush1.msra.mxu1 %v3964_v26  ;;  %v245_v32 = vand.u32 2147483647, %v241_v1  ;;  %v246_v19 = vand.u32 2147483647, %v5901_v42  ;;  %v1124_v58 = vsel %vm959_vm5, %v4984_v18, 0.0  ;;  %v1127_v30 = vsel %vm959_vm5, %v4995_v9, 0.0  ;;  %v5776_v6 = vpop.xlane.xlu1 %1029 }
 0x43d   :  { %4353 = vmatmul.mubr.msk.f32.vlgmr.msra.gmra.mxu0 %vm959_vm5, %v3223_v25  ;;  %4354 = vmatmul.mubr.msk.f32.vlgmr.msra.gmra.mxu1 %vm959_vm5, %v3223_v25  ;;  %v4195_v53 = vadd.f32 %v4187_v10, %v4186_v54  ;;  %v4191_v27 = vadd.f32 %v4190_v60, %v4184_v14  ;;  %v444_v33 = vrot.slane %v5463_v43, %v5387_v44  ;;  %v5902_v0 = vld [vmem:[#allocation3_spill] sm:$0xff]  ;;  %v1137_v9 = vsel %vm959_vm5, %v5903_v38, 0.0  ;;  %v5774_v26 = vpop.xlane.xlu0 %1064 }
 0x43e   :  { %v254_v8 = vsel %vm247_vm0, %v245_v32, 0.0  ;;  %v257_v16 = vsel %vm247_vm0, %v246_v19, 0.0  ;;  %v439_v2 = vrot.slane %v5420_v56, %v5384_v11  ;;  %v450_v48 = vrot.slane %v5442_v39, %v5384_v11  ;;  %v5904_v56 = vld [vmem:[#allocation5_spill] sm:$0xff] }
 0x43f   :  { %v4196_v15 = vadd.f32 %v4195_v53, %v4188_v55  ;;  %v4192_v41 = vadd.f32 %v4191_v27, %v4185_v28  ;;  %v454_v20 = vrot.slane %v5482_v29, %v5387_v44  ;;  %v1130_v18 = vsel %vm959_vm5, %v5902_v0, 0.0 }
 0x440   :  { %v446_v31 = vsel %vm445_vm1, %v444_v33, %v439_v2  ;;  %v1140_v34 = vsel %vm959_vm5, %v5904_v56, 0.0  ;;  %v1143_v29 = vsel %vm959_vm5, %v5315_v61, 0.0  ;;  %v1146_v21 = vsel %vm959_vm5, %v5905_v46, 0.0  ;;  %v4159_v57 = vpop.xlane.xlu1 %4158  ;;  %v5907_v2 = vld [vmem:[#allocation8_spill] sm:$0xff] }
 0x441   :  { %v4197_v49 = vadd.f32 %v4196_v15, %v4189_v13  ;;  %4193 = vadd.xlane.f32.xlu1 %v4192_v41  ;;  %v455_v43 = vsel %vm445_vm1, %v454_v20, %v450_v48  ;;  %vm5906_vm0 = vcmask 123904   ;;  %v3196_v63 = vpop.xlane.xlu0 %3195  ;;  %v3147_v36 = vadd.f32 %v3146_v62, %v3137_v45  ;;  %v5908_v48 = vld [vmem:[#allocation9_spill] sm:$0xff] }
 0x442   :  { %v457_v39 = vsel %vm456_vm2, %v455_v43, %v446_v31  ;;  %v1092_v20 = vrot.slane %v5908_v48, %v5387_v44  ;;  %vm5909_vm5 = vmmov %vm5906_vm0  ;;  %4562 = vlog2.f32 %v5774_v26 }
 0x443   :  { %4198 = vadd.xlane.f32.xlu0 %v4197_v49  ;;  %v460_v51 = vsel %vm5906_vm0, %v457_v39, 0.0  ;;  %v3148_v40 = vrot.slane %v3147_v36, 4  ;;  %vm5911_vm15 = vmmov %vm5906_vm0  ;;  %4564 = vlog2.f32 %v5776_v6 }
 0x444   :  { %vm5912_vm4 = vmmov %vm5906_vm0 }
 0x445   :  { %255 = vadd.xlane.f32.xlu1 %v254_v8  ;;  %v3205_v23 = vpop.xlane.xlu0 %3204  ;;  %v3149_v47 = vadd.f32 %v3148_v40, %v3147_v36 }
 0x446   :  { %v3206_v4 = vadd.f32 %v3205_v23, %v3196_v63  ;;  %v5910_v23 = vld [vmem:[#allocation10_spill] sm:$0xff] }
 0x447   :  { %258 = vadd.xlane.f32.xlu0 %v257_v16  ;;  %v3150_v35 = vrot.slane %v3149_v47, 2 }
 0x448   :  { %v3207_v59 = vrot.slane %v3206_v4, 4 }
 0x449   :  { %1122 = vadd.xlane.f32.xlu1 %v1121_v7  ;;  %v4164_v61 = vpop.xlane.xlu0 %4163  ;;  %v3151_v54 = vadd.f32 %v3150_v35, %v3149_v47 }
 0x44a   :  { %v4165_v17 = vadd.f32 %v4164_v61, %v4159_v57  ;;  %v3208_v12 = vadd.f32 %v3207_v59, %v3206_v4 }
 0x44b   :  { %1125 = vadd.xlane.f32.xlu0 %v1124_v58  ;;  %v3152_v13 = vrot.slane %v3151_v54, 1 }
 0x44c   :  { %v4166_v50 = vrot.slane %v4165_v17, 4 }
 0x44d   :  { %1128 = vadd.xlane.f32.xlu1 %v1127_v30  ;;  %v3153_v16 = vadd.f32 %v3152_v13, %v3151_v54 }
 0x44e   :  { %v4167_v24 = vadd.f32 %v4166_v50, %v4165_v17 }
 0x44f   :  { %1131 = vadd.xlane.f32.xlu0 %v1130_v18  ;;  %v3155_v56 = vmul.f32 6.1035156e-05, %v3153_v16 }
 0x450   :  { %v4168_v3 = vrot.slane %v4167_v24, 2 }
 0x451   :  { %1138 = vadd.xlane.f32.xlu1 %v1137_v9 }
 0x452   :  { %v4169_v14 = vadd.f32 %v4168_v3, %v4167_v24 }
 0x453   :  { %1141 = vadd.xlane.f32.xlu0 %v1140_v34 }
 0x454   :  { %v4170_v41 = vrot.slane %v4169_v14, 1 }
 0x455   :  { %1144 = vadd.xlane.f32.xlu1 %v1143_v29 }
 0x456   :  { %v4171_v7 = vadd.f32 %v4170_v41, %v4169_v14 }
 0x457   :  { %1147 = vadd.xlane.f32.xlu0 %v1146_v21 }
 0x458   :  { %v4173_v34 = vmul.f32 0.00012207031, %v4171_v7 }
 0x459   :  { %461 = vadd.xlane.f32.xlu1 %v460_v51 }
 0x45b   :  { %3093 = vadd.xlane.f32.xlu0 %v5656_v52  ;;  %v3209_v52 = vrot.slane %v3208_v12, 2 }
 0x45d   :  { %v3210_v25 = vadd.f32 %v3209_v52, %v3208_v12 }
 0x45f   :  { %v3211_v53 = vrot.slane %v3210_v25, 1 }
 0x461   :  { %v3212_v42 = vadd.f32 %v3211_v53, %v3210_v25 }
 0x463   :  { %v3213_v0 = vmul.f32 6.1035156e-05, %v3212_v42 }
 0x465   :  { %v3214_v51 = vadd.f32 %v3213_v0, %v3155_v56 }
 0x4ca   :  { %v4194_v5 = vpop.xlane.xlu1 %4193 }
 0x4cc   :  { %v4199_v10 = vpop.xlane.xlu0 %4198 }
 0x4cd   :  { %v4200_v22 = vadd.f32 %v4199_v10, %v4194_v5 }
 0x4ce   :  { %v256_v55 = vpop.xlane.xlu1 %255 }
 0x4cf   :  { %v4201_v60 = vrot.slane %v4200_v22, 4  ;;  %v261_v1 = vadd.f32 %v5512_v37, %v256_v55  ;;  %v1088_v37 = vrot.slane %v5907_v2, %v5384_v11 }
 0x4d0   :  { %v259_v28 = vpop.xlane.xlu0 %258 }
 0x4d1   :  { %v4202_v27 = vadd.f32 %v4201_v60, %v4200_v22  ;;  %v5779_v15 = vadd.f32 %v261_v1, %v259_v28  ;;  %v1093_v62 = vsel %vm445_vm1, %v1092_v20, %v1088_v37 }
 0x4d2   :  { %v1123_v32 = vpop.xlane.xlu1 %1122  ;;  %v1103_v4 = vsel %vm456_vm2, %v5910_v23, %v1093_v62 }
 0x4d3   :  { %v4203_v49 = vrot.slane %v4202_v27, 2  ;;  %v1156_v9 = vrot.slane %v1123_v32, %v5384_v11  ;;  %v1105_v36 = vsel %vm5911_vm15, %v1103_v4, 0.0  ;;  %v263_v2 = vrot.slane %v5779_v15, 4 }
 0x4d4   :  { %v1126_v19 = vpop.xlane.xlu0 %1125 }
 0x4d5   :  { %v4204_v8 = vadd.f32 %v4203_v49, %v4202_v27  ;;  %v1160_v30 = vrot.slane %v1126_v19, %v5387_v44  ;;  %v264_v48 = vadd.f32 %v263_v2, %v5779_v15 }
 0x4d6   :  { %v1129_v33 = vpop.xlane.xlu1 %1128 }
 0x4d7   :  { %v4205_v58 = vrot.slane %v4204_v8, 1  ;;  %v1165_v31 = vrot.slane %v1129_v33, %v5384_v11  ;;  %v1161_v29 = vsel %vm445_vm1, %v1160_v30, %v1156_v9 }
 0x4d8   :  { %v1132_v18 = vpop.xlane.xlu0 %1131 }
 0x4d9   :  { %v4206_v38 = vadd.f32 %v4205_v58, %v4204_v8  ;;  %v1169_v43 = vrot.slane %v1132_v18, %v5387_v44  ;;  %v265_v18 = vrot.slane %v264_v48, 2 }
 0x4da   :  { %v1139_v17 = vpop.xlane.xlu1 %1138 }
 0x4db   :  { %v4207_v39 = vmul.f32 0.00012207031, %v4206_v38  ;;  %v1170_v46 = vsel %vm445_vm1, %v1169_v43, %v1165_v31  ;;  %v1191_v41 = vrot.slane %v1139_v17, %v5384_v11  ;;  %v266_v6 = vadd.f32 %v265_v18, %v264_v48 }
 0x4dc   :  { %v1171_v21 = vsel %vm456_vm2, %v1170_v46, %v1161_v29  ;;  %v1142_v57 = vpop.xlane.xlu0 %1141 }
 0x4dd   :  { %v4208_v45 = vadd.f32 %v4207_v39, %v4173_v34  ;;  %v1173_v63 = vsel %vm5909_vm5, %v1171_v21, 0.0  ;;  %v1195_v28 = vrot.slane %v1142_v57, %v5387_v44  ;;  %v267_v43 = vrot.slane %v266_v6, 1 }
 0x4de   :  { %1174 = vadd.xlane.f32.xlu0 %v1173_v63  ;;  %v1145_v22 = vpop.xlane.xlu1 %1144 }
 0x4df   :  { %v5796_v61 = vadd.f32 %v4208_v45, %v3214_v51  ;;  %v1200_v27 = vrot.slane %v1145_v22, %v5384_v11  ;;  %v1196_v19 = vsel %vm445_vm1, %v1195_v28, %v1191_v41  ;;  %v268_v39 = vadd.f32 %v267_v43, %v266_v6 }
 0x4e0   :  { %v1148_v52 = vpop.xlane.xlu0 %1147 }
 0x4e1   :  { %v1204_v54 = vrot.slane %v1148_v52, %v5387_v44  ;;  %v4563_v44 = vpop.eup %4562  ;;  %4566 = vrcp.f32 %v5796_v61  ;;  %v5818_v51 = vmul.f32 0.0009765625, %v268_v39 }
 0x4e2   :  { %1106 = vadd.xlane.f32.xlu0 %v1105_v36  ;;  %v4565_v7 = vpop.eup %4564  ;;  %v1069_v11 = vmul.f32 0.6931472, %v4563_v44  ;;  %v462_v0 = vpop.xlane.xlu1 %461 }
 0x4e3   :  { %v1205_v32 = vsel %vm445_vm1, %v1204_v54, %v1200_v27  ;;  %v1067_v58 = vmul.f32 0.6931472, %v4565_v7 }
 0x4e4   :  { %v1206_v8 = vsel %vm456_vm2, %v1205_v32, %v1196_v19  ;;  %v3094_v45 = vpop.xlane.xlu0 %3093 }
 0x4e5   :  { %v1208_v16 = vsel %vm5912_vm4, %v1206_v8, 0.0  ;;  %v1070_v30 = vadd.f32 %v1069_v11, %v1067_v58  ;;  %v3096_v4 = vmul.f32 0.0009765625, %v3094_v45 }
 0x4ee   :  { %v4567_v21 = vpop.eup %4566 }
 0x4ef   :  { %v5821_v63 = vmul.f32 %v4567_v21, %v5818_v51 }
 0x4f1   :  { %v4214_v17 = vmul.f32 %v5821_v63, %v5796_v61 }
 0x4fd   :  { %v4043_v59 = vpop.f32.mrf.mxu0  ;;  %v4114_v40 = vpop.f32.mrf.mxu1 }
 0x4fe   :  { %v4119_v50 = vsub.f32 1.0, %v4043_v59  ;;  %v4121_v12 = vsub.f32 1.0, %v4114_v40 }
 0x4ff   :  { %v4045_v47 = vpop.f32.mrf.mxu0  ;;  %v4116_v24 = vpop.f32.mrf.mxu1 }
 0x500   :  { %v4123_v35 = vmul.f32 %v4119_v50, %v4119_v50  ;;  %v4120_v3 = vsub.f32 1.0, %v4045_v47  ;;  %v4125_v5 = vmul.f32 %v4121_v12, %v4121_v12  ;;  %v4122_v25 = vsub.f32 1.0, %v4116_v24  ;;  %v4211_v50 = vld [vmem:[#allocation2] sm:$0x1] }
 0x502   :  { %v4124_v10 = vmul.f32 %v4120_v3, %v4120_v3  ;;  %v4127_v14 = vsel %vm3077_vm6, %v4123_v35, 0.0  ;;  %v4130_v55 = vsel %vm3077_vm6, %v4125_v5, 0.0  ;;  %v4126_v53 = vmul.f32 %v4122_v25, %v4122_v25 }
 0x504   :  { %v4128_v60 = vsel %vm3077_vm6, %v4124_v10, 0.0  ;;  %v4132_v49 = vsel %vm3077_vm6, %v4126_v53, 0.0  ;;  %vm5913_vm6 = vcmask 1041408  }
 0x505   :  { %v4129_v1 = vadd.f32 %v4128_v60, %v4127_v14  ;;  %v1071_v33 = vsel %vm5913_vm6, %v1070_v30, 0.0  ;;  %vm5914_vm1 = vmmov %vm5913_vm6 }
 0x506   :  { %v1072_v37 = vrot.slane %v1071_v33, 4  ;;  %v464_v38 = vsel %vm5914_vm1, %v462_v0, 0.0  ;;  %vm5915_vm2 = vmmov %vm5914_vm1 }
 0x507   :  { %v4131_v13 = vadd.f32 %v4130_v55, %v4129_v1  ;;  %v465_v9 = vrot.slane %v464_v38, 4  ;;  %vm5916_vm8 = vmmov %vm5914_vm1 }
 0x508   :  { %v1073_v20 = vadd.f32 %v1072_v37, %v1071_v33  ;;  %vm5917_vm7 = vmmov %vm5914_vm1 }
 0x509   :  { %v4133_v42 = vadd.f32 %v4132_v49, %v4131_v13  ;;  %v466_v56 = vadd.f32 %v465_v9, %v464_v38 }
 0x50a   :  { %v1074_v26 = vrot.slane %v1073_v20, 2 }
 0x50b   :  { %4134 = vadd.xlane.f32.xlu1 %v4133_v42  ;;  %v467_v29 = vrot.slane %v466_v56, 2 }
 0x50c   :  { %v1075_v31 = vadd.f32 %v1074_v26, %v1073_v20  ;;  %v5918_v20 = vld [vmem:[#allocation7_spill] sm:$0xff] }
 0x50d   :  { %v468_v15 = vadd.f32 %v467_v29, %v466_v56  ;;  %vm4220_vm9 = vcmp.eq.s32.totalorder %v5918_v20, 0  ;;  %vm4227_vm10 = vcmp.eq.s32.totalorder %v5918_v20, 1  ;;  %vm4229_vm12 = vcmp.eq.s32.totalorder %v5918_v20, 2 }
 0x50e   :  { %v1076_v34 = vrot.slane %v1075_v31, 1  ;;  %vm4231_vm13 = vcmp.eq.s32.totalorder %v5918_v20, 3  ;;  %vm4233_vm14 = vcmp.eq.s32.totalorder %v5918_v20, 4  ;;  %vm4235_vm11 = vcmp.eq.s32.totalorder %v5918_v20, 5 }
 0x50f   :  { %1209 = vadd.xlane.f32.xlu1 %v1208_v16  ;;  %v469_v36 = vrot.slane %v468_v15, 1  ;;  %vm4237_vm3 = vcmp.eq.s32.totalorder %v5918_v20, 6  ;;  %vm4239_vm0 = vcmp.eq.s32.totalorder %v5918_v20, 7  ;;  %vm4241_vm5 = vcmp.eq.s32.totalorder %v5918_v20, 8 }
 0x510   :  { %v1077_v46 = vadd.f32 %v1076_v34, %v1075_v31 }
 0x511   :  { %v470_v12 = vadd.f32 %v469_v36, %v468_v15 }
 0x512   :  { %v1078_v62 = vsub.f32 0.0, %v1077_v46 }
 0x513   :  { %v472_v35 = vmul.f32 0.03125, %v470_v12 }
 0x514   :  { %v1080_v40 = vmul.f32 0.5, %v1078_v62 }
 0x516   :  { %v4217_v52 = vmul.f32 %v4211_v50, %v1080_v40 }
 0x567   :  { %v1175_v10 = vpop.xlane.xlu0 %1174 }
 0x568   :  { %v1176_v54 = vsel %vm5916_vm8, %v1175_v10, 0.0 }
 0x569   :  { %v1177_v60 = vrot.slane %v1176_v54, 4 }
 0x56b   :  { %v1107_v53 = vpop.xlane.xlu0 %1106  ;;  %v1178_v1 = vadd.f32 %v1177_v60, %v1176_v54 }
 0x56c   :  { %v1108_v28 = vsel %vm5917_vm7, %v1107_v53, 0.0 }
 0x56d   :  { %v1179_v13 = vrot.slane %v1178_v1, 2  ;;  %v1109_v41 = vrot.slane %v1108_v28, 4 }
 0x56f   :  { %v1180_v32 = vadd.f32 %v1179_v13, %v1178_v1  ;;  %v1110_v42 = vadd.f32 %v1109_v41, %v1108_v28 }
 0x571   :  { %v1181_v8 = vrot.slane %v1180_v32, 1  ;;  %v1111_v16 = vrot.slane %v1110_v42, 2 }
 0x573   :  { %v1182_v7 = vadd.f32 %v1181_v8, %v1180_v32  ;;  %v1112_v11 = vadd.f32 %v1111_v16, %v1110_v42 }
 0x575   :  { %v1183_v30 = vmul.f32 0.03125, %v1182_v7  ;;  %v1113_v33 = vrot.slane %v1112_v11, 1 }
 0x577   :  { %v1114_v37 = vadd.f32 %v1113_v33, %v1112_v11 }
 0x579   :  { %v1115_v18 = vmul.f32 0.03125, %v1114_v37 }
 0x57b   :  { %v1116_v43 = vmul.f32 0.1, %v1115_v18 }
 0x594   :  { %v4135_v23 = vpop.xlane.xlu1 %4134 }
 0x595   :  { %v4138_v57 = vmul.f32 0.001953125, %v4135_v23 }
 0x597   :  { %v4209_v59 = vadd.f32 %v4138_v57, %v3096_v4 }
 0x598   :  { %v1210_v25 = vpop.xlane.xlu1 %1209 }
 0x599   :  { %v4215_v47 = vadd.f32 %v4214_v17, %v4209_v59  ;;  %v1211_v22 = vsel %vm5915_vm2, %v1210_v25, 0.0 }
 0x59a   :  { %v1212_v14 = vrot.slane %v1211_v22, 4 }
 0x59b   :  { %v4216_v24 = vadd.f32 %v4215_v47, %v5818_v51 }
 0x59c   :  { %v1213_v55 = vadd.f32 %v1212_v14, %v1211_v22 }
 0x59d   :  { %v4218_v3 = vadd.f32 %v4217_v52, %v4216_v24 }
 0x59e   :  { %v1214_v27 = vrot.slane %v1213_v55, 2 }
 0x59f   :  { %v4219_v5 = vadd.f32 %v4218_v3, %v472_v35 }
 0x5a0   :  { %v1215_v49 = vadd.f32 %v1214_v27, %v1213_v55 }
 0x5a1   :  { %4223 = vperm.xlu1 %4447, %v4219_v5  }
 0x5a2   :  { %v1216_v19 = vrot.slane %v1215_v49, 1 }
 0x5a4   :  { %v1217_v44 = vadd.f32 %v1216_v19, %v1215_v49 }
 0x5a6   :  { %v1218_v58 = vmul.f32 0.03125, %v1217_v44 }
 0x5a8   :  { %v1219_v2 = vadd.f32 %v1218_v58, %v1183_v30 }
 0x5aa   :  { %v1220_v48 = vmul.f32 0.5, %v1219_v2 }
 0x5ac   :  { %v1222_v26 = vmul.f32 0.25, %v1220_v48 }
 0x5ae   :  { %v1223_v34 = vmul.f32 0.1, %v1222_v26 }
 0x61c   :  { %v4224_v0 = vpop.permute.xlu1 %4223 }
 0x61d   :  { %v4226_v38 = vsel %vm4220_vm9, %v4224_v0, 0.0 }
 0x61e   :  { %v4228_v6 = vsel %vm4227_vm10, %v4209_v59, %v4226_v38 }
 0x61f   :  { %v4230_v9 = vsel %vm4229_vm12, %v5796_v61, %v4228_v6 }
 0x620   :  { %v4232_v31 = vsel %vm4231_vm13, %v5818_v51, %v4230_v9 }
 0x621   :  { %v4234_v56 = vsel %vm4233_vm14, %v472_v35, %v4232_v31 }
 0x622   :  { %v4236_v39 = vsel %vm4235_vm11, %v1080_v40, %v4234_v56 }
 0x623   :  { %v4238_v29 = vsel %vm4237_vm3, %v1116_v43, %v4236_v39 }
 0x624   :  { %v4240_v46 = vsel %vm4239_vm0, %v1223_v34, %v4238_v29 }
 0x625   :  { %v4242_v21 = vsel %vm4241_vm5, %v5821_v63, %v4240_v46 }
 0x626   :  { %4243 = vst [vmem:[%s5862_s18] sm:$0x1] %v4242_v21 }

</bundles_post_ra>
